<compile_context>
chip_gen: v7x
topology: tpu7x:2x2x1
jax: 0.10.0
libtpu: 0.0.40
codegen_flags: <defaults>
</compile_context>

<pallas_src>
import functools

import jax
import jax.numpy as jnp
import numpy as np
from jax.experimental import pallas as pl
from jax.experimental.pallas import tpu as pltpu


def _round_up(v, m):
    return (v + m - 1) // m * m


def _is_v7x():
    try:
        kind = jax.devices()[0].device_kind.lower()
    except Exception:
        return False
    return ("v7" in kind) or ("7x" in kind)


def _vmem_capacity_bytes():
    try:
        return int(pltpu.get_tpu_info().vmem_capacity_bytes)
    except Exception:
        return 64 * 1024 * 1024   # conservative (v7x per-TC physical VMEM)


def _pick_row_chunk(H, Wp, Cmidp, n_taps, budget_bytes=4 << 20):
    """Largest divisor of H whose bf16 im2col chunk stays under budget_bytes."""
    bytes_per_row = Wp * n_taps * Cmidp * 2
    max_rows = max(1, budget_bytes // max(1, bytes_per_row))
    for r in range(min(H, max_rows), 0, -1):
        if H % r == 0:
            return r
    return 1


def _bottleneck_kernel(x_ref, w1_ref, b1p_ref, w2_ref, b2_ref, w3_ref, b3_ref,
                       o_ref, h1pad_ref, *, H, Wp, d, s, Rc, n_chunks, split_conv2):
    """One batch element per grid step.

    x_ref:     (1, H, Wp, Cp)   f32; valid image in columns [0, W), zeros elsewhere
    w1_ref:    (Cp, Cmidp)      bf16, BN1 scale folded in
    b1p_ref:   (1, Wp, Cmidp)   f32 conv1 bias plane, zero in padded W columns
    w2_ref:    (9*Cmidp, Cmidp) bf16, tap-major rows, BN2 scale folded in
    b2_ref:    (1, Cmidp)       f32
    w3_ref:    (Cmidp, Cp)      bf16, BN3 scale folded in
    b3_ref:    (1, Cp)          f32
    o_ref:     (1, H, Wp, Cp)   f32 output (valid columns [0, W))
    h1pad_ref: (Rtot, Cmidp)    f32 scratch: zero-padded conv1 activation, flattened
               row-major over the padded (row, col) grid, shifted by s for alignment.
    """
    Cp = x_ref.shape[-1]
    Cmidp = w1_ref.shape[1]
    HWp = H * Wp
    Rtot = h1pad_ref.shape[0]
    istart = d * Wp + d + s            # multiple of 8 by construction
    iend = istart + HWp                # also a multiple of 8 (Wp % 8 == 0)

    # Hoisted bias loads.
    b1p = b1p_ref[...]
    b2 = b2_ref[...]
    b3 = b3_ref[...]

    # --- conv1 (1x1, BN scale pre-folded) + bias + ReLU --------------------------------
    # Padded W columns get bias 0, and their matmul output is exactly 0 (input is zero
    # there), so relu gives 0 -> the conv2 halo stays zero with no extra mask pass.
    h1 = jnp.dot(x_ref[...].reshape(HWp, Cp).astype(jnp.bfloat16), w1_ref[...],
                 preferred_element_type=jnp.float32)
    h1 = jnp.maximum(h1.reshape(H, Wp, Cmidp) + b1p, 0.0).reshape(HWp, Cmidp)

    # Zero only the halo row-regions (aligned starts/lengths), then the aligned interior
    # overwrite:  scratch[(y + d) * Wp + (x + d) + s] = h1[y, x].
    h1pad_ref[0:istart, :] = jnp.zeros((istart, Cmidp), jnp.float32)
    h1pad_ref[iend:Rtot, :] = jnp.zeros((Rtot - iend, Cmidp), jnp.float32)
    h1pad_ref[istart:iend, :] = h1

    rows = Rc * Wp

    # --- conv2 (3x3, dilated) + BN2-bias + ReLU, conv3 (1x1) + bias + residual + ReLU,
    #     processed over row chunks so im2col / h2 / h3 temps stay bounded. -------------
    def process_rows(r0):
        if isinstance(r0, int):
            base = r0 * Wp
        else:
            base = pl.multiple_of(r0 * Wp, 8)      # Wp % 8 == 0

        def tap(ky, kx):
            off = base + ky * d * Wp + kx * d + s
            return h1pad_ref[pl.ds(off, rows), :].astype(jnp.bfloat16)

        if split_conv2:
            # v7x: MRB accumulates in place -> 3 matmuls of K=3*Cmid, 3x smaller im2col.
            h2 = None
            for ky in range(3):
                grp = jnp.concatenate([tap(ky, kx) for kx in range(3)], axis=1)
                part = jnp.dot(grp, w2_ref[ky * 3 * Cmidp:(ky + 1) * 3 * Cmidp, :],
                               preferred_element_type=jnp.float32)
                h2 = part if h2 is None else h2 + part
        else:
            # v5e/v6e: one matmul with K = 9*Cmid keeps the accumulation on the MXU.
            im2col = jnp.concatenate(
                [tap(ky, kx) for ky in range(3) for kx in range(3)], axis=1)
            h2 = jnp.dot(im2col, w2_ref[...], preferred_element_type=jnp.float32)
        h2 = jnp.maximum(h2 + b2, 0.0)

        h3 = jnp.dot(h2.astype(jnp.bfloat16), w3_ref[...],
                     preferred_element_type=jnp.float32)
        # Residual re-read from the resident x block (no long-lived f32 copy).
        res = x_ref[:, pl.ds(r0, Rc), :, :].reshape(rows, Cp)
        out = jnp.maximum(h3 + b3 + res, 0.0)
        o_ref[:, pl.ds(r0, Rc), :, :] = out.reshape(1, Rc, Wp, Cp).astype(o_ref.dtype)

    if n_chunks == 1:
        process_rows(0)
    elif n_chunks <= 4:
        for c in range(n_chunks):                  # static offsets, fully unrolled
            process_rows(c * Rc)
    else:
        def body(c, carry):
            process_rows(c * Rc)
            return carry
        jax.lax.fori_loop(0, n_chunks, body, 0)


@functools.partial(jax.jit, static_argnames=("dilation", "row_chunk"))
def bottleneck_forward(x_nchw, params, dilation=1, row_chunk=None):
    """x_nchw: (N, Cin, H, W) float32.  Returns (N, Cout, H, W) with Cout == Cin."""
    w1, s1, b1, w2, s2, b2, w3, s3, b3 = params
    N, Cin, H, W = x_nchw.shape
    Cmid = w1.shape[1]
    Cout = w3.shape[1]
    assert Cin == Cout, "downsample=None requires inplanes == planes*4"
    d = int(dilation)

    Cp = _round_up(Cin, 128)            # lane-dense in/out channels
    Cmidp = _round_up(Cmid, 128)        # lane-dense mid channels
    Wp = _round_up(W + 2 * d, 8)        # sublane-aligned padded width
    assert Wp >= W + 2 * d              # row-wrapped left-halo trick depends on this
    s = (-(d * Wp + d)) % 8             # aligns the interior scratch store
    HWp = H * Wp
    Rtot = _round_up((H + 2 * d) * Wp + 2 * d + s, 8)

    split_conv2 = _is_v7x()
    n_taps = 3 if split_conv2 else 9
    if row_chunk is None:
        Rc = _pick_row_chunk(H, Wp, Cmidp, n_taps)
    else:
        Rc = int(row_chunk)
        assert H % Rc == 0, "row_chunk must divide H"
    n_chunks = H // Rc

    # NCHW -> NHWC, zero-pad W (right) and channels up to lane-dense sizes.
    x = jnp.transpose(x_nchw, (0, 2, 3, 1))
    x = jnp.pad(x, ((0, 0), (0, 0), (0, Wp - W), (0, Cp - Cin)))

    # Fold the inference-BN scale into the bf16 weights (one-time wrapper cost).
    w1f = w1 * s1[0][None, :]
    w2f = w2 * s2[0][None, None, None, :]
    w3f = w3 * s3[0][None, :]
    w1p = jnp.pad(w1f, ((0, Cp - Cin), (0, Cmidp - Cmid))).astype(jnp.bfloat16)
    w2p = jnp.pad(w2f, ((0, 0), (0, 0), (0, Cmidp - Cmid), (0, Cmidp - Cmid)))
    w2r = w2p.reshape(9 * Cmidp, Cmidp).astype(jnp.bfloat16)   # tap-major rows
    w3p = jnp.pad(w3f, ((0, Cmidp - Cmid), (0, Cp - Cout))).astype(jnp.bfloat16)

    # conv1 bias as a (1, Wp, Cmidp) plane, zero in padded W columns (replaces the
    # in-kernel mask) and zero in padded channels.
    wmask = (jnp.arange(Wp) < W).astype(jnp.float32)
    b1pad = jnp.pad(b1[0], (0, Cmidp - Cmid))
    b1_plane = (wmask[:, None] * b1pad[None, :])[None]          # (1, Wp, Cmidp)
    b2p = jnp.pad(b2, ((0, 0), (0, Cmidp - Cmid)))
    b3p = jnp.pad(b3, ((0, 0), (0, Cp - Cout)))

    # Explicit VMEM limit, derived from the actual block / scratch / temp footprint and
    # clamped per-generation (v7x: 64 MiB physical; v5e/v6e: 128 MiB).
    est = (2 * 2 * HWp * Cp * 4                                  # x + out, double-buffered
           + 2 * ((Cp * Cmidp + 9 * Cmidp * Cmidp + Cmidp * Cp) * 2
                  + (Wp * Cmidp + Cmidp + Cp) * 4)               # weights / biases
           + Rtot * Cmidp * 4                                    # f32 conv1 scratch
           + Rc * Wp * n_taps * Cmidp * 2                        # bf16 im2col chunk
           + HWp * Cmidp * 4                                     # f32 conv1 accumulator
           + Rc * Wp * (Cmidp + 2 * Cp) * 4)                     # h2 / h3 / residual chunk
    vmem_cap = _vmem_capacity_bytes()
    vmem_limit = int(min(max(est + (8 << 20), 32 << 20), vmem_cap - (8 << 20)))

    kernel = functools.partial(_bottleneck_kernel, H=H, Wp=Wp, d=d, s=s,
                               Rc=Rc, n_chunks=n_chunks, split_conv2=split_conv2)
    out_p = pl.pallas_call(
        kernel,
        out_shape=jax.ShapeDtypeStruct((N, H, Wp, Cp), jnp.float32),
        grid=(N,),
        in_specs=[
            pl.BlockSpec((1, H, Wp, Cp), lambda n: (n, 0, 0, 0)),
            pl.BlockSpec((Cp, Cmidp), lambda n: (0, 0)),
            pl.BlockSpec((1, Wp, Cmidp), lambda n: (0, 0, 0)),
            pl.BlockSpec((9 * Cmidp, Cmidp), lambda n: (0, 0)),
            pl.BlockSpec((1, Cmidp), lambda n: (0, 0)),
            pl.BlockSpec((Cmidp, Cp), lambda n: (0, 0)),
            pl.BlockSpec((1, Cp), lambda n: (0, 0)),
        ],
        out_specs=pl.BlockSpec((1, H, Wp, Cp), lambda n: (n, 0, 0, 0)),
        scratch_shapes=[pltpu.VMEM((Rtot, Cmidp), jnp.float32)],
        compiler_params=pltpu.CompilerParams(
            dimension_semantics=("parallel",),
            vmem_limit_bytes=vmem_limit),
    )(x, w1p, b1_plane, w2r, b2p, w3p, b3p)

    out = out_p[:, :, :W, :Cout]              # drop W / channel padding (padded cols hold garbage)
    return jnp.transpose(out, (0, 3, 1, 2))   # -> NCHW


def _fold_bn(gamma, beta, mean, var, eps=1e-5):
    scale = gamma / jnp.sqrt(var + eps)
    bias = beta - mean * scale
    return scale.reshape(1, -1), bias.reshape(1, -1)


def _make_params(key, inplanes, planes):
    """Deterministic synthetic parameters matching BottleNeck.__init__ shapes."""
    cout = planes * 4
    ks = jax.random.split(key, 16)

    def bn(k, c):
        k1, k2, k3, k4 = jax.random.split(k, 4)
        gamma = 1.0 + 0.1 * jax.random.uniform(k1, (c,), jnp.float32)
        beta = 0.05 * jax.random.normal(k2, (c,), jnp.float32)
        mean = 0.01 * jax.random.normal(k3, (c,), jnp.float32)
        var = 1.0 + 0.1 * jax.random.uniform(k4, (c,), jnp.float32)
        return _fold_bn(gamma, beta, mean, var)

    # conv weights channels-last style: (Cin, Cout) for 1x1, (3,3,Cin,Cout) for 3x3
    w1 = 0.1 * jax.random.normal(ks[0], (inplanes, planes), jnp.float32)
    w2 = 0.1 * jax.random.normal(ks[1], (3, 3, planes, planes), jnp.float32)
    w3 = 0.1 * jax.random.normal(ks[2], (planes, cout), jnp.float32)
    s1, b1 = bn(ks[3], planes)
    s2, b2 = bn(ks[4], planes)
    s3, b3 = bn(ks[5], cout)
    return (w1, s1, b1, w2, s2, b2, w3, s3, b3)


def _reference_forward(x_nchw, params, dilation=1):
    """Pure-JAX f32 reference (lax conv) of the same forward pass."""
    w1, s1, b1, w2, s2, b2, w3, s3, b3 = params
    x = jnp.transpose(x_nchw, (0, 2, 3, 1))

    def conv(x, w, pad, dil):
        return jax.lax.conv_general_dilated(
            x, w, window_strides=(1, 1),
            padding=[(pad, pad), (pad, pad)],
            rhs_dilation=(dil, dil),
            dimension_numbers=('NHWC', 'HWIO', 'NHWC'))

    h = conv(x, w1[None, None], 0, 1) * s1[0] + b1[0]
    h = jnp.maximum(h, 0.0)
    h = conv(h, w2, dilation, dilation) * s2[0] + b2[0]
    h = jnp.maximum(h, 0.0)
    h = conv(h, w3[None, None], 0, 1) * s3[0] + b3[0]
    h = jnp.maximum(h + x, 0.0)
    return jnp.transpose(h, (0, 3, 1, 2))


if __name__ == "__main__":
    N, H, W = 2, 16, 16
    planes = 8
    inplanes = planes * 4          # residual add valid with downsample=None

    key = jax.random.PRNGKey(0)
    kx, kp = jax.random.split(key)
    x = jax.random.normal(kx, (N, inplanes, H, W), jnp.float32)   # NCHW like PyTorch
    params = _make_params(kp, inplanes, planes)

    # dilation=1 (layer1/layer2 blocks), dilation=2 (layer3 blocks), plus a forced
    # 4-way row-chunk run to exercise the chunked conv2/conv3 path.
    for dil, rc in ((1, None), (2, None), (2, 4)):
        out = jax.block_until_ready(bottleneck_forward(x, params, dilation=dil,
                                                       row_chunk=rc))
        ref = jax.block_until_ready(_reference_forward(x, params, dilation=dil))
        assert out.shape == (N, planes * 4, H, W)
        # bf16 MXU operands (f32 accumulation) -> slightly looser tolerance vs f32 ref
        np.testing.assert_allclose(np.asarray(out), np.asarray(ref),
                                   atol=1e-2, rtol=1e-2)
    print("KERNEL_OK")
</pallas_src>

<mosaic_0001>
module attributes {stable_mosaic.version = 11 : i64} {
  func.func @_bottleneck_kernel(%arg0: i32, %arg1: memref<1x16x24x128xf32, #tpu.memory_space<vmem>>, %arg2: memref<128x128xbf16, #tpu.memory_space<vmem>>, %arg3: memref<1x24x128xf32, #tpu.memory_space<vmem>>, %arg4: memref<1152x128xbf16, #tpu.memory_space<vmem>>, %arg5: memref<1x128xf32, #tpu.memory_space<vmem>>, %arg6: memref<128x128xbf16, #tpu.memory_space<vmem>>, %arg7: memref<1x128xf32, #tpu.memory_space<vmem>>, %arg8: memref<1x16x24x128xf32, #tpu.memory_space<vmem>>, %arg9: memref<448x128xf32, #tpu.memory_space<vmem>>) attributes {dimension_semantics = [#tpu.dimension_semantics<parallel>], iteration_bounds = array<i64: 2>, scalar_prefetch = 0 : i64, scratch_operands = 1 : i64, tpu.core_type = #tpu.core_type<tc>, window_params = [{transform_indices = @transform_0, window_bounds = array<i64: 1, 16, 24, 128>}, {pipeline_mode = #tpu.pipeline_mode<synchronous>, transform_indices = @transform_1, window_bounds = array<i64: 128, 128>}, {pipeline_mode = #tpu.pipeline_mode<synchronous>, transform_indices = @transform_2, window_bounds = array<i64: 1, 24, 128>}, {pipeline_mode = #tpu.pipeline_mode<synchronous>, transform_indices = @transform_3, window_bounds = array<i64: 1152, 128>}, {pipeline_mode = #tpu.pipeline_mode<synchronous>, transform_indices = @transform_4, window_bounds = array<i64: 1, 128>}, {pipeline_mode = #tpu.pipeline_mode<synchronous>, transform_indices = @transform_5, window_bounds = array<i64: 128, 128>}, {pipeline_mode = #tpu.pipeline_mode<synchronous>, transform_indices = @transform_6, window_bounds = array<i64: 1, 128>}, {transform_indices = @transform_7, window_bounds = array<i64: 1, 16, 24, 128>}]} {
    %c0 = arith.constant 0 : index
    %c0_0 = arith.constant 0 : index
    %c0_1 = arith.constant 0 : index
    %0 = vector.load %arg3[%c0, %c0_0, %c0_1] : memref<1x24x128xf32, #tpu.memory_space<vmem>>, vector<1x24x128xf32>
    %c0_2 = arith.constant 0 : index
    %c0_3 = arith.constant 0 : index
    %1 = vector.load %arg5[%c0_2, %c0_3] : memref<1x128xf32, #tpu.memory_space<vmem>>, vector<1x128xf32>
    %c0_4 = arith.constant 0 : index
    %c0_5 = arith.constant 0 : index
    %2 = vector.load %arg7[%c0_4, %c0_5] : memref<1x128xf32, #tpu.memory_space<vmem>>, vector<1x128xf32>
    %c0_6 = arith.constant 0 : index
    %c0_7 = arith.constant 0 : index
    %c0_8 = arith.constant 0 : index
    %c0_9 = arith.constant 0 : index
    %3 = vector.load %arg1[%c0_6, %c0_7, %c0_8, %c0_9] : memref<1x16x24x128xf32, #tpu.memory_space<vmem>>, vector<1x16x24x128xf32>
    %4 = vector.shape_cast %3 : vector<1x16x24x128xf32> to vector<384x128xf32>
    %5 = arith.truncf %4 : vector<384x128xf32> to vector<384x128xbf16>
    %c0_10 = arith.constant 0 : index
    %c0_11 = arith.constant 0 : index
    %6 = vector.load %arg2[%c0_10, %c0_11] : memref<128x128xbf16, #tpu.memory_space<vmem>>, vector<128x128xbf16>
    %cst = arith.constant dense<0.000000e+00> : vector<384x128xf32>
    %7 = tpu.matmul %5, %6, %cst {dimension_numbers = #tpu.dot_dimension_numbers<[1], [0], [0], [1], [0, 0, 1, 1], [], []>} : vector<384x128xbf16>, vector<128x128xbf16>, vector<384x128xf32> -> vector<384x128xf32>
    %8 = vector.shape_cast %7 : vector<384x128xf32> to vector<16x24x128xf32>
    %9 = vector.broadcast %0 : vector<1x24x128xf32> to vector<16x24x128xf32>
    %10 = arith.addf %8, %9 : vector<16x24x128xf32>
    %cst_12 = arith.constant 0.000000e+00 : f32
    %11 = vector.broadcast %cst_12 : f32 to vector<16x24x128xf32>
    %12 = arith.maximumf %10, %11 : vector<16x24x128xf32>
    %13 = vector.shape_cast %12 : vector<16x24x128xf32> to vector<384x128xf32>
    %cst_13 = arith.constant 0.000000e+00 : f32
    %14 = vector.broadcast %cst_13 : f32 to vector<32x128xf32>
    %c0_14 = arith.constant 0 : index
    %c0_15 = arith.constant 0 : index
    %15 = vector.load %arg9[%c0_14, %c0_15] : memref<448x128xf32, #tpu.memory_space<vmem>>, vector<32x128xf32>
    tpu.vector_store %arg9[%c0_14, %c0_15], %14 {strides = array<i32>} : memref<448x128xf32, #tpu.memory_space<vmem>>, vector<32x128xf32>,
    %cst_16 = arith.constant 0.000000e+00 : f32
    %16 = vector.broadcast %cst_16 : f32 to vector<32x128xf32>
    %c416 = arith.constant 416 : index
    %c0_17 = arith.constant 0 : index
    %17 = vector.load %arg9[%c416, %c0_17] : memref<448x128xf32, #tpu.memory_space<vmem>>, vector<32x128xf32>
    tpu.vector_store %arg9[%c416, %c0_17], %16 {strides = array<i32>} : memref<448x128xf32, #tpu.memory_space<vmem>>, vector<32x128xf32>,
    %c32 = arith.constant 32 : index
    %c0_18 = arith.constant 0 : index
    %18 = vector.load %arg9[%c32, %c0_18] : memref<448x128xf32, #tpu.memory_space<vmem>>, vector<384x128xf32>
    tpu.vector_store %arg9[%c32, %c0_18], %13 {strides = array<i32>} : memref<448x128xf32, #tpu.memory_space<vmem>>, vector<384x128xf32>,
    %c7 = arith.constant 7 : index
    %c0_19 = arith.constant 0 : index
    %19 = vector.load %arg9[%c7, %c0_19] : memref<448x128xf32, #tpu.memory_space<vmem>>, vector<384x128xf32>
    %20 = arith.truncf %19 : vector<384x128xf32> to vector<384x128xbf16>
    %c8 = arith.constant 8 : index
    %c0_20 = arith.constant 0 : index
    %21 = vector.load %arg9[%c8, %c0_20] : memref<448x128xf32, #tpu.memory_space<vmem>>, vector<384x128xf32>
    %22 = arith.truncf %21 : vector<384x128xf32> to vector<384x128xbf16>
    %c9 = arith.constant 9 : index
    %c0_21 = arith.constant 0 : index
    %23 = vector.load %arg9[%c9, %c0_21] : memref<448x128xf32, #tpu.memory_space<vmem>>, vector<384x128xf32>
    %24 = arith.truncf %23 : vector<384x128xf32> to vector<384x128xbf16>
    %c31 = arith.constant 31 : index
    %c0_22 = arith.constant 0 : index
    %25 = vector.load %arg9[%c31, %c0_22] : memref<448x128xf32, #tpu.memory_space<vmem>>, vector<384x128xf32>
    %26 = arith.truncf %25 : vector<384x128xf32> to vector<384x128xbf16>
    %c32_23 = arith.constant 32 : index
    %c0_24 = arith.constant 0 : index
    %27 = vector.load %arg9[%c32_23, %c0_24] : memref<448x128xf32, #tpu.memory_space<vmem>>, vector<384x128xf32>
    %28 = arith.truncf %27 : vector<384x128xf32> to vector<384x128xbf16>
    %c33 = arith.constant 33 : index
    %c0_25 = arith.constant 0 : index
    %29 = vector.load %arg9[%c33, %c0_25] : memref<448x128xf32, #tpu.memory_space<vmem>>, vector<384x128xf32>
    %30 = arith.truncf %29 : vector<384x128xf32> to vector<384x128xbf16>
    %c55 = arith.constant 55 : index
    %c0_26 = arith.constant 0 : index
    %31 = vector.load %arg9[%c55, %c0_26] : memref<448x128xf32, #tpu.memory_space<vmem>>, vector<384x128xf32>
    %32 = arith.truncf %31 : vector<384x128xf32> to vector<384x128xbf16>
    %c56 = arith.constant 56 : index
    %c0_27 = arith.constant 0 : index
    %33 = vector.load %arg9[%c56, %c0_27] : memref<448x128xf32, #tpu.memory_space<vmem>>, vector<384x128xf32>
    %34 = arith.truncf %33 : vector<384x128xf32> to vector<384x128xbf16>
    %c57 = arith.constant 57 : index
    %c0_28 = arith.constant 0 : index
    %35 = vector.load %arg9[%c57, %c0_28] : memref<448x128xf32, #tpu.memory_space<vmem>>, vector<384x128xf32>
    %36 = arith.truncf %35 : vector<384x128xf32> to vector<384x128xbf16>
    %37 = tpu.concatenate %20, %22, %24, %26, %28, %30, %32, %34, %36 in 1 : vector<384x128xbf16>, vector<384x128xbf16>, vector<384x128xbf16>, vector<384x128xbf16>, vector<384x128xbf16>, vector<384x128xbf16>, vector<384x128xbf16>, vector<384x128xbf16>, vector<384x128xbf16> -> vector<384x1152xbf16>
    %c0_29 = arith.constant 0 : index
    %c0_30 = arith.constant 0 : index
    %38 = vector.load %arg4[%c0_29, %c0_30] : memref<1152x128xbf16, #tpu.memory_space<vmem>>, vector<1152x128xbf16>
    %cst_31 = arith.constant dense<0.000000e+00> : vector<384x128xf32>
    %39 = tpu.matmul %37, %38, %cst_31 {dimension_numbers = #tpu.dot_dimension_numbers<[1], [0], [0], [1], [0, 0, 1, 1], [], []>} : vector<384x1152xbf16>, vector<1152x128xbf16>, vector<384x128xf32> -> vector<384x128xf32>
    %40 = vector.broadcast %1 : vector<1x128xf32> to vector<384x128xf32>
    %41 = arith.addf %39, %40 : vector<384x128xf32>
    %cst_32 = arith.constant 0.000000e+00 : f32
    %42 = vector.broadcast %cst_32 : f32 to vector<384x128xf32>
    %43 = arith.maximumf %41, %42 : vector<384x128xf32>
    %44 = arith.truncf %43 : vector<384x128xf32> to vector<384x128xbf16>
    %c0_33 = arith.constant 0 : index
    %c0_34 = arith.constant 0 : index
    %45 = vector.load %arg6[%c0_33, %c0_34] : memref<128x128xbf16, #tpu.memory_space<vmem>>, vector<128x128xbf16>
    %cst_35 = arith.constant dense<0.000000e+00> : vector<384x128xf32>
    %46 = tpu.matmul %44, %45, %cst_35 {dimension_numbers = #tpu.dot_dimension_numbers<[1], [0], [0], [1], [0, 0, 1, 1], [], []>} : vector<384x128xbf16>, vector<128x128xbf16>, vector<384x128xf32> -> vector<384x128xf32>
    %c0_36 = arith.constant 0 : index
    %c0_37 = arith.constant 0 : index
    %c0_38 = arith.constant 0 : index
    %c0_39 = arith.constant 0 : index
    %47 = vector.load %arg1[%c0_36, %c0_37, %c0_38, %c0_39] : memref<1x16x24x128xf32, #tpu.memory_space<vmem>>, vector<1x16x24x128xf32>
    %48 = vector.shape_cast %47 : vector<1x16x24x128xf32> to vector<384x128xf32>
    %49 = vector.broadcast %2 : vector<1x128xf32> to vector<384x128xf32>
    %50 = arith.addf %46, %49 : vector<384x128xf32>
    %51 = arith.addf %50, %48 : vector<384x128xf32>
    %cst_40 = arith.constant 0.000000e+00 : f32
    %52 = vector.broadcast %cst_40 : f32 to vector<384x128xf32>
    %53 = arith.maximumf %51, %52 : vector<384x128xf32>
    %54 = vector.shape_cast %53 : vector<384x128xf32> to vector<1x16x24x128xf32>
    %c0_41 = arith.constant 0 : index
    %c0_42 = arith.constant 0 : index
    %c0_43 = arith.constant 0 : index
    %c0_44 = arith.constant 0 : index
    %55 = vector.load %arg8[%c0_41, %c0_42, %c0_43, %c0_44] : memref<1x16x24x128xf32, #tpu.memory_space<vmem>>, vector<1x16x24x128xf32>
    tpu.vector_store %arg8[%c0_41, %c0_42, %c0_43, %c0_44], %54 {strides = array<i32>} : memref<1x16x24x128xf32, #tpu.memory_space<vmem>>, vector<1x16x24x128xf32>,
    return
  }
  func.func @transform_0(%arg0: i32) -> (i32, i32, i32, i32) {
    %c0_i32 = arith.constant 0 : i32
    %c0_i32_0 = arith.constant 0 : i32
    %c0_i32_1 = arith.constant 0 : i32
    %c0_i32_2 = arith.constant 0 : i32
    return %arg0, %c0_i32, %c0_i32_0, %c0_i32_1 : i32, i32, i32, i32
  }
  func.func @transform_1(%arg0: i32) -> (i32, i32) {
    %c0_i32 = arith.constant 0 : i32
    %c0_i32_0 = arith.constant 0 : i32
    %c0_i32_1 = arith.constant 0 : i32
    return %c0_i32, %c0_i32_0 : i32, i32
  }
  func.func @transform_2(%arg0: i32) -> (i32, i32, i32) {
    %c0_i32 = arith.constant 0 : i32
    %c0_i32_0 = arith.constant 0 : i32
    %c0_i32_1 = arith.constant 0 : i32
    %c0_i32_2 = arith.constant 0 : i32
    return %c0_i32, %c0_i32_0, %c0_i32_1 : i32, i32, i32
  }
  func.func @transform_3(%arg0: i32) -> (i32, i32) {
    %c0_i32 = arith.constant 0 : i32
    %c0_i32_0 = arith.constant 0 : i32
    %c0_i32_1 = arith.constant 0 : i32
    return %c0_i32, %c0_i32_0 : i32, i32
  }
  func.func @transform_4(%arg0: i32) -> (i32, i32) {
    %c0_i32 = arith.constant 0 : i32
    %c0_i32_0 = arith.constant 0 : i32
    %c0_i32_1 = arith.constant 0 : i32
    return %c0_i32, %c0_i32_0 : i32, i32
  }
  func.func @transform_5(%arg0: i32) -> (i32, i32) {
    %c0_i32 = arith.constant 0 : i32
    %c0_i32_0 = arith.constant 0 : i32
    %c0_i32_1 = arith.constant 0 : i32
    return %c0_i32, %c0_i32_0 : i32, i32
  }
  func.func @transform_6(%arg0: i32) -> (i32, i32) {
    %c0_i32 = arith.constant 0 : i32
    %c0_i32_0 = arith.constant 0 : i32
    %c0_i32_1 = arith.constant 0 : i32
    return %c0_i32, %c0_i32_0 : i32, i32
  }
  func.func @transform_7(%arg0: i32) -> (i32, i32, i32, i32) {
    %c0_i32 = arith.constant 0 : i32
    %c0_i32_0 = arith.constant 0 : i32
    %c0_i32_1 = arith.constant 0 : i32
    %c0_i32_2 = arith.constant 0 : i32
    return %arg0, %c0_i32, %c0_i32_0, %c0_i32_1 : i32, i32, i32, i32
  }
}

</mosaic_0001>

<bundles_post_ra>
// kernel: bottleneck_forward.1
= control target key start
LH: loop header
LB: loop body
LE: loop exit
PB: predicated region body
PF: predicated region fallthrough
CT: control target
= control target key end

     0   :  { %s4292_s24 = smov 0   ;;  %s6228_s0 = inlined_call_operand.vmem [shape: f32[2,16,24,128], index: 0, kind: input, shape index: {}]   ;;  %s6229_s1 = inlined_call_operand.vmem [shape: bf16[128,128], index: 1, kind: input, shape index: {}]   ;;  %s6230_s2 = inlined_call_operand.vmem [shape: f32[1,24,128], index: 2, kind: input, shape index: {}]   ;;  %s6231_s3 = inlined_call_operand.vmem [shape: bf16[1152,128], index: 3, kind: input, shape index: {}]   ;;  %s6232_s4 = inlined_call_operand.vmem [shape: f32[1,128], index: 4, kind: input, shape index: {}]   ;;  %s6233_s5 = inlined_call_operand.vmem [shape: bf16[128,128], index: 5, kind: input, shape index: {}]   ;;  %s6234_s6 = inlined_call_operand.vmem [shape: f32[1,128], index: 6, kind: input, shape index: {}]   ;;  %s6235_s7 = inlined_call_operand.vmem [shape: f32[2,16,24,128], index: 7, kind: output, shape index: {}]  }
   0x1 LB: > { %s3434_s25 = sadd.s32 4294967295, %s4247_s24   ;;  %p3438_p0 = scmp.ge.s32.totalorder %s4247_s24, 1  ;;  %s4247_s24 = sphi %s4292_s24, %s17_s24  }
   0x2   : > { %p237_p1 = scmp.lt.s32.totalorder %s4247_s24, 3 }
   0x4   : > { %p238_p2 = pnand %p3438_p0, %p237_p1 }
   0x6   : > { %241 = sbr.rel (%p238_p2) target bundleno = 1259 (0x4eb), region = 48 }
   0xd   : > { %v4152_v0 = vld [vmem:[%s6229_s1] sm:$0xff]   ;;  %p269_p3 = scmp.lt.s32.totalorder %s3434_s25, 1  ;;  %v4153_v1 = vld [vmem:[%s6229_s1 + $0x8] sm:$0xff]   ;;  %v6236_v2 = vmov 0   ;;  %v4154_v3 = vld [vmem:[%s6229_s1 + $0x10] sm:$0xff]  }
   0xe   : > { %3629 = vmatprep.subr.bf16.mxu0 %v4152_v0  ;;  %3821 = vmatprep.subr.bf16.mxu1 %v6236_v2  ;;  %v4155_v4 = vld [vmem:[%s6229_s1 + $0x18] sm:$0xff]   ;;  %v4156_v8 = vld [vmem:[%s6229_s1 + $0x20] sm:$0xff]   ;;  %v4157_v9 = vld [vmem:[%s6229_s1 + $0x28] sm:$0xff]  }
   0xf   : > { %s6699_s25 = smov (!%p269_p3, %s3434_s25), 1  ;;  %3630 = vmatpush3.bf16.msra.mxu0 %v4152_v0  ;;  %v4158_v10 = vld [vmem:[%s6229_s1 + $0x30] sm:$0xff]   ;;  %v4159_v11 = vld [vmem:[%s6229_s1 + $0x38] sm:$0xff]   ;;  %v4160_v18 = vld [vmem:[%s6231_s3] sm:$0xff]  }
  0x10   : > { %3631 = vmatprep.subr.bf16.mxu0 %v4153_v1  ;;  %s4141_s9 = smul.u32 384, %s6699_s25  ;;  %v4161_v22 = vld [vmem:[%s6231_s3 + $0x8] sm:$0xff]   ;;  %v4354_v23 = vld [vmem:[%s6231_s3 + $0x80] sm:$0xff]   ;;  %v4162_v28 = vld [vmem:[%s6231_s3 + $0x10] sm:$0xff]  }
  0x11   : > { %3837 = vmatpush1.bf16.msra.mxu1 %v4354_v23  ;;  %v4362_v25 = vld [vmem:[%s6231_s3 + $0x88] sm:$0xff]   ;;  %v4375_v31 = vld [vmem:[%s6231_s3 + $0x90] sm:$0xff]   ;;  %v4163_v34 = vld [vmem:[%s6231_s3 + $0x18] sm:$0xff]  }
  0x12   : > { %s4318_s12 = scalar_lea.vmem %s6228_s0, %s4141_s9  ;;  %3822 = vmatprep.subr.bf16.mxu1 %v6236_v2  ;;  %v4386_v35 = vld [vmem:[%s6231_s3 + $0x98] sm:$0xff]   ;;  %v4164_v36 = vld [vmem:[%s6231_s3 + $0x20] sm:$0xff]   ;;  %v4165_v41 = vld [vmem:[%s6231_s3 + $0x28] sm:$0xff]   ;;  %s6086_s26 = scalar_lea.vmem %s6235_s7, %s4141_s9 }
  0x13   : > { %3632 = vmatpush3.bf16.msra.mxu0 %v4153_v1  ;;  %v285_v5 = vld [vmem:[%s4318_s12] sm:$0xff]  ;;  %v286_v6 = vld [vmem:[%s4318_s12 + $0x8] sm:$0xff]  ;;  %v287_v12 = vld [vmem:[%s4318_s12 + $0x10] sm:$0xff] }
  0x14   : > { %3633 = vmatprep.subr.bf16.mxu0 %v4154_v3  ;;  %v333_v7 = vpack.c.bf16 %v286_v6, %v285_v5  ;;  %v288_v13 = vld [vmem:[%s4318_s12 + $0x18] sm:$0xff]  ;;  %v289_v14 = vld [vmem:[%s4318_s12 + $0x20] sm:$0xff]  ;;  %v290_v15 = vld [vmem:[%s4318_s12 + $0x28] sm:$0xff] }
  0x15   : > { %v334_v16 = vpack.c.bf16 %v288_v13, %v287_v12  ;;  %v335_v17 = vpack.c.bf16 %v290_v15, %v289_v14  ;;  %v291_v19 = vld [vmem:[%s4318_s12 + $0x30] sm:$0xff]  ;;  %v292_v20 = vld [vmem:[%s4318_s12 + $0x38] sm:$0xff]  ;;  %v293_v21 = vld [vmem:[%s4318_s12 + $0x40] sm:$0xff]  ;;  %3838 = vmatpush1.bf16.msra.mxu1 %v4362_v25 }
  0x16   : > { %3645 = vmatprep.mubr.bf16.mxu0 %v333_v7  ;;  %v294_v24 = vld [vmem:[%s4318_s12 + $0x48] sm:$0xff]  ;;  %v336_v26 = vpack.c.bf16 %v292_v20, %v291_v19  ;;  %v295_v29 = vld [vmem:[%s4318_s12 + $0x50] sm:$0xff]  ;;  %v296_v30 = vld [vmem:[%s4318_s12 + $0x58] sm:$0xff]  ;;  %3823 = vmatprep.subr.bf16.mxu1 %v6236_v2 }
  0x17   : > { %3634 = vmatpush3.bf16.msra.mxu0 %v4154_v3  ;;  %v337_v27 = vpack.c.bf16 %v294_v24, %v293_v21  ;;  %v297_v32 = vld [vmem:[%s4318_s12 + $0x60] sm:$0xff]  ;;  %v298_v33 = vld [vmem:[%s4318_s12 + $0x68] sm:$0xff]  ;;  %v338_v37 = vpack.c.bf16 %v296_v30, %v295_v29  ;;  %v299_v39 = vld [vmem:[%s4318_s12 + $0x70] sm:$0xff] }
  0x18   : > { %3635 = vmatprep.subr.bf16.mxu0 %v4155_v4  ;;  %v339_v38 = vpack.c.bf16 %v298_v33, %v297_v32  ;;  %v300_v40 = vld [vmem:[%s4318_s12 + $0x78] sm:$0xff]  ;;  %v301_v42 = vld [vmem:[%s4318_s12 + $0x80] sm:$0xff]  ;;  %v302_v43 = vld [vmem:[%s4318_s12 + $0x88] sm:$0xff] }
  0x19   : > { %3839 = vmatpush1.bf16.msra.mxu1 %v4375_v31  ;;  %v4166_v44 = vld [vmem:[%s6231_s3 + $0x30] sm:$0xff]   ;;  %v340_v45 = vpack.c.bf16 %v300_v40, %v299_v39  ;;  %v341_v46 = vpack.c.bf16 %v302_v43, %v301_v42  ;;  %v304_v48 = vld [vmem:[%s4318_s12 + $0x98] sm:$0xff]  ;;  %v305_v50 = vld [vmem:[%s4318_s12 + $0xa0] sm:$0xff] }
  0x1a   : > { %3824 = vmatprep.subr.bf16.mxu1 %v6236_v2  ;;  %v303_v47 = vld [vmem:[%s4318_s12 + $0x90] sm:$0xff]  ;;  %v4167_v49 = vld [vmem:[%s6231_s3 + $0x38] sm:$0xff]   ;;  %v306_v51 = vld [vmem:[%s4318_s12 + $0xa8] sm:$0xff] }
  0x1b   : > { %3636 = vmatpush3.bf16.msra.mxu0 %v4155_v4  ;;  %v4168_v52 = vld [vmem:[%s6231_s3 + $0x40] sm:$0xff]   ;;  %v342_v53 = vpack.c.bf16 %v304_v48, %v303_v47  ;;  %v343_v54 = vpack.c.bf16 %v306_v51, %v305_v50  ;;  %v307_v55 = vld [vmem:[%s4318_s12 + $0xb0] sm:$0xff]  ;;  %v308_v56 = vld [vmem:[%s4318_s12 + $0xb8] sm:$0xff] }
  0x1c   : > { %3637 = vmatprep.subr.bf16.mxu0 %v4156_v8  ;;  %v4169_v57 = vld [vmem:[%s6231_s3 + $0x48] sm:$0xff]   ;;  %v309_v58 = vld [vmem:[%s4318_s12 + $0xc0] sm:$0xff]  ;;  %v4170_v60 = vld [vmem:[%s6231_s3 + $0x50] sm:$0xff]   ;;  %v344_v61 = vpack.c.bf16 %v308_v56, %v307_v55 }
  0x1d   : > { %3840 = vmatpush1.bf16.msra.mxu1 %v4386_v35  ;;  %v310_v59 = vld [vmem:[%s4318_s12 + $0xc8] sm:$0xff]  ;;  %v311_v63 = vld [vmem:[%s4318_s12 + $0xd0] sm:$0xff]  ;;  %v312_v0 = vld [vmem:[%s4318_s12 + $0xd8] sm:$0xff] }
  0x1e   : > { %3825 = vmatprep.subr.bf16.mxu1 %v6236_v2  ;;  %v345_v62 = vpack.c.bf16 %v310_v59, %v309_v58  ;;  %v4172_v1 = vld [vmem:[%s6231_s3 + $0x58] sm:$0xff]   ;;  %v313_v3 = vld [vmem:[%s4318_s12 + $0xe0] sm:$0xff]  ;;  %v314_v4 = vld [vmem:[%s4318_s12 + $0xe8] sm:$0xff]  ;;  %v346_v6 = vpack.c.bf16 %v312_v0, %v311_v63 }
  0x1f   : > { %3638 = vmatpush3.bf16.msra.mxu0 %v4156_v8  ;;  %v4174_v5 = vld [vmem:[%s6231_s3 + $0x60] sm:$0xff]   ;;  %v347_v7 = vpack.c.bf16 %v314_v4, %v313_v3  ;;  %v315_v8 = vld [vmem:[%s4318_s12 + $0xf0] sm:$0xff]  ;;  %v318_v12 = vld [vmem:[%s4318_s12 + $0x108] sm:$0xff] }
  0x20   : > { %3639 = vmatprep.subr.bf16.mxu0 %v4157_v9  ;;  %v319_v15 = vld [vmem:[%s4318_s12 + $0x110] sm:$0xff]  ;;  %v325_v24 = vld [vmem:[%s4318_s12 + $0x140] sm:$0xff]  ;;  %v328_v30 = vld [vmem:[%s4318_s12 + $0x158] sm:$0xff] }
  0x21   : > { %v323_v21 = vld [vmem:[%s4318_s12 + $0x130] sm:$0xff]  ;;  %v329_v32 = vld [vmem:[%s4318_s12 + $0x160] sm:$0xff]  ;;  %v330_v33 = vld [vmem:[%s4318_s12 + $0x168] sm:$0xff] }
  0x22   : > { %v327_v29 = vld [vmem:[%s4318_s12 + $0x150] sm:$0xff]  ;;  %v332_v39 = vld [vmem:[%s4318_s12 + $0x178] sm:$0xff]  ;;  %v4179_v42 = vld [vmem:[%s6231_s3 + $0xa0] sm:$0xff]  }
  0x23   : > { %3640 = vmatpush3.bf16.msra.mxu0 %v4157_v9  ;;  %v316_v9 = vld [vmem:[%s4318_s12 + $0xf8] sm:$0xff]  ;;  %v4178_v40 = vld [vmem:[%s6231_s3 + $0x70] sm:$0xff]   ;;  %3841 = vmatpush1.bf16.msra.mxu1 %v4179_v42  ;;  %v4184_v51 = vld [vmem:[%s6231_s3 + $0xc0] sm:$0xff]  }
  0x24   : > { %3641 = vmatprep.subr.bf16.mxu0 %v4158_v10  ;;  %v348_v13 = vpack.c.bf16 %v316_v9, %v315_v8  ;;  %v4180_v43 = vld [vmem:[%s6231_s3 + $0x78] sm:$0xff]   ;;  %3826 = vmatprep.subr.bf16.mxu1 %v6236_v2  ;;  %v4554_v55 = vld [vmem:[%s6230_s2 + $0x10] sm:$0xff]  ;;  %v4559_v56 = vld [vmem:[%s6230_s2] sm:$0xff] }
  0x25   : > { %v4183_v50 = vld [vmem:[%s6231_s3 + $0xb8] sm:$0xff]  }
  0x27   : > { %3642 = vmatpush3.bf16.msra.mxu0 %v4158_v10  ;;  %v4176_v10 = vld [vmem:[%s6231_s3 + $0x68] sm:$0xff]  }
  0x28   : > { %3643 = vmatprep.subr.bf16.mxu0 %v4159_v11 }
  0x2b   : > { %3644 = vmatpush3.bf16.msra.mxu0 %v4159_v11  ;;  %v317_v11 = vld [vmem:[%s4318_s12 + $0x100] sm:$0xff] }
  0x2c   : > { %1695 = vmatprep.subr.bf16.mxu0 %v6236_v2  ;;  %v349_v14 = vpack.c.bf16 %v318_v12, %v317_v11 }
  0x2e   : > { %3646 = vmatmul.mubr.bf16.vlgmr.msra.gmra.mrb[0].mxu0 %v334_v16  ;;  %v320_v16 = vld [vmem:[%s4318_s12 + $0x118] sm:$0xff] }
  0x2f   : > { %3649 = vmatprep.mubr.bf16.mxu0 %v335_v17  ;;  %1696 = vmatpush1.bf16.msra.mxu0 %v4160_v18  ;;  %v321_v17 = vld [vmem:[%s4318_s12 + $0x120] sm:$0xff]  ;;  %v322_v18 = vld [vmem:[%s4318_s12 + $0x128] sm:$0xff]  ;;  %v350_v19 = vpack.c.bf16 %v320_v16, %v319_v15 }
  0x30   : > { %1697 = vmatprep.subr.bf16.mxu0 %v6236_v2  ;;  %v351_v20 = vpack.c.bf16 %v322_v18, %v321_v17 }
  0x33   : > { %1698 = vmatpush1.bf16.msra.mxu0 %v4161_v22  ;;  %v324_v22 = vld [vmem:[%s4318_s12 + $0x138] sm:$0xff] }
  0x34   : > { %1699 = vmatprep.subr.bf16.mxu0 %v6236_v2 }
  0x36   : > { %3650 = vmatmul.mubr.bf16.gmra.mrb[4].mxu0 %v336_v26  ;;  %v326_v26 = vld [vmem:[%s4318_s12 + $0x148] sm:$0xff] }
  0x37   : > { %3653 = vmatprep.mubr.bf16.mxu0 %v337_v27  ;;  %1700 = vmatpush1.bf16.msra.mxu0 %v4162_v28  ;;  %v352_v27 = vpack.c.bf16 %v324_v22, %v323_v21  ;;  %v353_v28 = vpack.c.bf16 %v326_v26, %v325_v24 }
  0x38   : > { %1701 = vmatprep.subr.bf16.mxu0 %v6236_v2 }
  0x3b   : > { %1702 = vmatpush1.bf16.msra.mxu0 %v4163_v34  ;;  %v354_v34 = vpack.c.bf16 %v328_v30, %v327_v29 }
  0x3c   : > { %1703 = vmatprep.subr.bf16.mxu0 %v6236_v2 }
  0x3e   : > { %3654 = vmatmul.mubr.bf16.gmra.mrb[8].mxu0 %v338_v37  ;;  %v4250_v37 = vmov 0.0  }
  0x3f   : > { %3657 = vmatprep.mubr.bf16.mxu0 %v339_v38  ;;  %1704 = vmatpush1.bf16.msra.mxu0 %v4164_v36  ;;  %v355_v36 = vpack.c.bf16 %v330_v33, %v329_v32  ;;  %743 = vst [vmem:[#allocation2 + $0x8] sm:$0xff] %v4250_v37  ;;  %744 = vst [vmem:[#allocation2 + $0x10] sm:$0xff] %v4250_v37  ;;  %v331_v38 = vld [vmem:[%s4318_s12 + $0x170] sm:$0xff] }
  0x40   : > { %1705 = vmatprep.subr.bf16.mxu0 %v6236_v2  ;;  %742 = vst [vmem:[#allocation2] sm:$0xff] %v4250_v37  ;;  %745 = vst [vmem:[#allocation2 + $0x18] sm:$0xff] %v4250_v37 }
  0x41   : > { %746 = vst [vmem:[#allocation2 + $0x1a0] sm:$0xff] %v4250_v37  ;;  %747 = vst [vmem:[#allocation2 + $0x1a8] sm:$0xff] %v4250_v37 }
  0x42   : > { %748 = vst [vmem:[#allocation2 + $0x1b0] sm:$0xff] %v4250_v37  ;;  %749 = vst [vmem:[#allocation2 + $0x1b8] sm:$0xff] %v4250_v37 }
  0x43   : > { %1706 = vmatpush1.bf16.msra.mxu0 %v4165_v41  ;;  %v356_v41 = vpack.c.bf16 %v332_v39, %v331_v38 }
  0x44   : > { %1707 = vmatprep.subr.bf16.mxu0 %v6236_v2 }
  0x46   : > { %3658 = vmatmul.mubr.bf16.gmra.mrb[12].mxu0 %v340_v45  ;;  %v4251_v45 = vmov 0.0|0.0   ;;  %v799_v47 = vld [vmem:[#allocation2 + $0xf] sm:$0xff] }
  0x47   : > { %3661 = vmatprep.mubr.bf16.mxu0 %v341_v46  ;;  %1708 = vmatpush1.bf16.msra.mxu0 %v4166_v44  ;;  %v4181_v44 = vld [vmem:[%s6231_s3 + $0xa8] sm:$0xff]  }
  0x48   : > { %1709 = vmatprep.subr.bf16.mxu0 %v6236_v2  ;;  %v798_v46 = vld [vmem:[#allocation2 + $0x7] sm:$0xff]  ;;  %3842 = vmatpush1.bf16.msra.mxu1 %v4181_v44 }
  0x49   : > { %v846_v48 = vpack.c.bf16 %v799_v47, %v798_v46  ;;  %3827 = vmatprep.subr.bf16.mxu1 %v6236_v2 }
  0x4b   : > { %1710 = vmatpush1.bf16.msra.mxu0 %v4167_v49  ;;  %v4182_v49 = vld [vmem:[%s6231_s3 + $0xb0] sm:$0xff]  }
  0x4c   : > { %1711 = vmatprep.subr.bf16.mxu0 %v6236_v2  ;;  %3843 = vmatpush1.bf16.msra.mxu1 %v4182_v49 }
  0x4d   : > { %3828 = vmatprep.subr.bf16.mxu1 %v6236_v2 }
  0x4e   : > { %3662 = vmatmul.mubr.bf16.gmra.mrb[16].mxu0 %v342_v53  ;;  %v4190_v53 = vld [vmem:[%s6231_s3 + $0xf0] sm:$0xff]  }
  0x4f   : > { %3665 = vmatprep.mubr.bf16.mxu0 %v343_v54  ;;  %1712 = vmatpush1.bf16.msra.mxu0 %v4168_v52  ;;  %v4188_v52 = vld [vmem:[%s6231_s3 + $0xe0] sm:$0xff]   ;;  %v4191_v54 = vld [vmem:[%s6231_s3 + $0xf8] sm:$0xff]  }
  0x50   : > { %1713 = vmatprep.subr.bf16.mxu0 %v6236_v2  ;;  %3844 = vmatpush1.bf16.msra.mxu1 %v4183_v50 }
  0x51   : > { %3829 = vmatprep.subr.bf16.mxu1 %v6236_v2 }
  0x53   : > { %1714 = vmatpush1.bf16.msra.mxu0 %v4169_v57 }
  0x54   : > { %1715 = vmatprep.subr.bf16.mxu0 %v6236_v2  ;;  %3845 = vmatpush1.bf16.msra.mxu1 %v4184_v51 }
  0x55   : > { %3830 = vmatprep.subr.bf16.mxu1 %v6236_v2 }
  0x56   : > { %3666 = vmatmul.mubr.bf16.gmra.mrb[20].mxu0 %v344_v61 }
  0x57   : > { %3669 = vmatprep.mubr.bf16.mxu0 %v345_v62  ;;  %1716 = vmatpush1.bf16.msra.mxu0 %v4170_v60  ;;  %v4565_v60 = vld [vmem:[%s6230_s2 + $0x8] sm:$0xff] }
  0x58   : > { %1717 = vmatprep.subr.bf16.mxu0 %v6236_v2 }
  0x5b   : > { %1718 = vmatpush1.bf16.msra.mxu0 %v4172_v1 }
  0x5c   : > { %1719 = vmatprep.subr.bf16.mxu0 %v6236_v2 }
  0x5e   : > { %3670 = vmatmul.mubr.bf16.gmra.mrb[24].mxu0 %v346_v6 }
  0x5f   : > { %3673 = vmatprep.mubr.bf16.mxu0 %v347_v7  ;;  %1720 = vmatpush1.bf16.msra.mxu0 %v4174_v5 }
  0x60   : > { %1721 = vmatprep.subr.bf16.mxu0 %v6236_v2 }
  0x63   : > { %1722 = vmatpush1.bf16.msra.mxu0 %v4176_v10 }
  0x64   : > { %1723 = vmatprep.subr.bf16.mxu0 %v6236_v2 }
  0x66   : > { %3674 = vmatmul.mubr.bf16.gmra.mrb[28].mxu0 %v348_v13 }
  0x67   : > { %3677 = vmatprep.mubr.bf16.mxu0 %v349_v14  ;;  %1724 = vmatpush1.bf16.msra.mxu0 %v4178_v40 }
  0x68   : > { %1725 = vmatprep.subr.bf16.mxu0 %v6236_v2 }
  0x6b   : > { %1726 = vmatpush1.bf16.msra.mxu0 %v4180_v43 }
  0x6c   : > { %1920 = vmatprep.subr.bf16.mxu0 %v6236_v2 }
  0x6e   : > { %3678 = vmatmul.mubr.bf16.gmra.mrb[32].mxu0 %v350_v19  ;;  %v800_v19 = vld [vmem:[#allocation2 + $0x17] sm:$0xff] }
  0x6f   : > { %3681 = vmatprep.mubr.bf16.mxu0 %v351_v20 }
  0x76   : > { %3682 = vmatmul.mubr.bf16.gmra.mrb[36].mxu0 %v352_v27 }
  0x77   : > { %3685 = vmatprep.mubr.bf16.mxu0 %v353_v28 }
  0x7e   : > { %3686 = vmatmul.mubr.bf16.gmra.mrb[40].mxu0 %v354_v34 }
  0x7f   : > { %3689 = vmatprep.mubr.bf16.mxu0 %v355_v36 }
  0x86   : > { %3690 = vmatmul.mubr.bf16.gmra.mrb[44].mxu0 %v356_v41 }
  0x87   : > { %1727 = vmatprep.mubr.bf16.mxu0 %v4251_v45 }
  0x8e   : > { %1728 = vmatmul.mubr.bf16.vlgmr.msra.gmra.mrb[48].mxu0 %v846_v48 }
  0x8f   : > { %1921 = vmatpush1.bf16.msra.mxu0 %v4354_v23  ;;  %v4185_v23 = vld [vmem:[%s6231_s3 + $0xc8] sm:$0xff]  }
  0x90   : > { %1922 = vmatprep.subr.bf16.mxu0 %v6236_v2  ;;  %3846 = vmatpush1.bf16.msra.mxu1 %v4185_v23 }
  0x91   : > { %3831 = vmatprep.subr.bf16.mxu1 %v6236_v2 }
  0x93   : > { %1923 = vmatpush1.bf16.msra.mxu0 %v4362_v25  ;;  %v4186_v25 = vld [vmem:[%s6231_s3 + $0xd0] sm:$0xff]  }
  0x94   : > { %1924 = vmatprep.subr.bf16.mxu0 %v6236_v2  ;;  %3847 = vmatpush1.bf16.msra.mxu1 %v4186_v25 }
  0x95   : > { %3832 = vmatprep.subr.bf16.mxu1 %v6236_v2 }
  0x97   : > { %1925 = vmatpush1.bf16.msra.mxu0 %v4375_v31  ;;  %v4187_v31 = vld [vmem:[%s6231_s3 + $0xd8] sm:$0xff]  }
  0x98   : > { %1926 = vmatprep.subr.bf16.mxu0 %v6236_v2  ;;  %3848 = vmatpush1.bf16.msra.mxu1 %v4187_v31 }
  0x99   : > { %3833 = vmatprep.subr.bf16.mxu1 %v6236_v2 }
  0x9b   : > { %1927 = vmatpush1.bf16.msra.mxu0 %v4386_v35  ;;  %v4189_v35 = vld [vmem:[%s6231_s3 + $0xe8] sm:$0xff]  }
  0x9c   : > { %1928 = vmatprep.subr.bf16.mxu0 %v6236_v2  ;;  %3849 = vmatpush1.bf16.msra.mxu1 %v4188_v52 }
  0x9d   : > { %3834 = vmatprep.subr.bf16.mxu1 %v6236_v2 }
  0x9f   : > { %1929 = vmatpush1.bf16.msra.mxu0 %v4179_v42 }
  0xa0   : > { %1930 = vmatprep.subr.bf16.mxu0 %v6236_v2  ;;  %3850 = vmatpush1.bf16.msra.mxu1 %v4189_v35 }
  0xa1   : > { %3835 = vmatprep.subr.bf16.mxu1 %v6236_v2 }
  0xa3   : > { %1931 = vmatpush1.bf16.msra.mxu0 %v4181_v44 }
  0xa4   : > { %1932 = vmatprep.subr.bf16.mxu0 %v6236_v2  ;;  %3851 = vmatpush1.bf16.msra.mxu1 %v4190_v53 }
  0xa5   : > { %3836 = vmatprep.subr.bf16.mxu1 %v6236_v2 }
  0xa7   : > { %1933 = vmatpush1.bf16.msra.mxu0 %v4182_v49 }
  0xa8   : > { %1934 = vmatprep.subr.bf16.mxu0 %v6236_v2  ;;  %3852 = vmatpush1.bf16.msra.mxu1 %v4191_v54 }
  0xa9   : > { %2145 = vmatprep.subr.bf16.mxu1 %v6236_v2 }
  0xab   : > { %1935 = vmatpush1.bf16.msra.mxu0 %v4183_v50 }
  0xac   : > { %1936 = vmatprep.subr.bf16.mxu0 %v6236_v2 }
  0xaf   : > { %1937 = vmatpush1.bf16.msra.mxu0 %v4184_v51 }
  0xb0   : > { %1938 = vmatprep.subr.bf16.mxu0 %v6236_v2 }
  0xb3   : > { %1939 = vmatpush1.bf16.msra.mxu0 %v4185_v23 }
  0xb4   : > { %1940 = vmatprep.subr.bf16.mxu0 %v6236_v2 }
  0xb7   : > { %1941 = vmatpush1.bf16.msra.mxu0 %v4186_v25 }
  0xb8   : > { %1942 = vmatprep.subr.bf16.mxu0 %v6236_v2 }
  0xbb   : > { %1943 = vmatpush1.bf16.msra.mxu0 %v4187_v31 }
  0xbc   : > { %1944 = vmatprep.subr.bf16.mxu0 %v6236_v2 }
  0xbf   : > { %1945 = vmatpush1.bf16.msra.mxu0 %v4188_v52 }
  0xc0   : > { %1946 = vmatprep.subr.bf16.mxu0 %v6236_v2 }
  0xc3   : > { %1947 = vmatpush1.bf16.msra.mxu0 %v4189_v35 }
  0xc4   : > { %1948 = vmatprep.subr.bf16.mxu0 %v6236_v2 }
  0xc7   : > { %1949 = vmatpush1.bf16.msra.mxu0 %v4190_v53 }
  0xc8   : > { %1950 = vmatprep.subr.bf16.mxu0 %v6236_v2 }
  0xcb   : > { %1951 = vmatpush1.bf16.msra.mxu0 %v4191_v54 }
 0x101   : > { %v3647_v57 = vpop.f32.mrb[0].mxu0 }
 0x102   : > { %v648_v58 = vadd.f32 %v3647_v57, %v4554_v55  ;;  %v455_v59 = vpop.f32.mrb[1].mxu0 }
 0x103   : > { %v646_v61 = vadd.f32 %v455_v59, %v4559_v56  ;;  %v3648_v62 = vpop.f32.mrb[2].mxu0 }
 0x104   : > { %v4568_v63 = vmax.f32 %v648_v58, 0.0  ;;  %v649_v0 = vadd.f32 %v3648_v62, %v4559_v56  ;;  %v458_v1 = vpop.f32.mrb[3].mxu0 }
 0x105   : > { %v4571_v3 = vmax.f32 %v646_v61, 0.0  ;;  %v647_v4 = vadd.f32 %v458_v1, %v4565_v60 }
 0x106   : > { %752 = vst [vmem:[#allocation2 + $0x30] sm:$0xff] %v4568_v63  ;;  %v4575_v5 = vmax.f32 %v649_v0, 0.0  ;;  %v4192_v0 = vld [vmem:[%s6231_s3 + $0x100] sm:$0xff]  }
 0x107   : > { %750 = vst [vmem:[#allocation2 + $0x20] sm:$0xff] %v4571_v3  ;;  %v4578_v6 = vmax.f32 %v647_v4, 0.0  ;;  %v919_v7 = vpack.c.bf16 %v4571_v3, %v4250_v37 }
 0x108   : > { %753 = vst [vmem:[#allocation2 + $0x38] sm:$0xff] %v4575_v5 }
 0x109   : > { %751 = vst [vmem:[#allocation2 + $0x28] sm:$0xff] %v4578_v6  ;;  %v3651_v9 = vpop.f32.mrb[4].mxu0  ;;  %1735 = vmatprep.mubr.bf16.mxu0 %v919_v7  ;;  %v920_v10 = vpack.c.bf16 %v4568_v63, %v4578_v6 }
 0x10a   : > { %v652_v12 = vadd.f32 %v3651_v9, %v4559_v56  ;;  %v471_v13 = vpop.f32.mrb[5].mxu0 }
 0x10b   : > { %v650_v14 = vadd.f32 %v471_v13, %v4565_v60  ;;  %v3652_v15 = vpop.f32.mrb[6].mxu0 }
 0x10c   : > { %v4592_v16 = vmax.f32 %v652_v12, 0.0  ;;  %v653_v17 = vadd.f32 %v3652_v15, %v4565_v60  ;;  %v474_v18 = vpop.f32.mrb[7].mxu0 }
 0x10d   : > { %v4595_v20 = vmax.f32 %v650_v14, 0.0  ;;  %v651_v21 = vadd.f32 %v474_v18, %v4554_v55 }
 0x10e   : > { %6347 = vst [vmem:[#allocation3_spill] sm:$0xff] %v4592_v16  ;;  %756 = vst [vmem:[#allocation2 + $0x50] sm:$0xff] %v4592_v16  ;;  %v4599_v22 = vmax.f32 %v653_v17, 0.0  ;;  %v4601_v24 = vld [vmem:[#allocation2 + $0x1f] sm:$0xff] }
 0x10f   : > { %754 = vst [vmem:[#allocation2 + $0x40] sm:$0xff] %v4595_v20  ;;  %v4604_v26 = vmax.f32 %v651_v21, 0.0  ;;  %v847_v27 = vpack.c.bf16 %v4601_v24, %v800_v19  ;;  %v4609_v28 = vpack.c.bf16 %v4595_v20, %v4575_v5  ;;  %v4611_v29 = vld [vmem:[#allocation2 + $0x37] sm:$0xff] }
 0x110   : > { %6348 = vst [vmem:[#allocation4_spill] sm:$0xff] %v4599_v22  ;;  %757 = vst [vmem:[#allocation2 + $0x58] sm:$0xff] %v4599_v22  ;;  %v4614_v30 = vld [vmem:[#allocation2 + $0x27] sm:$0xff]  ;;  %v4616_v32 = vld [vmem:[#allocation2 + $0x2f] sm:$0xff] }
 0x111   : > { %6349 = vst [vmem:[#allocation5_spill] sm:$0xff] %v4609_v28  ;;  %6350 = vst [vmem:[#allocation6_spill] sm:$0xff] %v4616_v32  ;;  %v3655_v34 = vpop.f32.mrb[8].mxu0  ;;  %1736 = vmatmul.mubr.bf16.gmra.mrb[52].mxu0 %v847_v27  ;;  %v4623_v36 = vpack.c.bf16 %v4592_v16, %v4604_v26  ;;  %v848_v51 = vpack.c.bf16 %v4616_v32, %v4614_v30 }
 0x112   : > { %755 = vst [vmem:[#allocation2 + $0x48] sm:$0xff] %v4604_v26  ;;  %v656_v39 = vadd.f32 %v3655_v34, %v4565_v60  ;;  %v487_v40 = vpop.f32.mrb[9].mxu0  ;;  %1743 = vmatprep.mubr.bf16.mxu0 %v920_v10 }
 0x113   : > { %6351 = vst [vmem:[#allocation7_spill] sm:$0xff] %v4623_v36  ;;  %v654_v42 = vadd.f32 %v487_v40, %v4554_v55  ;;  %v3656_v43 = vpop.f32.mrb[10].mxu0 }
 0x114   : > { %v4633_v44 = vmax.f32 %v656_v39, 0.0  ;;  %v657_v45 = vadd.f32 %v3656_v43, %v4554_v55  ;;  %v490_v46 = vpop.f32.mrb[11].mxu0 }
 0x115   : > { %v4636_v47 = vmax.f32 %v654_v42, 0.0  ;;  %v655_v48 = vadd.f32 %v490_v46, %v4559_v56 }
 0x116   : > { %6352 = vst [vmem:[#allocation8_spill] sm:$0xff] %v4633_v44  ;;  %760 = vst [vmem:[#allocation2 + $0x70] sm:$0xff] %v4633_v44  ;;  %v4640_v49 = vmax.f32 %v657_v45, 0.0  ;;  %v4654_v31 = vld [vmem:[#allocation2 + $0x3f] sm:$0xff] }
 0x117   : > { %6353 = vst [vmem:[#allocation9_spill] sm:$0xff] %v4636_v47  ;;  %758 = vst [vmem:[#allocation2 + $0x60] sm:$0xff] %v4636_v47  ;;  %v4643_v50 = vmax.f32 %v655_v48, 0.0  ;;  %v4649_v23 = vpack.c.bf16 %v4636_v47, %v4599_v22  ;;  %v4651_v25 = vld [vmem:[#allocation2 + $0x57] sm:$0xff]  ;;  %v4690_v17 = vpack.c.bf16 %v4654_v31, %v4611_v29 }
 0x118   : > { %6354 = vst [vmem:[#allocation10_spill] sm:$0xff] %v4640_v49  ;;  %6357 = vst [vmem:[#allocation13_spill] sm:$0xff] %v4651_v25 }
 0x119   : > { %6355 = vst [vmem:[#allocation11_spill] sm:$0xff] %v4643_v50  ;;  %6356 = vst [vmem:[#allocation12_spill] sm:$0xff] %v4649_v23  ;;  %v4656_v52 = vld [vmem:[#allocation2 + $0x47] sm:$0xff]  ;;  %v4658_v35 = vld [vmem:[#allocation2 + $0x4f] sm:$0xff]  ;;  %v3659_v54 = vpop.f32.mrb[12].mxu0  ;;  %1744 = vmatmul.mubr.bf16.gmra.mrb[56].mxu0 %v848_v51  ;;  %v4665_v57 = vpack.c.bf16 %v4633_v44, %v4643_v50 }
 0x11a   : > { %761 = vst [vmem:[#allocation2 + $0x78] sm:$0xff] %v4640_v49  ;;  %6358 = vst [vmem:[#allocation14_spill] sm:$0xff] %v4654_v31  ;;  %v660_v61 = vadd.f32 %v3659_v54, %v4554_v55  ;;  %v503_v62 = vpop.f32.mrb[13].mxu0  ;;  %1751 = vmatprep.mubr.bf16.mxu0 %v4609_v28 }
 0x11b   : > { %6359 = vst [vmem:[#allocation15_spill] sm:$0xff] %v4656_v52  ;;  %6360 = vst [vmem:[#allocation16_spill] sm:$0xff] %v4658_v35  ;;  %v658_v1 = vadd.f32 %v503_v62, %v4559_v56  ;;  %v3660_v4 = vpop.f32.mrb[14].mxu0 }
 0x11c   : > { %759 = vst [vmem:[#allocation2 + $0x68] sm:$0xff] %v4643_v50  ;;  %6361 = vst [vmem:[#allocation17_spill] sm:$0xff] %v4665_v57  ;;  %v4676_v7 = vmax.f32 %v660_v61, 0.0  ;;  %v661_v9 = vadd.f32 %v3660_v4, %v4559_v56  ;;  %v506_v10 = vpop.f32.mrb[15].mxu0 }
 0x11d   : > { %v4679_v12 = vmax.f32 %v658_v1, 0.0  ;;  %v659_v13 = vadd.f32 %v506_v10, %v4565_v60  ;;  %6366 = vst [vmem:[#allocation22_spill] sm:$0xff] %v4690_v17 }
 0x11e   : > { %6362 = vst [vmem:[#allocation18_spill] sm:$0xff] %v4676_v7  ;;  %764 = vst [vmem:[#allocation2 + $0x90] sm:$0xff] %v4676_v7  ;;  %v4683_v14 = vmax.f32 %v661_v9, 0.0  ;;  %v4699_v21 = vld [vmem:[#allocation2 + $0x5f] sm:$0xff] }
 0x11f   : > { %6363 = vst [vmem:[#allocation19_spill] sm:$0xff] %v4679_v12  ;;  %762 = vst [vmem:[#allocation2 + $0x80] sm:$0xff] %v4679_v12  ;;  %v4686_v15 = vmax.f32 %v659_v13, 0.0  ;;  %v4694_v18 = vpack.c.bf16 %v4679_v12, %v4640_v49 }
 0x120   : > { %6364 = vst [vmem:[#allocation20_spill] sm:$0xff] %v4683_v14  ;;  %765 = vst [vmem:[#allocation2 + $0x98] sm:$0xff] %v4683_v14 }
 0x121   : > { %6365 = vst [vmem:[#allocation21_spill] sm:$0xff] %v4686_v15  ;;  %6367 = vst [vmem:[#allocation23_spill] sm:$0xff] %v4694_v18  ;;  %v4696_v19 = vld [vmem:[#allocation2 + $0x77] sm:$0xff]  ;;  %v3663_v40 = vpop.f32.mrb[16].mxu0  ;;  %1752 = vmatmul.mubr.bf16.gmra.mrb[60].mxu0 %v4690_v17  ;;  %v4711_v42 = vpack.c.bf16 %v4676_v7, %v4686_v15 }
 0x122   : > { %6368 = vst [vmem:[#allocation24_spill] sm:$0xff] %v4696_v19  ;;  %6369 = vst [vmem:[#allocation25_spill] sm:$0xff] %v4699_v21  ;;  %v664_v46 = vadd.f32 %v3663_v40, %v4559_v56  ;;  %v519_v48 = vpop.f32.mrb[17].mxu0  ;;  %1759 = vmatprep.mubr.bf16.mxu0 %v4623_v36 }
 0x123   : > { %v4701_v27 = vld [vmem:[#allocation2 + $0x67] sm:$0xff]  ;;  %v4703_v34 = vld [vmem:[#allocation2 + $0x6f] sm:$0xff]  ;;  %763 = vst [vmem:[#allocation2 + $0x88] sm:$0xff] %v4686_v15  ;;  %6372 = vst [vmem:[#allocation28_spill] sm:$0xff] %v4711_v42  ;;  %v662_v54 = vadd.f32 %v519_v48, %v4565_v60  ;;  %v3664_v61 = vpop.f32.mrb[18].mxu0  ;;  %v4736_v48 = vpack.c.bf16 %v4658_v35, %v4656_v52 }
 0x124   : > { %6370 = vst [vmem:[#allocation26_spill] sm:$0xff] %v4701_v27  ;;  %6371 = vst [vmem:[#allocation27_spill] sm:$0xff] %v4703_v34  ;;  %v4722_v62 = vmax.f32 %v664_v46, 0.0  ;;  %v665_v1 = vadd.f32 %v3664_v61, %v4565_v60  ;;  %v522_v4 = vpop.f32.mrb[19].mxu0 }
 0x125   : > { %v4725_v9 = vmax.f32 %v662_v54, 0.0  ;;  %v663_v10 = vadd.f32 %v522_v4, %v4554_v55  ;;  %6377 = vst [vmem:[#allocation33_spill] sm:$0xff] %v4736_v48 }
 0x126   : > { %6373 = vst [vmem:[#allocation29_spill] sm:$0xff] %v4722_v62  ;;  %768 = vst [vmem:[#allocation2 + $0xb0] sm:$0xff] %v4722_v62  ;;  %v4729_v13 = vmax.f32 %v665_v1, 0.0  ;;  %v4745_v61 = vld [vmem:[#allocation2 + $0x7f] sm:$0xff] }
 0x127   : > { %6374 = vst [vmem:[#allocation30_spill] sm:$0xff] %v4725_v9  ;;  %766 = vst [vmem:[#allocation2 + $0xa0] sm:$0xff] %v4725_v9  ;;  %v4732_v40 = vmax.f32 %v663_v10, 0.0  ;;  %v4738_v46 = vld [vmem:[#allocation2 + $0x97] sm:$0xff]  ;;  %v4742_v54 = vpack.c.bf16 %v4725_v9, %v4683_v14 }
 0x128   : > { %6375 = vst [vmem:[#allocation31_spill] sm:$0xff] %v4729_v13  ;;  %6378 = vst [vmem:[#allocation34_spill] sm:$0xff] %v4738_v46  ;;  %v4777_v10 = vld [vmem:[#allocation2 + $0x91] sm:$0xff] }
 0x129   : > { %6376 = vst [vmem:[#allocation32_spill] sm:$0xff] %v4732_v40  ;;  %6379 = vst [vmem:[#allocation35_spill] sm:$0xff] %v4742_v54  ;;  %v3667_v39 = vpop.f32.mrb[20].mxu0  ;;  %1760 = vmatmul.mubr.bf16.gmra.mrb[64].mxu0 %v4736_v48  ;;  %v4757_v51 = vpack.c.bf16 %v4722_v62, %v4732_v40 }
 0x12a   : > { %769 = vst [vmem:[#allocation2 + $0xb8] sm:$0xff] %v4729_v13  ;;  %6380 = vst [vmem:[#allocation36_spill] sm:$0xff] %v4745_v61  ;;  %v4747_v1 = vld [vmem:[#allocation2 + $0x87] sm:$0xff]  ;;  %v4749_v4 = vld [vmem:[#allocation2 + $0x8f] sm:$0xff]  ;;  %v668_v43 = vadd.f32 %v3667_v39, %v4565_v60  ;;  %v535_v53 = vpop.f32.mrb[21].mxu0  ;;  %1767 = vmatprep.mubr.bf16.mxu0 %v4649_v23 }
 0x12b   : > { %6381 = vst [vmem:[#allocation37_spill] sm:$0xff] %v4747_v1  ;;  %6382 = vst [vmem:[#allocation38_spill] sm:$0xff] %v4749_v4  ;;  %v666_v59 = vadd.f32 %v535_v53, %v4554_v55  ;;  %v3668_v58 = vpop.f32.mrb[22].mxu0 }
 0x12c   : > { %767 = vst [vmem:[#allocation2 + $0xa8] sm:$0xff] %v4732_v40  ;;  %6383 = vst [vmem:[#allocation39_spill] sm:$0xff] %v4757_v51  ;;  %v4768_v33 = vmax.f32 %v668_v43, 0.0  ;;  %v669_v41 = vadd.f32 %v3668_v58, %v4554_v55  ;;  %v538_v38 = vpop.f32.mrb[23].mxu0  ;;  %v4786_v58 = vpack.c.bf16 %v4699_v21, %v4651_v25  ;;  %v4790_v43 = vld [vmem:[#allocation2 + $0x89] sm:$0xff] }
 0x12d   : > { %v4771_v45 = vmax.f32 %v666_v59, 0.0  ;;  %v667_v39 = vadd.f32 %v538_v38, %v4559_v56  ;;  %6387 = vst [vmem:[#allocation43_spill] sm:$0xff] %v4777_v10  ;;  %6391 = vst [vmem:[#allocation47_spill] sm:$0xff] %v4790_v43  ;;  %v4822_v23 = vpack.c.bf16 %v4777_v10, %v4790_v43 }
 0x12e   : > { %6384 = vst [vmem:[#allocation40_spill] sm:$0xff] %v4768_v33  ;;  %772 = vst [vmem:[#allocation2 + $0xd0] sm:$0xff] %v4768_v33  ;;  %v4775_v37 = vmax.f32 %v669_v41, 0.0  ;;  %v4779_v8 = vld [vmem:[#allocation2 + $0x99] sm:$0xff] }
 0x12f   : > { %6385 = vst [vmem:[#allocation41_spill] sm:$0xff] %v4771_v45  ;;  %6388 = vst [vmem:[#allocation44_spill] sm:$0xff] %v4779_v8  ;;  %v4782_v53 = vmax.f32 %v667_v39, 0.0  ;;  %v4788_v59 = vld [vmem:[#allocation2 + $0x9f] sm:$0xff]  ;;  %v4796_v41 = vpack.c.bf16 %v4771_v45, %v4729_v13 }
 0x130   : > { %6386 = vst [vmem:[#allocation42_spill] sm:$0xff] %v4775_v37  ;;  %770 = vst [vmem:[#allocation2 + $0xc0] sm:$0xff] %v4771_v45 }
 0x131   : > { %6389 = vst [vmem:[#allocation45_spill] sm:$0xff] %v4782_v53  ;;  %6390 = vst [vmem:[#allocation46_spill] sm:$0xff] %v4786_v58  ;;  %v4792_v38 = vld [vmem:[#allocation2 + $0xb7] sm:$0xff]  ;;  %v3671_v48 = vpop.f32.mrb[24].mxu0  ;;  %1768 = vmatmul.mubr.bf16.gmra.mrb[68].mxu0 %v4786_v58  ;;  %v4826_v58 = vpack.c.bf16 %v4768_v33, %v4782_v53 }
 0x132   : > { %6392 = vst [vmem:[#allocation48_spill] sm:$0xff] %v4796_v41  ;;  %773 = vst [vmem:[#allocation2 + $0xd8] sm:$0xff] %v4775_v37  ;;  %v672_v28 = vadd.f32 %v3671_v48, %v4554_v55  ;;  %v551_v62 = vpop.f32.mrb[25].mxu0  ;;  %1775 = vmatprep.mubr.bf16.mxu0 %v4665_v57 }
 0x133   : > { %v4801_v39 = vld [vmem:[#allocation2 + $0xa7] sm:$0xff]  ;;  %v4803_v11 = vld [vmem:[#allocation2 + $0xaf] sm:$0xff]  ;;  %771 = vst [vmem:[#allocation2 + $0xc8] sm:$0xff] %v4782_v53  ;;  %6395 = vst [vmem:[#allocation51_spill] sm:$0xff] %v4822_v23  ;;  %v670_v9 = vadd.f32 %v551_v62, %v4559_v56  ;;  %v3672_v40 = vpop.f32.mrb[26].mxu0 }
 0x134   : > { %v4805_v2 = vld [vmem:[#allocation2 + $0xa1] sm:$0xff]  ;;  %v1025_v36 = vpack.c.bf16 %v4801_v39, %v4788_v59  ;;  %v4816_v17 = vld [vmem:[#allocation2 + $0xa9] sm:$0xff]  ;;  %6396 = vst [vmem:[#allocation52_spill] sm:$0xff] %v4826_v58  ;;  %v1026_v48 = vpack.c.bf16 %v4792_v38, %v4803_v11  ;;  %v4835_v7 = vmax.f32 %v672_v28, 0.0  ;;  %v673_v14 = vadd.f32 %v3672_v40, %v4559_v56  ;;  %v554_v10 = vpop.f32.mrb[27].mxu0  ;;  %v4849_v40 = vld [vmem:[#allocation2 + $0xb1] sm:$0xff] }
 0x135   : > { %6393 = vst [vmem:[#allocation49_spill] sm:$0xff] %v4805_v2  ;;  %6394 = vst [vmem:[#allocation50_spill] sm:$0xff] %v4816_v17  ;;  %v4839_v33 = vmax.f32 %v670_v9, 0.0  ;;  %v671_v13 = vadd.f32 %v554_v10, %v4565_v60  ;;  %v6400_v28 = vmov 0   ;;  %v4883_v53 = vpack.c.bf16 %v4805_v2, %v4779_v8  ;;  %v4195_v2 = vld [vmem:[%s6231_s3 + $0x118] sm:$0xff]  }
 0x136   : > { %2016 = vmatprep.mubr.bf16.mxu1 %v1025_v36  ;;  %6397 = vst [vmem:[#allocation53_spill] sm:$0xff] %v4835_v7  ;;  %v4193_v36 = vld [vmem:[%s6231_s3 + $0x108] sm:$0xff]   ;;  %776 = vst [vmem:[#allocation2 + $0xf0] sm:$0xff] %v4835_v7  ;;  %v4846_v62 = vmax.f32 %v673_v14, 0.0 }
 0x137   : > { %2017 = vmatmul.mubr.bf16.vlgmr.msra.gmra.mrb[0].mxu1 %v4822_v23  ;;  %6398 = vst [vmem:[#allocation54_spill] sm:$0xff] %v4839_v33  ;;  %6401 = vst [vmem:[#allocation56_spill] sm:$0xff] %v4849_v40  ;;  %v4851_v57 = vld [vmem:[#allocation2 + $0xb9] sm:$0xff]  ;;  %v4854_v9 = vmax.f32 %v671_v13, 0.0  ;;  %v4862_v10 = vpack.c.bf16 %v4839_v33, %v4775_v37  ;;  %v4194_v37 = vld [vmem:[%s6231_s3 + $0x110] sm:$0xff]  }
 0x138   : > { %2146 = vmatpush1.bf16.msra.mxu1 %v4192_v0  ;;  %2024 = vmatprep.mubr.bf16.mxu1 %v1026_v48  ;;  %6399 = vst [vmem:[#allocation55_spill] sm:$0xff] %v4846_v62  ;;  %6402 = vst [vmem:[#allocation57_spill] sm:$0xff] %v4851_v57  ;;  %v4858_v0 = vpack.c.bf16 %v4703_v34, %v4701_v27  ;;  %v4873_v13 = vld [vmem:[#allocation2 + $0xbf] sm:$0xff] }
 0x139   : > { %2147 = vmatprep.subr.bf16.mxu1 %v6400_v28  ;;  %774 = vst [vmem:[#allocation2 + $0xe0] sm:$0xff] %v4839_v33  ;;  %6403 = vst [vmem:[#allocation58_spill] sm:$0xff] %v4854_v9  ;;  %v3675_v45 = vpop.f32.mrb[28].mxu0  ;;  %v4904_v44 = vld [vmem:[#allocation2 + $0xd1] sm:$0xff]  ;;  %v4196_v33 = vld [vmem:[%s6231_s3 + $0x120] sm:$0xff]  }
 0x13a   : > { %6404 = vst [vmem:[#allocation59_spill] sm:$0xff] %v4858_v0  ;;  %6405 = vst [vmem:[#allocation60_spill] sm:$0xff] %v4862_v10  ;;  %v4867_v48 = vld [vmem:[#allocation2 + $0xc7] sm:$0xff]  ;;  %1776 = vmatmul.mubr.bf16.gmra.mrb[72].mxu0 %v4858_v0  ;;  %v567_v0 = vpop.f32.mrb[29].mxu0 }
 0x13b   : > { %777 = vst [vmem:[#allocation2 + $0xf8] sm:$0xff] %v4846_v62  ;;  %775 = vst [vmem:[#allocation2 + $0xe8] sm:$0xff] %v4854_v9  ;;  %v4878_v14 = vld [vmem:[#allocation2 + $0xc9] sm:$0xff]  ;;  %1783 = vmatprep.mubr.bf16.mxu0 %v4694_v18  ;;  %v1027_v23 = vpack.c.bf16 %v4867_v48, %v4873_v13  ;;  %v4889_v34 = vld [vmem:[#allocation2 + $0xc1] sm:$0xff]  ;;  %v674_v12 = vadd.f32 %v567_v0, %v4565_v60  ;;  %v3676_v15 = vpop.f32.mrb[30].mxu0  ;;  %v4894_v18 = vpack.c.bf16 %v4835_v7, %v4854_v9 }
 0x13c   : > { %2148 = vmatpush1.bf16.msra.mxu1 %v4193_v36  ;;  %6406 = vst [vmem:[#allocation61_spill] sm:$0xff] %v4878_v14  ;;  %6407 = vst [vmem:[#allocation62_spill] sm:$0xff] %v4883_v53  ;;  %v676_v36 = vadd.f32 %v3675_v45, %v4559_v56  ;;  %v677_v21 = vadd.f32 %v3676_v15, %v4565_v60  ;;  %v570_v27 = vpop.f32.mrb[31].mxu0 }
 0x13d   : > { %2149 = vmatprep.subr.bf16.mxu1 %v6400_v28  ;;  %6408 = vst [vmem:[#allocation63_spill] sm:$0xff] %v4889_v34  ;;  %6409 = vst [vmem:[#allocation64_spill] sm:$0xff] %v4894_v18  ;;  %v4906_v0 = vmax.f32 %v674_v12, 0.0  ;;  %v675_v7 = vadd.f32 %v570_v27, %v4554_v55  ;;  %v4923_v12 = vpack.c.bf16 %v4745_v61, %v4696_v19  ;;  %v4927_v27 = vld [vmem:[#allocation2 + $0xd7] sm:$0xff] }
 0x13e   : > { %v4901_v45 = vmax.f32 %v676_v36, 0.0  ;;  %6411 = vst [vmem:[#allocation66_spill] sm:$0xff] %v4904_v44  ;;  %v4913_v8 = vmax.f32 %v677_v21, 0.0  ;;  %v4948_v36 = vpack.c.bf16 %v4849_v40, %v4816_v17  ;;  %v4197_v40 = vld [vmem:[%s6231_s3 + $0x128] sm:$0xff]  }
 0x13f   : > { %2025 = vmatmul.mubr.bf16.gmra.mrb[4].mxu1 %v4883_v53  ;;  %6412 = vst [vmem:[#allocation67_spill] sm:$0xff] %v4906_v0  ;;  %778 = vst [vmem:[#allocation2 + $0x100] sm:$0xff] %v4906_v0  ;;  %v4931_v21 = vpack.c.bf16 %v4906_v0, %v4846_v62 }
 0x140   : > { %6410 = vst [vmem:[#allocation65_spill] sm:$0xff] %v4901_v45  ;;  %2032 = vmatprep.mubr.bf16.mxu1 %v1027_v23  ;;  %2150 = vmatpush1.bf16.msra.mxu1 %v4194_v37  ;;  %780 = vst [vmem:[#allocation2 + $0x110] sm:$0xff] %v4901_v45  ;;  %v4916_v15 = vld [vmem:[#allocation2 + $0xd9] sm:$0xff]  ;;  %v4919_v23 = vmax.f32 %v675_v7, 0.0  ;;  %v4925_v37 = vld [vmem:[#allocation2 + $0xcf] sm:$0xff] }
 0x141   : > { %6413 = vst [vmem:[#allocation68_spill] sm:$0xff] %v4913_v8  ;;  %2151 = vmatprep.subr.bf16.mxu1 %v6400_v28  ;;  %6414 = vst [vmem:[#allocation69_spill] sm:$0xff] %v4916_v15  ;;  %v3679_v53 = vpop.f32.mrb[32].mxu0  ;;  %v1028_v7 = vpack.c.bf16 %v4927_v27, %v4925_v37  ;;  %v5002_v0 = vld [vmem:[#allocation2 + $0xdf] sm:$0xff] }
 0x142   : > { %6415 = vst [vmem:[#allocation70_spill] sm:$0xff] %v4919_v23  ;;  %6416 = vst [vmem:[#allocation71_spill] sm:$0xff] %v4923_v12  ;;  %1784 = vmatmul.mubr.bf16.gmra.mrb[76].mxu0 %v4923_v12  ;;  %v4943_v62 = vld [vmem:[#allocation2 + $0xe9] sm:$0xff]  ;;  %v680_v9 = vadd.f32 %v3679_v53, %v4565_v60  ;;  %v583_v12 = vpop.f32.mrb[33].mxu0  ;;  %v4969_v35 = vld [vmem:[#allocation2 + $0xf1] sm:$0xff] }
 0x143   : > { %6417 = vst [vmem:[#allocation72_spill] sm:$0xff] %v4931_v21  ;;  %781 = vst [vmem:[#allocation2 + $0x118] sm:$0xff] %v4913_v8  ;;  %1791 = vmatprep.mubr.bf16.mxu0 %v4711_v42  ;;  %v678_v61 = vadd.f32 %v583_v12, %v4554_v55  ;;  %v3680_v19 = vpop.f32.mrb[34].mxu0  ;;  %v4959_v42 = vpack.c.bf16 %v4901_v45, %v4919_v23 }
 0x144   : > { %779 = vst [vmem:[#allocation2 + $0x108] sm:$0xff] %v4919_v23  ;;  %2152 = vmatpush1.bf16.msra.mxu1 %v4195_v2  ;;  %6418 = vst [vmem:[#allocation73_spill] sm:$0xff] %v4948_v36  ;;  %v4954_v2 = vld [vmem:[#allocation2 + $0xe1] sm:$0xff]  ;;  %v4966_v53 = vmax.f32 %v680_v9, 0.0  ;;  %v681_v49 = vadd.f32 %v3680_v19, %v4554_v55  ;;  %v586_v43 = vpop.f32.mrb[35].mxu0  ;;  %v4985_v9 = vpack.c.bf16 %v4749_v4, %v4747_v1 }
 0x145   : > { %2153 = vmatprep.subr.bf16.mxu1 %v6400_v28  ;;  %6419 = vst [vmem:[#allocation74_spill] sm:$0xff] %v4954_v2  ;;  %6420 = vst [vmem:[#allocation75_spill] sm:$0xff] %v4959_v42  ;;  %v4971_v12 = vmax.f32 %v678_v61, 0.0  ;;  %v679_v45 = vadd.f32 %v586_v43, %v4559_v56  ;;  %v4987_v61 = vld [vmem:[#allocation2 + $0xe7] sm:$0xff] }
 0x146   : > { %6421 = vst [vmem:[#allocation76_spill] sm:$0xff] %v4966_v53  ;;  %784 = vst [vmem:[#allocation2 + $0x130] sm:$0xff] %v4966_v53  ;;  %v4978_v17 = vmax.f32 %v681_v49, 0.0  ;;  %v4981_v19 = vld [vmem:[#allocation2 + $0xf9] sm:$0xff]  ;;  %v5013_v49 = vpack.c.bf16 %v4889_v34, %v4851_v57 }
 0x147   : > { %2033 = vmatmul.mubr.bf16.gmra.mrb[8].mxu1 %v4948_v36  ;;  %6422 = vst [vmem:[#allocation77_spill] sm:$0xff] %v4971_v12  ;;  %6424 = vst [vmem:[#allocation79_spill] sm:$0xff] %v4985_v9  ;;  %v4994_v43 = vpack.c.bf16 %v4971_v12, %v4913_v8  ;;  %v4198_v8 = vld [vmem:[%s6231_s3 + $0x130] sm:$0xff]   ;;  %v4199_v34 = vld [vmem:[%s6231_s3 + $0x138] sm:$0xff]  }
 0x148   : > { %2040 = vmatprep.mubr.bf16.mxu1 %v1028_v7  ;;  %2154 = vmatpush1.bf16.msra.mxu1 %v4196_v33  ;;  %6423 = vst [vmem:[#allocation78_spill] sm:$0xff] %v4978_v17  ;;  %782 = vst [vmem:[#allocation2 + $0x120] sm:$0xff] %v4971_v12  ;;  %v4990_v33 = vmax.f32 %v679_v45, 0.0  ;;  %v1029_v7 = vpack.c.bf16 %v4987_v61, %v5002_v0 }
 0x149   : > { %2155 = vmatprep.subr.bf16.mxu1 %v6400_v28  ;;  %6426 = vst [vmem:[#allocation81_spill] sm:$0xff] %v4994_v43  ;;  %785 = vst [vmem:[#allocation2 + $0x138] sm:$0xff] %v4978_v17  ;;  %v3683_v45 = vpop.f32.mrb[36].mxu0 }
 0x14a   : > { %6425 = vst [vmem:[#allocation80_spill] sm:$0xff] %v4990_v33  ;;  %1792 = vmatmul.mubr.bf16.gmra.mrb[80].mxu0 %v4985_v9  ;;  %783 = vst [vmem:[#allocation2 + $0x128] sm:$0xff] %v4990_v33  ;;  %v684_v9 = vadd.f32 %v3683_v45, %v4554_v55  ;;  %v599_v36 = vpop.f32.mrb[37].mxu0  ;;  %v5034_v50 = vld [vmem:[#allocation2 + $0x111] sm:$0xff] }
 0x14b   : > { %v5008_v23 = vld [vmem:[#allocation2 + $0x109] sm:$0xff]  ;;  %1799 = vmatprep.mubr.bf16.mxu0 %v4742_v54  ;;  %6427 = vst [vmem:[#allocation82_spill] sm:$0xff] %v5013_v49  ;;  %v682_v4 = vadd.f32 %v599_v36, %v4559_v56  ;;  %v3684_v1 = vpop.f32.mrb[38].mxu0  ;;  %v5024_v54 = vpack.c.bf16 %v4966_v53, %v4990_v33 }
 0x14c   : > { %2156 = vmatpush1.bf16.msra.mxu1 %v4197_v40  ;;  %v5019_v40 = vld [vmem:[#allocation2 + $0x101] sm:$0xff]  ;;  %v5031_v45 = vmax.f32 %v684_v9, 0.0  ;;  %v685_v25 = vadd.f32 %v3684_v1, %v4559_v56  ;;  %v602_v47 = vpop.f32.mrb[39].mxu0  ;;  %v5050_v9 = vpack.c.bf16 %v4788_v59, %v4738_v46 }
 0x14d   : > { %2157 = vmatprep.subr.bf16.mxu1 %v6400_v28  ;;  %6428 = vst [vmem:[#allocation83_spill] sm:$0xff] %v5024_v54  ;;  %v5036_v36 = vmax.f32 %v682_v4, 0.0  ;;  %v683_v53 = vadd.f32 %v602_v47, %v4565_v60  ;;  %v5052_v4 = vld [vmem:[#allocation2 + $0xef] sm:$0xff]  ;;  %v5054_v47 = vld [vmem:[#allocation2 + $0xf7] sm:$0xff] }
 0x14e   : > { %6429 = vst [vmem:[#allocation84_spill] sm:$0xff] %v5031_v45  ;;  %788 = vst [vmem:[#allocation2 + $0x150] sm:$0xff] %v5031_v45  ;;  %v5043_v57 = vmax.f32 %v685_v25, 0.0  ;;  %v1030_v59 = vpack.c.bf16 %v5054_v47, %v5052_v4 }
 0x14f   : > { %2041 = vmatmul.mubr.bf16.gmra.mrb[12].mxu1 %v5013_v49  ;;  %6430 = vst [vmem:[#allocation85_spill] sm:$0xff] %v5036_v36  ;;  %v5046_v1 = vld [vmem:[#allocation2 + $0x119] sm:$0xff]  ;;  %6432 = vst [vmem:[#allocation87_spill] sm:$0xff] %v5050_v9  ;;  %v5061_v25 = vpack.c.bf16 %v5036_v36, %v4978_v17 }
 0x150   : > { %2048 = vmatprep.mubr.bf16.mxu1 %v1029_v7  ;;  %2158 = vmatpush1.bf16.msra.mxu1 %v4198_v8  ;;  %6431 = vst [vmem:[#allocation86_spill] sm:$0xff] %v5043_v57  ;;  %786 = vst [vmem:[#allocation2 + $0x140] sm:$0xff] %v5036_v36  ;;  %v5057_v8 = vmax.f32 %v683_v53, 0.0  ;;  %v4200_v53 = vld [vmem:[%s6231_s3 + $0x140] sm:$0xff]   ;;  %v5078_v7 = vpack.c.bf16 %v4904_v44, %v4878_v14  ;;  %v5099_v16 = vld [vmem:[#allocation2 + $0x131] sm:$0xff] }
 0x151   : > { %2159 = vmatprep.subr.bf16.mxu1 %v6400_v28  ;;  %789 = vst [vmem:[#allocation2 + $0x158] sm:$0xff] %v5043_v57  ;;  %v3687_v12 = vpop.f32.mrb[40].mxu0  ;;  %v5073_v17 = vld [vmem:[#allocation2 + $0x129] sm:$0xff] }
 0x152   : > { %6433 = vst [vmem:[#allocation88_spill] sm:$0xff] %v5057_v8  ;;  %1800 = vmatmul.mubr.bf16.gmra.mrb[84].mxu0 %v5050_v9  ;;  %787 = vst [vmem:[#allocation2 + $0x148] sm:$0xff] %v5057_v8  ;;  %v688_v9 = vadd.f32 %v3687_v12, %v4559_v56  ;;  %v615_v33 = vpop.f32.mrb[41].mxu0  ;;  %v4201_v44 = vld [vmem:[%s6231_s3 + $0x148] sm:$0xff]  }
 0x153   : > { %1807 = vmatprep.mubr.bf16.mxu0 %v4757_v51  ;;  %6434 = vst [vmem:[#allocation89_spill] sm:$0xff] %v5078_v7  ;;  %v686_v49 = vadd.f32 %v615_v33, %v4565_v60  ;;  %v3688_v46 = vpop.f32.mrb[42].mxu0  ;;  %v5089_v51 = vpack.c.bf16 %v5031_v45, %v5057_v8 }
 0x154   : > { %2160 = vmatpush1.bf16.msra.mxu1 %v4199_v34  ;;  %v5084_v34 = vld [vmem:[#allocation2 + $0x121] sm:$0xff]  ;;  %v5096_v12 = vmax.f32 %v688_v9, 0.0  ;;  %v689_v31 = vadd.f32 %v3688_v46, %v4565_v60  ;;  %v618_v52 = vpop.f32.mrb[43].mxu0  ;;  %v5115_v9 = vpack.c.bf16 %v4803_v11, %v4801_v39 }
 0x155   : > { %2161 = vmatprep.subr.bf16.mxu1 %v6400_v28  ;;  %6435 = vst [vmem:[#allocation90_spill] sm:$0xff] %v5089_v51  ;;  %v5101_v33 = vmax.f32 %v686_v49, 0.0  ;;  %v687_v45 = vadd.f32 %v618_v52, %v4554_v55  ;;  %v5117_v49 = vld [vmem:[#allocation2 + $0xff] sm:$0xff]  ;;  %v5119_v52 = vld [vmem:[#allocation2 + $0x107] sm:$0xff] }
 0x156   : > { %6436 = vst [vmem:[#allocation91_spill] sm:$0xff] %v5096_v12  ;;  %792 = vst [vmem:[#allocation2 + $0x170] sm:$0xff] %v5096_v12  ;;  %v5108_v14 = vmax.f32 %v689_v31, 0.0  ;;  %v1031_v11 = vpack.c.bf16 %v5119_v52, %v5117_v49 }
 0x157   : > { %2049 = vmatmul.mubr.bf16.gmra.mrb[16].mxu1 %v5078_v7  ;;  %6437 = vst [vmem:[#allocation92_spill] sm:$0xff] %v5101_v33  ;;  %v5111_v46 = vld [vmem:[#allocation2 + $0x139] sm:$0xff]  ;;  %6439 = vst [vmem:[#allocation94_spill] sm:$0xff] %v5115_v9  ;;  %v5126_v31 = vpack.c.bf16 %v5101_v33, %v5043_v57 }
 0x158   : > { %2056 = vmatprep.mubr.bf16.mxu1 %v1030_v59  ;;  %2162 = vmatpush1.bf16.msra.mxu1 %v4200_v53  ;;  %6438 = vst [vmem:[#allocation93_spill] sm:$0xff] %v5108_v14  ;;  %790 = vst [vmem:[#allocation2 + $0x160] sm:$0xff] %v5101_v33  ;;  %v5122_v59 = vmax.f32 %v687_v45, 0.0  ;;  %v4202_v45 = vld [vmem:[%s6231_s3 + $0x150] sm:$0xff]   ;;  %v5143_v53 = vpack.c.bf16 %v4954_v2, %v4916_v15  ;;  %v4203_v2 = vld [vmem:[%s6231_s3 + $0x158] sm:$0xff]  }
 0x159   : > { %2163 = vmatprep.subr.bf16.mxu1 %v6400_v28  ;;  %6440 = vst [vmem:[#allocation95_spill] sm:$0xff] %v5126_v31  ;;  %793 = vst [vmem:[#allocation2 + $0x178] sm:$0xff] %v5108_v14  ;;  %v3691_v39 = vpop.f32.mrb[44].mxu0  ;;  %v5138_v57 = vld [vmem:[#allocation2 + $0x149] sm:$0xff]  ;;  %v5162_v32 = vld [vmem:[#allocation2 + $0x151] sm:$0xff] }
 0x15a   : > { %1808 = vmatmul.mubr.bf16.gmra.mrb[88].mxu0 %v5115_v9  ;;  %791 = vst [vmem:[#allocation2 + $0x168] sm:$0xff] %v5122_v59  ;;  %v692_v9 = vadd.f32 %v3691_v39, %v4565_v60  ;;  %v631_v36 = vpop.f32.mrb[45].mxu0  ;;  %v4206_v33 = vld [vmem:[%s6231_s3 + $0x170] sm:$0xff]  }
 0x15b   : > { %1815 = vmatprep.mubr.bf16.mxu0 %v4796_v41  ;;  %v690_v8 = vadd.f32 %v631_v36, %v4554_v55  ;;  %v3692_v7 = vpop.f32.mrb[46].mxu0  ;;  %v5154_v41 = vpack.c.bf16 %v5096_v12, %v5122_v59 }
 0x15c   : > { %2164 = vmatpush1.bf16.msra.mxu1 %v4201_v44  ;;  %v5149_v44 = vld [vmem:[#allocation2 + $0x141] sm:$0xff]  ;;  %v740_v60 = vmax.f32 %v692_v9, 0.0  ;;  %v693_v39 = vadd.f32 %v3692_v7, %v4554_v55  ;;  %v634_v22 = vpop.f32.mrb[47].mxu0  ;;  %v5175_v55 = vpack.c.bf16 %v4873_v13, %v4792_v38  ;;  %v5186_v7 = vld [vmem:[#allocation2 + $0x10f] sm:$0xff] }
 0x15d   : > { %2165 = vmatprep.subr.bf16.mxu1 %v6400_v28  ;;  %6441 = vst [vmem:[#allocation96_spill] sm:$0xff] %v5154_v41  ;;  %v5164_v36 = vmax.f32 %v690_v8, 0.0  ;;  %v691_v12 = vadd.f32 %v634_v22, %v4559_v56  ;;  %v4204_v38 = vld [vmem:[%s6231_s3 + $0x160] sm:$0xff]   ;;  %v4205_v22 = vld [vmem:[%s6231_s3 + $0x168] sm:$0xff]  }
 0x15e   : > { %796 = vst [vmem:[#allocation2 + $0x190] sm:$0xff] %v740_v60  ;;  %v741_v15 = vmax.f32 %v693_v39, 0.0  ;;  %6443 = vst [vmem:[#allocation98_spill] sm:$0xff] %v5175_v55  ;;  %v5226_v60 = vpack.c.bf16 %v4925_v37, %v4867_v48  ;;  %v5241_v48 = vld [vmem:[%s6231_s3 + $0x200] sm:$0xff]   ;;  %v5246_v37 = vpack.c.bf16 %v5019_v40, %v4981_v19 }
 0x15f   : > { %2057 = vmatmul.mubr.bf16.gmra.mrb[20].mxu1 %v5143_v53  ;;  %6442 = vst [vmem:[#allocation97_spill] sm:$0xff] %v5164_v36  ;;  %v5171_v9 = vld [vmem:[#allocation2 + $0x159] sm:$0xff]  ;;  %794 = vst [vmem:[#allocation2 + $0x180] sm:$0xff] %v5164_v36  ;;  %v5178_v8 = vmax.f32 %v691_v12, 0.0  ;;  %v5182_v56 = vpack.c.bf16 %v5164_v36, %v5108_v14  ;;  %v5230_v36 = vld [vmem:[#allocation2 + $0x127] sm:$0xff]  ;;  %3693 = vmatprep.subr.bf16.mxu0 %v5241_v48 }
 0x160   : > { %2064 = vmatprep.mubr.bf16.mxu1 %v1031_v11  ;;  %2166 = vmatpush1.bf16.msra.mxu1 %v4202_v45  ;;  %v5188_v11 = vld [vmem:[#allocation2 + $0x117] sm:$0xff]  ;;  %797 = vst [vmem:[#allocation2 + $0x198] sm:$0xff] %v741_v15  ;;  %v5202_v45 = vpack.c.bf16 %v4969_v35, %v4943_v62  ;;  %6446 = vst [vmem:[#allocation101_spill] sm:$0xff] %v5226_v60 }
 0x161   : > { %2167 = vmatprep.subr.bf16.mxu1 %v6400_v28  ;;  %6444 = vst [vmem:[#allocation99_spill] sm:$0xff] %v5178_v8  ;;  %795 = vst [vmem:[#allocation2 + $0x188] sm:$0xff] %v5178_v8  ;;  %v5195_v13 = vld [vmem:[#allocation2 + $0x161] sm:$0xff]  ;;  %v5197_v12 = vld [vmem:[#allocation2 + $0x169] sm:$0xff] }
 0x162   : > { %1816 = vmatmul.mubr.bf16.gmra.mrb[92].mxu0 %v5175_v55  ;;  %v5212_v39 = vld [vmem:[#allocation2 + $0x171] sm:$0xff] }
 0x163   : > { %1823 = vmatprep.mubr.bf16.mxu0 %v4826_v58  ;;  %v836_v8 = vld [vmem:[#allocation2 + $0x137] sm:$0xff] }
 0x164   : > { %2168 = vmatpush1.bf16.msra.mxu1 %v4203_v2  ;;  %v1032_v2 = vpack.c.bf16 %v5188_v11, %v5186_v7 }
 0x165   : > { %2169 = vmatprep.subr.bf16.mxu1 %v6400_v28  ;;  %v5217_v58 = vld [vmem:[#allocation2 + $0x190] sm:$0xff] }
 0x166   : > { %6445 = vst [vmem:[#allocation100_spill] sm:$0xff] %v5217_v58  ;;  %v5220_v15 = vld [vmem:[#allocation2 + $0x179] sm:$0xff]  ;;  %v835_v58 = vld [vmem:[#allocation2 + $0x12f] sm:$0xff] }
 0x167   : > { %2065 = vmatmul.mubr.bf16.gmra.mrb[24].mxu1 %v5202_v45 }
 0x168   : > { %2072 = vmatprep.mubr.bf16.mxu1 %v1032_v2  ;;  %2170 = vmatpush1.bf16.msra.mxu1 %v4204_v38  ;;  %v833_v2 = vld [vmem:[#allocation2 + $0x11f] sm:$0xff]  ;;  %v5232_v14 = vld [vmem:[#allocation2 + $0x18f] sm:$0xff]  ;;  %v5248_v55 = vld [vmem:[#allocation2 + $0x187] sm:$0xff] }
 0x169   : > { %2171 = vmatprep.subr.bf16.mxu1 %v6400_v28  ;;  %6447 = vst [vmem:[#allocation102_spill] sm:$0xff] %v5232_v14  ;;  %6448 = vst [vmem:[#allocation103_spill] sm:$0xff] %v5248_v55  ;;  %v838_v38 = vld [vmem:[#allocation2 + $0x147] sm:$0xff] }
 0x16a   : > { %1824 = vmatmul.mubr.bf16.gmra.mrb[96].mxu0 %v5226_v60  ;;  %v5262_v60 = vpack.c.bf16 %v5002_v0, %v4927_v27  ;;  %v5274_v0 = vpack.c.bf16 %v5052_v4, %v4987_v61  ;;  %v837_v27 = vld [vmem:[#allocation2 + $0x13f] sm:$0xff]  ;;  %v839_v61 = vld [vmem:[#allocation2 + $0x14f] sm:$0xff]  ;;  %v840_v4 = vld [vmem:[#allocation2 + $0x157] sm:$0xff] }
 0x16b   : > { %1831 = vmatprep.mubr.bf16.mxu0 %v4862_v10  ;;  %v4207_v10 = vld [vmem:[%s6231_s3 + $0x178] sm:$0xff]  }
 0x16c   : > { %2172 = vmatpush1.bf16.msra.mxu1 %v4205_v22  ;;  %v1033_v22 = vpack.c.bf16 %v5230_v36, %v833_v2  ;;  %6449 = vst [vmem:[#allocation104_spill] sm:$0xff] %v5262_v60  ;;  %6450 = vst [vmem:[#allocation105_spill] sm:$0xff] %v5274_v0 }
 0x16d   : > { %2173 = vmatprep.subr.bf16.mxu1 %v6400_v28 }
 0x16f   : > { %2073 = vmatmul.mubr.bf16.gmra.mrb[28].mxu1 %v5246_v37 }
 0x170   : > { %2080 = vmatprep.mubr.bf16.mxu1 %v1033_v22  ;;  %2174 = vmatpush1.bf16.msra.mxu1 %v4206_v33  ;;  %v5268_v33 = vpack.c.bf16 %v5034_v50, %v5008_v23  ;;  %v1034_v22 = vpack.c.bf16 %v836_v8, %v835_v58 }
 0x171   : > { %2175 = vmatprep.subr.bf16.mxu1 %v6400_v28 }
 0x172   : > { %1832 = vmatmul.mubr.bf16.gmra.mrb[100].mxu0 %v5262_v60  ;;  %v843_v60 = vld [vmem:[#allocation2 + $0x16f] sm:$0xff] }
 0x173   : > { %1839 = vmatprep.mubr.bf16.mxu0 %v4894_v18  ;;  %v1035_v18 = vpack.c.bf16 %v838_v38, %v837_v27 }
 0x174   : > { %2176 = vmatpush1.bf16.msra.mxu1 %v4207_v10  ;;  %v5280_v10 = vpack.c.bf16 %v5084_v34, %v5046_v1 }
 0x175   : > { %2370 = vmatprep.subr.bf16.mxu1 %v6400_v28 }
 0x177   : > { %2081 = vmatmul.mubr.bf16.gmra.mrb[32].mxu1 %v5268_v33 }
 0x178   : > { %2088 = vmatprep.mubr.bf16.mxu1 %v1034_v22  ;;  %v5285_v22 = vpack.c.bf16 %v5117_v49, %v5054_v47  ;;  %v841_v47 = vld [vmem:[#allocation2 + $0x15f] sm:$0xff]  ;;  %v842_v49 = vld [vmem:[#allocation2 + $0x167] sm:$0xff] }
 0x17a   : > { %1840 = vmatmul.mubr.bf16.gmra.mrb[104].mxu0 %v5274_v0  ;;  %6451 = vst [vmem:[#allocation106_spill] sm:$0xff] %v5285_v22  ;;  %v1036_v0 = vpack.c.bf16 %v840_v4, %v839_v61 }
 0x17b   : > { %1847 = vmatprep.mubr.bf16.mxu0 %v4931_v21  ;;  %v5291_v21 = vpack.c.bf16 %v5099_v16, %v5073_v17 }
 0x17f   : > { %2089 = vmatmul.mubr.bf16.gmra.mrb[36].mxu1 %v5280_v10 }
 0x180   : > { %2096 = vmatprep.mubr.bf16.mxu1 %v1035_v18  ;;  %v5296_v18 = vpack.c.bf16 %v5186_v7, %v5119_v52  ;;  %v844_v52 = vld [vmem:[#allocation2 + $0x177] sm:$0xff]  ;;  %v5312_v7 = vpack.c.bf16 %v5162_v32, %v5138_v57 }
 0x182   : > { %1848 = vmatmul.mubr.bf16.gmra.mrb[108].mxu0 %v5285_v22  ;;  %6452 = vst [vmem:[#allocation107_spill] sm:$0xff] %v5296_v18  ;;  %v1037_v22 = vpack.c.bf16 %v842_v49, %v841_v47 }
 0x183   : > { %1855 = vmatprep.mubr.bf16.mxu0 %v4959_v42  ;;  %v5302_v42 = vpack.c.bf16 %v5149_v44, %v5111_v46 }
 0x187   : > { %2097 = vmatmul.mubr.bf16.gmra.mrb[40].mxu1 %v5291_v21 }
 0x188   : > { %2104 = vmatprep.mubr.bf16.mxu1 %v1036_v0  ;;  %v5306_v0 = vpack.c.bf16 %v833_v2, %v5188_v11  ;;  %v5322_v11 = vpack.c.bf16 %v5195_v13, %v5171_v9 }
 0x18a   : > { %1856 = vmatmul.mubr.bf16.gmra.mrb[112].mxu0 %v5296_v18  ;;  %v5316_v18 = vpack.c.bf16 %v835_v58, %v5230_v36  ;;  %v5334_v58 = vpack.c.bf16 %v5212_v39, %v5197_v12 }
 0x18b   : > { %1863 = vmatprep.mubr.bf16.mxu0 %v4994_v43  ;;  %v1038_v43 = vpack.c.bf16 %v844_v52, %v843_v60 }
 0x18f   : > { %2105 = vmatmul.mubr.bf16.gmra.mrb[44].mxu1 %v5302_v42 }
 0x190   : > { %2112 = vmatprep.mubr.bf16.mxu1 %v1037_v22  ;;  %v845_v22 = vld [vmem:[#allocation2 + $0x17f] sm:$0xff] }
 0x191   : > { %v1039_v2 = vpack.c.bf16 %v5248_v55, %v845_v22  ;;  %v5339_v55 = vpack.c.bf16 %v839_v61, %v838_v38  ;;  %v5356_v38 = vpack.c.bf16 %v841_v47, %v840_v4  ;;  %v5358_v61 = vld [vmem:[#allocation2 + $0x39] sm:$0xff]  ;;  %v4209_v4 = vld [vmem:[%s6231_s3 + $0x188] sm:$0xff]   ;;  %v5376_v47 = vpack.c.bf16 %v843_v60, %v842_v49 }
 0x192   : > { %1864 = vmatmul.mubr.bf16.gmra.mrb[116].mxu0 %v5306_v0  ;;  %v4211_v60 = vld [vmem:[%s6231_s3 + $0x198] sm:$0xff]   ;;  %v5397_v49 = vpack.c.bf16 %v845_v22, %v844_v52  ;;  %v6458_v22 = vpack.c.bf16 %v4604_v26, %v4595_v20  ;;  %v4219_v20 = vld [vmem:[%s6231_s3 + $0x1b0] sm:$0xff]  }
 0x193   : > { %1871 = vmatprep.mubr.bf16.mxu0 %v5024_v54  ;;  %v5326_v54 = vpack.c.bf16 %v837_v27, %v836_v8  ;;  %v5341_v8 = vld [vmem:[#allocation2 + $0x181] sm:$0xff]  ;;  %6454 = vst [vmem:[#allocation109_spill] sm:$0xff] %v5356_v38  ;;  %v6459_v26 = vld [vmem:[#allocation6_spill] sm:$0xff] }
 0x194   : > { %v5343_v27 = vld [vmem:[#allocation2 + $0x21] sm:$0xff] }
 0x197   : > { %2113 = vmatmul.mubr.bf16.gmra.mrb[48].mxu1 %v5312_v7 }
 0x198   : > { %2120 = vmatprep.mubr.bf16.mxu1 %v1038_v43  ;;  %v5328_v43 = vld [vmem:[#allocation2 + $0x197] sm:$0xff] }
 0x199   : > { %6453 = vst [vmem:[#allocation108_spill] sm:$0xff] %v5328_v43  ;;  %v1040_v36 = vpack.c.bf16 %v5328_v43, %v5232_v14  ;;  %v5365_v14 = vld [vmem:[#allocation2 + $0x31] sm:$0xff] }
 0x19a   : > { %1872 = vmatmul.mubr.bf16.gmra.mrb[120].mxu0 %v5316_v18 }
 0x19b   : > { %1879 = vmatprep.mubr.bf16.mxu0 %v5061_v25 }
 0x19f   : > { %2121 = vmatmul.mubr.bf16.gmra.mrb[52].mxu1 %v5322_v11 }
 0x1a0   : > { %2128 = vmatprep.mubr.bf16.mxu1 %v1039_v2  ;;  %v5345_v2 = vld [vmem:[#allocation2 + $0x29] sm:$0xff] }
 0x1a1   : > { %v1071_v43 = vpack.c.bf16 %v5345_v2, %v5343_v27 }
 0x1a2   : > { %1880 = vmatmul.mubr.bf16.gmra.mrb[124].mxu0 %v5326_v54 }
 0x1a3   : > { %1887 = vmatprep.mubr.bf16.mxu0 %v5089_v51  ;;  %v5351_v51 = vpack.c.bf16 %v5341_v8, %v5220_v15 }
 0x1a7   : > { %2129 = vmatmul.mubr.bf16.gmra.mrb[56].mxu1 %v5334_v58 }
 0x1a8   : > { %2136 = vmatprep.mubr.bf16.mxu1 %v1040_v36  ;;  %v4208_v36 = vld [vmem:[%s6231_s3 + $0x180] sm:$0xff]  }
 0x1aa   : > { %1888 = vmatmul.mubr.bf16.gmra.mrb[128].mxu0 %v5339_v55 }
 0x1ab   : > { %1895 = vmatprep.mubr.bf16.mxu0 %v5126_v31  ;;  %v1072_v31 = vpack.c.bf16 %v5358_v61, %v5365_v14 }
 0x1af   : > { %2137 = vmatmul.mubr.bf16.gmra.mrb[60].mxu1 %v5351_v51 }
 0x1b0   : > { %2177 = vmatprep.mubr.bf16.mxu1 %v1071_v43  ;;  %v6455_v43 = vpack.c.bf16 %v4578_v6, %v4571_v3  ;;  %v4210_v3 = vld [vmem:[%s6231_s3 + $0x190] sm:$0xff]  }
 0x1b2   : > { %1896 = vmatmul.mubr.bf16.gmra.mrb[132].mxu0 %v5356_v38  ;;  %v5380_v38 = vld [vmem:[#allocation2 + $0x49] sm:$0xff] }
 0x1b3   : > { %1903 = vmatprep.mubr.bf16.mxu0 %v5154_v41  ;;  %v5378_v41 = vld [vmem:[#allocation2 + $0x41] sm:$0xff] }
 0x1b4   : > { %v1073_v6 = vpack.c.bf16 %v5380_v38, %v5378_v41 }
 0x1b7   : > { %2178 = vmatmul.mubr.bf16.vlgmr.msra.gmra.mrb[64].mxu1 %v6455_v43  ;;  %v5408_v43 = vld [vmem:[#allocation2 + $0x51] sm:$0xff] }
 0x1b8   : > { %2371 = vmatpush1.bf16.msra.mxu1 %v4208_v36  ;;  %2185 = vmatprep.mubr.bf16.mxu1 %v1072_v31  ;;  %v6456_v31 = vpack.c.bf16 %v4575_v5, %v4568_v63  ;;  %v5399_v36 = vld [vmem:[#allocation2 + $0x59] sm:$0xff]  ;;  %v6457_v5 = vpack.c.bf16 %v4614_v30, %v4601_v24  ;;  %v4215_v24 = vld [vmem:[%s6231_s3 + $0x1a8] sm:$0xff]  }
 0x1b9   : > { %2372 = vmatprep.subr.bf16.mxu1 %v6400_v28  ;;  %v4212_v63 = vld [vmem:[%s6231_s3 + $0x1a0] sm:$0xff]   ;;  %v1074_v52 = vpack.c.bf16 %v5399_v36, %v5408_v43  ;;  %v4214_v30 = vld [vmem:[%s6231_s3 + $0x208] sm:$0xff]  }
 0x1ba   : > { %1904 = vmatmul.mubr.bf16.gmra.mrb[136].mxu0 %v5376_v47 }
 0x1bb   : > { %1911 = vmatprep.mubr.bf16.mxu0 %v5182_v56 }
 0x1bc   : > { %2373 = vmatpush1.bf16.msra.mxu1 %v4209_v4  ;;  %v942_v4 = vld [vmem:[#allocation2 + $0x9] sm:$0xff] }
 0x1bd   : > { %2374 = vmatprep.subr.bf16.mxu1 %v6400_v28 }
 0x1bf   : > { %2186 = vmatmul.mubr.bf16.gmra.mrb[68].mxu1 %v6456_v31  ;;  %v5423_v31 = vld [vmem:[#allocation2 + $0x61] sm:$0xff] }
 0x1c0   : > { %2193 = vmatprep.mubr.bf16.mxu1 %v1073_v6  ;;  %2375 = vmatpush1.bf16.msra.mxu1 %v4210_v3  ;;  %v943_v3 = vld [vmem:[#allocation2 + $0x11] sm:$0xff] }
 0x1c1   : > { %2376 = vmatprep.subr.bf16.mxu1 %v6400_v28  ;;  %v990_v6 = vpack.c.bf16 %v943_v3, %v942_v4  ;;  %v4216_v4 = vld [vmem:[%s6231_s3 + $0x210] sm:$0xff]   ;;  %v6461_v3 = vld [vmem:[#allocation4_spill] sm:$0xff] }
 0x1c2   : > { %1912 = vmatmul.mubr.bf16.gmra.mrb[140].mxu0 %v5397_v49 }
 0x1c3   : > { %1952 = vmatprep.mubr.bf16.mxu0 %v6457_v5 }
 0x1c4   : > { %2377 = vmatpush1.bf16.msra.mxu1 %v4211_v60  ;;  %v5425_v60 = vld [vmem:[#allocation2 + $0x69] sm:$0xff] }
 0x1c5   : > { %2378 = vmatprep.subr.bf16.mxu1 %v6400_v28  ;;  %v1075_v5 = vpack.c.bf16 %v5425_v60, %v5423_v31 }
 0x1c7   : > { %2194 = vmatmul.mubr.bf16.gmra.mrb[72].mxu1 %v6458_v22 }
 0x1c8   : > { %2201 = vmatprep.mubr.bf16.mxu1 %v1074_v52  ;;  %2379 = vmatpush1.bf16.msra.mxu1 %v4212_v63  ;;  %v6460_v63 = vpack.c.bf16 %v4611_v29, %v6459_v26  ;;  %v6462_v52 = vld [vmem:[#allocation3_spill] sm:$0xff]  ;;  %v4223_v29 = vld [vmem:[%s6231_s3 + $0x1b8] sm:$0xff]  }
 0x1c9   : > { %2380 = vmatprep.subr.bf16.mxu1 %v6400_v28  ;;  %v6463_v22 = vpack.c.bf16 %v6461_v3, %v6462_v52  ;;  %v5451_v26 = vld [vmem:[#allocation2 + $0x79] sm:$0xff]  ;;  %v5459_v3 = vld [vmem:[#allocation2 + $0x71] sm:$0xff] }
 0x1ca   : > { %1953 = vmatmul.mubr.bf16.vlgmr.msra.gmra.mrb[48].mxu0 %v990_v6  ;;  %v4218_v52 = vld [vmem:[%s6231_s3 + $0x220] sm:$0xff]  }
 0x1cb   : > { %1960 = vmatprep.mubr.bf16.mxu0 %v6460_v63  ;;  %3694 = vmatpush3.bf16.msra.mxu0 %v5241_v48  ;;  %v944_v48 = vld [vmem:[#allocation2 + $0x19] sm:$0xff] }
 0x1cc   : > { %2381 = vmatpush1.bf16.msra.mxu1 %v4215_v24  ;;  %3695 = vmatprep.subr.bf16.mxu0 %v4214_v30  ;;  %v991_v6 = vpack.c.bf16 %v5343_v27, %v944_v48  ;;  %v4217_v24 = vld [vmem:[%s6231_s3 + $0x218] sm:$0xff]   ;;  %v6464_v63 = vld [vmem:[#allocation15_spill] sm:$0xff]  ;;  %v1076_v27 = vpack.c.bf16 %v5451_v26, %v5459_v3 }
 0x1cd   : > { %2382 = vmatprep.subr.bf16.mxu1 %v6400_v28 }
 0x1cf   : > { %2202 = vmatmul.mubr.bf16.gmra.mrb[76].mxu1 %v6463_v22  ;;  %3696 = vmatpush3.bf16.msra.mxu0 %v4214_v30  ;;  %v6467_v22 = vld [vmem:[#allocation11_spill] sm:$0xff] }
 0x1d0   : > { %2209 = vmatprep.mubr.bf16.mxu1 %v1075_v5  ;;  %2383 = vmatpush1.bf16.msra.mxu1 %v4219_v20  ;;  %v4224_v20 = vld [vmem:[%s6231_s3 + $0x1c0] sm:$0xff]   ;;  %v6465_v5 = vld [vmem:[#allocation14_spill] sm:$0xff] }
 0x1d1   : > { %2384 = vmatprep.subr.bf16.mxu1 %v6400_v28  ;;  %3697 = vmatprep.subr.bf16.mxu0 %v4216_v4  ;;  %v6466_v30 = vpack.c.bf16 %v6464_v63, %v6465_v5  ;;  %v4220_v63 = vld [vmem:[%s6231_s3 + $0x228] sm:$0xff]  }
 0x1d2   : > { %1961 = vmatmul.mubr.bf16.gmra.mrb[52].mxu0 %v991_v6  ;;  %v992_v6 = vpack.c.bf16 %v5365_v14, %v5345_v2  ;;  %v957_v5 = vld [vmem:[#allocation2 + $0x81] sm:$0xff]  ;;  %v4221_v14 = vld [vmem:[%s6231_s3 + $0x230] sm:$0xff]   ;;  %v6474_v2 = vld [vmem:[#allocation10_spill] sm:$0xff] }
 0x1d3   : > { %1968 = vmatprep.mubr.bf16.mxu0 %v6466_v30  ;;  %3698 = vmatpush3.bf16.msra.mxu0 %v4216_v4  ;;  %v4225_v4 = vld [vmem:[%s6231_s3 + $0x1c8] sm:$0xff]   ;;  %v6470_v30 = vld [vmem:[#allocation13_spill] sm:$0xff] }
 0x1d4   : > { %2385 = vmatpush1.bf16.msra.mxu1 %v4223_v29  ;;  %3699 = vmatprep.subr.bf16.mxu0 %v4217_v24  ;;  %v6468_v29 = vld [vmem:[#allocation9_spill] sm:$0xff] }
 0x1d5   : > { %2386 = vmatprep.subr.bf16.mxu1 %v6400_v28  ;;  %v6469_v48 = vpack.c.bf16 %v6467_v22, %v6468_v29  ;;  %v6473_v22 = vld [vmem:[#allocation47_spill] sm:$0xff] }
 0x1d6   : > { %v1077_v29 = vpack.c.bf16 %v6473_v22, %v957_v5 }
 0x1d7   : > { %2210 = vmatmul.mubr.bf16.gmra.mrb[80].mxu1 %v6469_v48  ;;  %3700 = vmatpush3.bf16.msra.mxu0 %v4217_v24  ;;  %v6475_v48 = vld [vmem:[#allocation8_spill] sm:$0xff] }
 0x1d8   : > { %2217 = vmatprep.mubr.bf16.mxu1 %v1076_v27  ;;  %2387 = vmatpush1.bf16.msra.mxu1 %v4224_v20  ;;  %v4226_v20 = vld [vmem:[%s6231_s3 + $0x1d0] sm:$0xff]   ;;  %v6471_v27 = vld [vmem:[#allocation16_spill] sm:$0xff] }
 0x1d9   : > { %2388 = vmatprep.subr.bf16.mxu1 %v6400_v28  ;;  %3701 = vmatprep.subr.bf16.mxu0 %v4218_v52  ;;  %v6472_v24 = vpack.c.bf16 %v6470_v30, %v6471_v27  ;;  %v4222_v30 = vld [vmem:[%s6231_s3 + $0x238] sm:$0xff]  }
 0x1da   : > { %1969 = vmatmul.mubr.bf16.gmra.mrb[56].mxu0 %v992_v6  ;;  %v4227_v6 = vld [vmem:[%s6231_s3 + $0x1d8] sm:$0xff]  }
 0x1db   : > { %1976 = vmatprep.mubr.bf16.mxu0 %v6472_v24  ;;  %3702 = vmatpush3.bf16.msra.mxu0 %v4218_v52  ;;  %v993_v52 = vpack.c.bf16 %v5378_v41, %v5358_v61  ;;  %v6477_v27 = vld [vmem:[#allocation26_spill] sm:$0xff]  ;;  %v6478_v24 = vld [vmem:[#allocation25_spill] sm:$0xff]  ;;  %v6481_v61 = vld [vmem:[#allocation19_spill] sm:$0xff] }
 0x1dc   : > { %2389 = vmatpush1.bf16.msra.mxu1 %v4225_v4  ;;  %3703 = vmatprep.subr.bf16.mxu0 %v4220_v63  ;;  %v6476_v4 = vpack.c.bf16 %v6474_v2, %v6475_v48  ;;  %v6479_v22 = vpack.c.bf16 %v6477_v27, %v6478_v24  ;;  %v6480_v41 = vld [vmem:[#allocation21_spill] sm:$0xff]  ;;  %v6484_v2 = vld [vmem:[#allocation43_spill] sm:$0xff]  ;;  %v6486_v27 = vld [vmem:[#allocation24_spill] sm:$0xff] }
 0x1dd   : > { %2390 = vmatprep.subr.bf16.mxu1 %v6400_v28  ;;  %v6487_v24 = vld [vmem:[#allocation27_spill] sm:$0xff] }
 0x1df   : > { %2218 = vmatmul.mubr.bf16.gmra.mrb[84].mxu1 %v6476_v4  ;;  %3704 = vmatpush3.bf16.msra.mxu0 %v4220_v63  ;;  %v6482_v63 = vpack.c.bf16 %v6480_v41, %v6481_v61  ;;  %v4229_v4 = vld [vmem:[%s6231_s3 + $0x1e8] sm:$0xff]   ;;  %v6490_v41 = vld [vmem:[#allocation18_spill] sm:$0xff] }
 0x1e0   : > { %2225 = vmatprep.mubr.bf16.mxu1 %v1077_v29  ;;  %2391 = vmatpush1.bf16.msra.mxu1 %v4226_v20  ;;  %v4228_v20 = vld [vmem:[%s6231_s3 + $0x1e0] sm:$0xff]   ;;  %v6483_v29 = vld [vmem:[#allocation44_spill] sm:$0xff]  ;;  %v6492_v61 = vld [vmem:[#allocation50_spill] sm:$0xff] }
 0x1e1   : > { %2392 = vmatprep.subr.bf16.mxu1 %v6400_v28  ;;  %3705 = vmatprep.subr.bf16.mxu0 %v4221_v14  ;;  %v6485_v48 = vpack.c.bf16 %v6483_v29, %v6484_v2  ;;  %v6495_v2 = vld [vmem:[#allocation37_spill] sm:$0xff] }
 0x1e2   : > { %1977 = vmatmul.mubr.bf16.gmra.mrb[60].mxu0 %v993_v52 }
 0x1e3   : > { %1984 = vmatprep.mubr.bf16.mxu0 %v6479_v22  ;;  %3706 = vmatpush3.bf16.msra.mxu0 %v4221_v14  ;;  %v994_v14 = vpack.c.bf16 %v5408_v43, %v5380_v38  ;;  %v6488_v22 = vpack.c.bf16 %v6486_v27, %v6487_v24  ;;  %v4231_v38 = vld [vmem:[%s6231_s3 + $0x1f8] sm:$0xff]   ;;  %v995_v43 = vpack.c.bf16 %v5423_v31, %v5399_v36  ;;  %v6498_v27 = vld [vmem:[#allocation32_spill] sm:$0xff] }
 0x1e4   : > { %2393 = vmatpush1.bf16.msra.mxu1 %v4227_v6  ;;  %3707 = vmatprep.subr.bf16.mxu0 %v4222_v30  ;;  %v4230_v6 = vld [vmem:[%s6231_s3 + $0x1f0] sm:$0xff]   ;;  %v6499_v24 = vld [vmem:[#allocation30_spill] sm:$0xff] }
 0x1e5   : > { %2394 = vmatprep.subr.bf16.mxu1 %v6400_v28  ;;  %v6505_v36 = vld [vmem:[#allocation38_spill] sm:$0xff] }
 0x1e7   : > { %2226 = vmatmul.mubr.bf16.gmra.mrb[88].mxu1 %v6482_v63  ;;  %3708 = vmatpush3.bf16.msra.mxu0 %v4222_v30  ;;  %v6493_v63 = vld [vmem:[#allocation49_spill] sm:$0xff] }
 0x1e8   : > { %2233 = vmatprep.mubr.bf16.mxu1 %v6485_v48  ;;  %2395 = vmatpush1.bf16.msra.mxu1 %v4228_v20  ;;  %v6489_v20 = vld [vmem:[#allocation20_spill] sm:$0xff]  ;;  %v6494_v29 = vpack.c.bf16 %v6492_v61, %v6493_v63  ;;  %v6507_v61 = vld [vmem:[#allocation31_spill] sm:$0xff]  ;;  %v6508_v63 = vld [vmem:[#allocation29_spill] sm:$0xff] }
 0x1e9   : > { %2396 = vmatprep.subr.bf16.mxu1 %v6400_v28  ;;  %v6491_v30 = vpack.c.bf16 %v6489_v20, %v6490_v41  ;;  %v6496_v48 = vld [vmem:[#allocation36_spill] sm:$0xff] }
 0x1ea   : > { %1985 = vmatmul.mubr.bf16.gmra.mrb[64].mxu0 %v994_v14  ;;  %v6502_v20 = vld [vmem:[#allocation56_spill] sm:$0xff] }
 0x1eb   : > { %1992 = vmatprep.mubr.bf16.mxu0 %v6488_v22  ;;  %v6500_v22 = vpack.c.bf16 %v6498_v27, %v6499_v24  ;;  %v6513_v27 = vld [vmem:[#allocation45_spill] sm:$0xff] }
 0x1ec   : > { %2397 = vmatpush1.bf16.msra.mxu1 %v4229_v4  ;;  %v6497_v4 = vpack.c.bf16 %v6495_v2, %v6496_v48  ;;  %v6511_v2 = vld [vmem:[#allocation63_spill] sm:$0xff]  ;;  %v6514_v24 = vld [vmem:[#allocation41_spill] sm:$0xff] }
 0x1ed   : > { %2398 = vmatprep.subr.bf16.mxu1 %v6400_v28 }
 0x1ef   : > { %2234 = vmatmul.mubr.bf16.gmra.mrb[92].mxu1 %v6491_v30  ;;  %v6504_v30 = vld [vmem:[#allocation34_spill] sm:$0xff] }
 0x1f0   : > { %2241 = vmatprep.mubr.bf16.mxu1 %v6494_v29  ;;  %2399 = vmatpush1.bf16.msra.mxu1 %v4230_v6  ;;  %v6501_v6 = vld [vmem:[#allocation57_spill] sm:$0xff]  ;;  %v6506_v31 = vpack.c.bf16 %v6504_v30, %v6505_v36  ;;  %v6509_v29 = vpack.c.bf16 %v6507_v61, %v6508_v63  ;;  %v6522_v36 = vld [vmem:[#allocation74_spill] sm:$0xff]  ;;  %v6527_v61 = vpack.c.bf16 %v4981_v19, %v4969_v35  ;;  %v6530_v63 = vld [vmem:[#allocation55_spill] sm:$0xff] }
 0x1f1   : > { %2400 = vmatprep.subr.bf16.mxu1 %v6400_v28  ;;  %v6503_v41 = vpack.c.bf16 %v6501_v6, %v6502_v20  ;;  %v996_v28 = vpack.c.bf16 %v5459_v3, %v5425_v60  ;;  %v6515_v60 = vpack.c.bf16 %v6513_v27, %v6514_v24  ;;  %v6516_v3 = vld [vmem:[#allocation69_spill] sm:$0xff]  ;;  %v6519_v20 = vld [vmem:[#allocation42_spill] sm:$0xff]  ;;  %v6537_v24 = vld [vmem:[#allocation67_spill] sm:$0xff] }
 0x1f2   : > { %1993 = vmatmul.mubr.bf16.gmra.mrb[68].mxu0 %v995_v43  ;;  %v6534_v35 = vld [vmem:[#allocation73_spill] sm:$0xff]  ;;  %v6535_v19 = vld [vmem:[#allocation82_spill] sm:$0xff] }
 0x1f3   : > { %2000 = vmatprep.mubr.bf16.mxu0 %v6497_v4  ;;  %v997_v4 = vpack.c.bf16 %v957_v5, %v5451_v26  ;;  %v6524_v26 = vld [vmem:[#allocation58_spill] sm:$0xff] }
 0x1f4   : > { %2401 = vmatpush1.bf16.msra.mxu1 %v4231_v38  ;;  %v6510_v38 = vld [vmem:[#allocation61_spill] sm:$0xff]  ;;  %v6525_v5 = vld [vmem:[#allocation54_spill] sm:$0xff] }
 0x1f5   : > { %v6512_v48 = vpack.c.bf16 %v6510_v38, %v6511_v2  ;;  %v6536_v27 = vld [vmem:[#allocation70_spill] sm:$0xff] }
 0x1f7   : > { %2242 = vmatmul.mubr.bf16.gmra.mrb[0].mxu1 %v6500_v22  ;;  %v6517_v22 = vld [vmem:[#allocation66_spill] sm:$0xff] }
 0x1f8   : > { %2249 = vmatprep.mubr.bf16.mxu1 %v6503_v41  ;;  %v6518_v6 = vpack.c.bf16 %v6516_v3, %v6517_v22  ;;  %v6520_v41 = vld [vmem:[#allocation40_spill] sm:$0xff]  ;;  %v6539_v22 = vpack.c.bf16 %v5046_v1, %v5034_v50 }
 0x1f9   : > { %v6521_v30 = vpack.c.bf16 %v6519_v20, %v6520_v41  ;;  %v6540_v20 = vld [vmem:[#allocation89_spill] sm:$0xff]  ;;  %v6541_v41 = vld [vmem:[#allocation68_spill] sm:$0xff] }
 0x1fa   : > { %2001 = vmatmul.mubr.bf16.gmra.mrb[72].mxu0 %v996_v28 }
 0x1fb   : > { %2008 = vmatprep.mubr.bf16.mxu0 %v6506_v31  ;;  %v6523_v31 = vpack.c.bf16 %v4943_v62, %v6522_v36 }
 0x1ff   : > { %2250 = vmatmul.mubr.bf16.gmra.mrb[4].mxu1 %v6509_v29  ;;  %v6531_v29 = vld [vmem:[#allocation53_spill] sm:$0xff] }
 0x200   : > { %2257 = vmatprep.mubr.bf16.mxu1 %v6512_v48  ;;  %v6532_v38 = vpack.c.bf16 %v6530_v63, %v6531_v29 }
 0x202   : > { %2009 = vmatmul.mubr.bf16.gmra.mrb[76].mxu0 %v997_v4 }
 0x203   : > { %3709 = vmatprep.mubr.bf16.mxu0 %v993_v52  ;;  %v6526_v52 = vpack.c.bf16 %v6524_v26, %v6525_v5  ;;  %v6544_v26 = vpack.c.bf16 %v5073_v17, %v5084_v34 }
 0x207   : > { %2258 = vmatmul.mubr.bf16.gmra.mrb[8].mxu1 %v6515_v60  ;;  %v6538_v60 = vpack.c.bf16 %v6536_v27, %v6537_v24 }
 0x208   : > { %2265 = vmatprep.mubr.bf16.mxu1 %v6518_v6 }
 0x20a   : > { %3710 = vmatmul.mubr.bf16.vlgmr.msra.gmra.mrb[144].mxu0 %v994_v14  ;;  %v6528_v14 = vld [vmem:[#allocation51_spill] sm:$0xff] }
 0x20b   : > { %3713 = vmatprep.mubr.bf16.mxu0 %v995_v43  ;;  %v6529_v43 = vld [vmem:[#allocation62_spill] sm:$0xff] }
 0x20f   : > { %2266 = vmatmul.mubr.bf16.gmra.mrb[12].mxu1 %v6521_v30  ;;  %v6542_v30 = vld [vmem:[#allocation65_spill] sm:$0xff] }
 0x210   : > { %2273 = vmatprep.mubr.bf16.mxu1 %v6523_v31  ;;  %v6543_v36 = vpack.c.bf16 %v6541_v41, %v6542_v30  ;;  %v1069_v41 = vld [vmem:[#allocation2 + $0x191] sm:$0xff]  ;;  %v1070_v30 = vld [vmem:[#allocation2 + $0x199] sm:$0xff] }
 0x212   : > { %3714 = vmatmul.mubr.bf16.gmra.mrb[148].mxu0 %v996_v28  ;;  %v6533_v28 = vpack.c.bf16 %v5008_v23, %v5019_v40 }
 0x213   : > { %3717 = vmatprep.mubr.bf16.mxu0 %v997_v4 }
 0x217   : > { %2274 = vmatmul.mubr.bf16.gmra.mrb[16].mxu1 %v6526_v52  ;;  %v6545_v52 = vld [vmem:[#allocation80_spill] sm:$0xff] }
 0x218   : > { %2281 = vmatprep.mubr.bf16.mxu1 %v6527_v61 }
 0x21a   : > { %3718 = vmatmul.mubr.bf16.gmra.mrb[152].mxu0 %v6528_v14 }
 0x21b   : > { %3721 = vmatprep.mubr.bf16.mxu0 %v6529_v43  ;;  %v6548_v43 = vpack.c.bf16 %v5111_v46, %v5099_v16 }
 0x21d   : > { %v5584_v62 = vpop.f32.mrb[80].mxu0 }
 0x21e   : > { %v1795_v2 = vpop.f32.mrb[81].mxu0 }
 0x21f   : > { %2282 = vmatmul.mubr.bf16.gmra.mrb[20].mxu1 %v6532_v38  ;;  %v5589_v48 = vpop.f32.mrb[82].mxu0 }
 0x220   : > { %2289 = vmatprep.mubr.bf16.mxu1 %v6533_v28  ;;  %v1798_v4 = vpop.f32.mrb[83].mxu0  ;;  %v6553_v28 = vpack.c.bf16 %v5138_v57, %v5149_v44 }
 0x222   : > { %3722 = vmatmul.mubr.bf16.gmra.mrb[156].mxu0 %v6534_v35 }
 0x223   : > { %3725 = vmatprep.mubr.bf16.mxu0 %v6535_v19  ;;  %v6559_v19 = vpack.c.bf16 %v5171_v9, %v5162_v32 }
 0x225   : > { %v5596_v3 = vpop.f32.mrb[84].mxu0 }
 0x226   : > { %v1803_v23 = vpop.f32.mrb[85].mxu0 }
 0x227   : > { %2290 = vmatmul.mubr.bf16.gmra.mrb[24].mxu1 %v6538_v60  ;;  %v5601_v40 = vpop.f32.mrb[86].mxu0 }
 0x228   : > { %2297 = vmatprep.mubr.bf16.mxu1 %v6539_v22  ;;  %v1806_v6 = vpop.f32.mrb[87].mxu0  ;;  %v6565_v22 = vpack.c.bf16 %v5197_v12, %v5195_v13  ;;  %v6570_v13 = vpack.c.bf16 %v5220_v15, %v5212_v39 }
 0x22a   : > { %3726 = vmatmul.mubr.bf16.gmra.mrb[160].mxu0 %v6540_v20  ;;  %v1068_v20 = vld [vmem:[#allocation2 + $0x189] sm:$0xff] }
 0x22b   : > { %3729 = vmatprep.mubr.bf16.mxu0 %v5143_v53  ;;  %v6546_v53 = vld [vmem:[#allocation77_spill] sm:$0xff] }
 0x22c   : > { %v6547_v61 = vpack.c.bf16 %v6545_v52, %v6546_v53  ;;  %v6573_v52 = vld [vmem:[#allocation91_spill] sm:$0xff] }
 0x22d   : > { %v5608_v31 = vpop.f32.mrb[88].mxu0 }
 0x22e   : > { %v1811_v50 = vpop.f32.mrb[89].mxu0 }
 0x22f   : > { %2298 = vmatmul.mubr.bf16.gmra.mrb[28].mxu1 %v6543_v36  ;;  %v5613_v1 = vpop.f32.mrb[90].mxu0  ;;  %v1107_v36 = vld [vmem:[#allocation2 + $0x1a1] sm:$0xff]  ;;  %v1110_v50 = vpack.c.bf16 %v1069_v41, %v1068_v20 }
 0x230   : > { %2305 = vmatprep.mubr.bf16.mxu1 %v6544_v26  ;;  %v1814_v5 = vpop.f32.mrb[91].mxu0 }
 0x231   : > { %v6572_v5 = vld [vmem:[#allocation93_spill] sm:$0xff] }
 0x232   : > { %3730 = vmatmul.mubr.bf16.gmra.mrb[164].mxu0 %v5202_v45  ;;  %v6549_v45 = vld [vmem:[#allocation78_spill] sm:$0xff]  ;;  %v6574_v53 = vpack.c.bf16 %v6572_v5, %v6573_v52  ;;  %v6598_v52 = vld [vmem:[#allocation59_spill] sm:$0xff] }
 0x233   : > { %3733 = vmatprep.mubr.bf16.mxu0 %v5246_v37  ;;  %v6550_v37 = vld [vmem:[#allocation76_spill] sm:$0xff] }
 0x234   : > { %v6551_v29 = vpack.c.bf16 %v6549_v45, %v6550_v37  ;;  %v6578_v45 = vld [vmem:[#allocation97_spill] sm:$0xff] }
 0x235   : > { %v5620_v14 = vpop.f32.mrb[92].mxu0 }
 0x236   : > { %v1819_v17 = vpop.f32.mrb[93].mxu0 }
 0x237   : > { %2306 = vmatmul.mubr.bf16.gmra.mrb[32].mxu1 %v6547_v61  ;;  %v5625_v34 = vpop.f32.mrb[94].mxu0  ;;  %v1094_v17 = vpack.c.bf16 %v1070_v30, %v1069_v41  ;;  %v6592_v41 = vld [vmem:[#allocation12_spill] sm:$0xff] }
 0x238   : > { %2313 = vmatprep.mubr.bf16.mxu1 %v6548_v43  ;;  %v1822_v63 = vpop.f32.mrb[95].mxu0 }
 0x239   : > { %v6577_v63 = vld [vmem:[#allocation99_spill] sm:$0xff] }
 0x23a   : > { %3734 = vmatmul.mubr.bf16.gmra.mrb[168].mxu0 %v5268_v33  ;;  %v6555_v33 = vld [vmem:[#allocation88_spill] sm:$0xff]  ;;  %v6579_v37 = vpack.c.bf16 %v6577_v63, %v6578_v45 }
 0x23b   : > { %3737 = vmatprep.mubr.bf16.mxu0 %v5280_v10  ;;  %v6556_v10 = vld [vmem:[#allocation85_spill] sm:$0xff] }
 0x23c   : > { %v6557_v4 = vpack.c.bf16 %v6555_v33, %v6556_v10  ;;  %v6582_v33 = vld [vmem:[#allocation100_spill] sm:$0xff] }
 0x23d   : > { %v5632_v38 = vpop.f32.mrb[96].mxu0 }
 0x23e   : > { %6552 = vst [vmem:[#allocation6_spill] sm:$0xff] %v5632_v38  ;;  %v1827_v16 = vpop.f32.mrb[97].mxu0 }
 0x23f   : > { %2314 = vmatmul.mubr.bf16.gmra.mrb[36].mxu1 %v6551_v29  ;;  %v5637_v46 = vpop.f32.mrb[98].mxu0 }
 0x240   : > { %2321 = vmatprep.mubr.bf16.mxu1 %v6553_v28  ;;  %6554 = vst [vmem:[#allocation4_spill] sm:$0xff] %v5637_v46  ;;  %v1830_v2 = vpop.f32.mrb[99].mxu0 }
 0x241   : > { %v5690_v2 = vld [vmem:[#allocation2 + $0x198] sm:$0xff] }
 0x242   : > { %3738 = vmatmul.mubr.bf16.gmra.mrb[172].mxu0 %v5291_v21  ;;  %v6561_v21 = vld [vmem:[#allocation86_spill] sm:$0xff]  ;;  %v1067_v10 = vpack.c.bf16 %v5690_v2, %v6582_v33 }
 0x243   : > { %3741 = vmatprep.mubr.bf16.mxu0 %v5302_v42  ;;  %v6562_v42 = vld [vmem:[#allocation84_spill] sm:$0xff] }
 0x244   : > { %v6563_v24 = vpack.c.bf16 %v6561_v21, %v6562_v42  ;;  %v6586_v42 = vld [vmem:[#allocation22_spill] sm:$0xff] }
 0x245   : > { %v5644_v35 = vpop.f32.mrb[100].mxu0 }
 0x246   : > { %6558 = vst [vmem:[#allocation3_spill] sm:$0xff] %v5644_v35  ;;  %v1835_v57 = vpop.f32.mrb[101].mxu0 }
 0x247   : > { %2322 = vmatmul.mubr.bf16.gmra.mrb[40].mxu1 %v6557_v4  ;;  %v5649_v44 = vpop.f32.mrb[102].mxu0 }
 0x248   : > { %2329 = vmatprep.mubr.bf16.mxu1 %v6559_v19  ;;  %6560 = vst [vmem:[#allocation15_spill] sm:$0xff] %v5649_v44  ;;  %v1838_v27 = vpop.f32.mrb[103].mxu0  ;;  %v6584_v19 = vld [vmem:[#allocation5_spill] sm:$0xff] }
 0x24a   : > { %3742 = vmatmul.mubr.bf16.gmra.mrb[176].mxu0 %v5312_v7  ;;  %v6567_v7 = vld [vmem:[#allocation92_spill] sm:$0xff] }
 0x24b   : > { %3745 = vmatprep.mubr.bf16.mxu0 %v5322_v11  ;;  %v6568_v11 = vpack.c.bf16 %v5122_v59, %v6567_v7  ;;  %v1093_v59 = vpack.c.bf16 %v1068_v20, %v5341_v8 }
 0x24d   : > { %v5656_v60 = vpop.f32.mrb[104].mxu0 }
 0x24e   : > { %6564 = vst [vmem:[#allocation14_spill] sm:$0xff] %v5656_v60  ;;  %v1843_v32 = vpop.f32.mrb[105].mxu0  ;;  %v6634_v60 = vpack.c.bf16 %v6582_v33, %v6577_v63  ;;  %v1095_v33 = vld [vmem:[#allocation2 + $0x19f] sm:$0xff] }
 0x24f   : > { %2330 = vmatmul.mubr.bf16.gmra.mrb[44].mxu1 %v6563_v24  ;;  %v5661_v9 = vpop.f32.mrb[106].mxu0 }
 0x250   : > { %2337 = vmatprep.mubr.bf16.mxu1 %v6565_v22  ;;  %6566 = vst [vmem:[#allocation11_spill] sm:$0xff] %v5661_v9  ;;  %v1846_v23 = vpop.f32.mrb[107].mxu0  ;;  %v6588_v22 = vld [vmem:[#allocation7_spill] sm:$0xff] }
 0x252   : > { %3746 = vmatmul.mubr.bf16.gmra.mrb[180].mxu0 %v5334_v58 }
 0x253   : > { %3749 = vmatprep.mubr.bf16.mxu0 %v5351_v51  ;;  %v1111_v51 = vpack.c.bf16 %v1107_v36, %v1070_v30  ;;  %v6594_v36 = vld [vmem:[#allocation46_spill] sm:$0xff] }
 0x255   : > { %v5668_v6 = vpop.f32.mrb[108].mxu0 }
 0x256   : > { %6569 = vst [vmem:[#allocation9_spill] sm:$0xff] %v5668_v6  ;;  %v1851_v12 = vpop.f32.mrb[109].mxu0 }
 0x257   : > { %2338 = vmatmul.mubr.bf16.gmra.mrb[48].mxu1 %v6568_v11  ;;  %v5673_v26 = vpop.f32.mrb[110].mxu0  ;;  %v6590_v11 = vld [vmem:[#allocation33_spill] sm:$0xff] }
 0x258   : > { %2345 = vmatprep.mubr.bf16.mxu1 %v6570_v13  ;;  %6571 = vst [vmem:[#allocation13_spill] sm:$0xff] %v5673_v26  ;;  %v1854_v58 = vpop.f32.mrb[111].mxu0 }
 0x25a   : > { %3750 = vmatmul.mubr.bf16.gmra.mrb[184].mxu0 %v1110_v50  ;;  %v6596_v50 = vld [vmem:[#allocation17_spill] sm:$0xff] }
 0x25b   : > { %3753 = vmatprep.mubr.bf16.mxu0 %v1111_v51 }
 0x25d   : > { %v5679_v61 = vpop.f32.mrb[112].mxu0 }
 0x25e   : > { %6575 = vst [vmem:[#allocation16_spill] sm:$0xff] %v5679_v61  ;;  %v1859_v15 = vpop.f32.mrb[113].mxu0 }
 0x25f   : > { %2346 = vmatmul.mubr.bf16.gmra.mrb[52].mxu1 %v6574_v53  ;;  %v5681_v39 = vpop.f32.mrb[114].mxu0  ;;  %v6600_v15 = vld [vmem:[#allocation23_spill] sm:$0xff] }
 0x260   : > { %2353 = vmatprep.mubr.bf16.mxu1 %v1093_v59  ;;  %6576 = vst [vmem:[#allocation47_spill] sm:$0xff] %v5681_v39  ;;  %v1862_v43 = vpop.f32.mrb[115].mxu0  ;;  %v6628_v39 = vld [vmem:[#allocation96_spill] sm:$0xff] }
 0x265   : > { %v5686_v29 = vpop.f32.mrb[116].mxu0 }
 0x266   : > { %6580 = vst [vmem:[#allocation10_spill] sm:$0xff] %v5686_v29  ;;  %v1867_v8 = vpop.f32.mrb[117].mxu0  ;;  %v6627_v29 = vld [vmem:[#allocation109_spill] sm:$0xff] }
 0x267   : > { %2354 = vmatmul.mubr.bf16.gmra.mrb[56].mxu1 %v6579_v37  ;;  %v5688_v28 = vpop.f32.mrb[118].mxu0  ;;  %v6602_v37 = vld [vmem:[#allocation71_spill] sm:$0xff] }
 0x268   : > { %2361 = vmatprep.mubr.bf16.mxu1 %v1094_v17  ;;  %6581 = vst [vmem:[#allocation8_spill] sm:$0xff] %v5688_v28  ;;  %v1870_v16 = vpop.f32.mrb[119].mxu0 }
 0x269   : > { %v6604_v16 = vld [vmem:[#allocation28_spill] sm:$0xff] }
 0x26d   : > { %v5694_v4 = vpop.f32.mrb[120].mxu0 }
 0x26e   : > { %6583 = vst [vmem:[#allocation26_spill] sm:$0xff] %v5694_v4  ;;  %v1875_v57 = vpop.f32.mrb[121].mxu0 }
 0x26f   : > { %2362 = vmatmul.mubr.bf16.gmra.mrb[60].mxu1 %v1067_v10  ;;  %v5697_v27 = vpop.f32.mrb[122].mxu0 }
 0x270   : > { %2402 = vmatprep.mubr.bf16.mxu1 %v6584_v19  ;;  %6585 = vst [vmem:[#allocation25_spill] sm:$0xff] %v5697_v27  ;;  %v1878_v21 = vpop.f32.mrb[123].mxu0  ;;  %v6626_v27 = vld [vmem:[#allocation95_spill] sm:$0xff] }
 0x271   : > { %v6606_v21 = vld [vmem:[#allocation79_spill] sm:$0xff] }
 0x275   : > { %v5700_v24 = vpop.f32.mrb[124].mxu0 }
 0x276   : > { %6587 = vst [vmem:[#allocation21_spill] sm:$0xff] %v5700_v24  ;;  %v1883_v32 = vpop.f32.mrb[125].mxu0 }
 0x277   : > { %2403 = vmatmul.mubr.bf16.vlgmr.msra.gmra.mrb[64].mxu1 %v6586_v42  ;;  %v5703_v23 = vpop.f32.mrb[126].mxu0 }
 0x278   : > { %2410 = vmatprep.mubr.bf16.mxu1 %v6588_v22  ;;  %6589 = vst [vmem:[#allocation19_spill] sm:$0xff] %v5703_v23  ;;  %v1886_v7 = vpop.f32.mrb[127].mxu0  ;;  %v6607_v22 = vld [vmem:[#allocation35_spill] sm:$0xff] }
 0x27d   : > { %v5706_v20 = vpop.f32.mrb[128].mxu0 }
 0x27e   : > { %6591 = vst [vmem:[#allocation44_spill] sm:$0xff] %v5706_v20  ;;  %v1891_v13 = vpop.f32.mrb[129].mxu0  ;;  %v6625_v20 = vld [vmem:[#allocation90_spill] sm:$0xff] }
 0x27f   : > { %2411 = vmatmul.mubr.bf16.gmra.mrb[68].mxu1 %v6590_v11  ;;  %v5709_v12 = vpop.f32.mrb[130].mxu0 }
 0x280   : > { %2418 = vmatprep.mubr.bf16.mxu1 %v6592_v41  ;;  %6593 = vst [vmem:[#allocation43_spill] sm:$0xff] %v5709_v12  ;;  %v1894_v30 = vpop.f32.mrb[131].mxu0  ;;  %v6608_v41 = vld [vmem:[#allocation87_spill] sm:$0xff] }
 0x281   : > { %v1108_v30 = vld [vmem:[#allocation2 + $0x1a9] sm:$0xff] }
 0x285   : > { %v5712_v58 = vpop.f32.mrb[132].mxu0 }
 0x286   : > { %6595 = vst [vmem:[#allocation24_spill] sm:$0xff] %v5712_v58  ;;  %v1899_v51 = vpop.f32.mrb[133].mxu0 }
 0x287   : > { %2419 = vmatmul.mubr.bf16.gmra.mrb[72].mxu1 %v6594_v36  ;;  %v5715_v59 = vpop.f32.mrb[134].mxu0  ;;  %v1109_v36 = vld [vmem:[#allocation2 + $0x1b1] sm:$0xff] }
 0x288   : > { %2426 = vmatprep.mubr.bf16.mxu1 %v6596_v50  ;;  %6597 = vst [vmem:[#allocation27_spill] sm:$0xff] %v5715_v59  ;;  %v1902_v5 = vpop.f32.mrb[135].mxu0  ;;  %v6609_v50 = vld [vmem:[#allocation39_spill] sm:$0xff] }
 0x289   : > { %v1112_v5 = vpack.c.bf16 %v1109_v36, %v1108_v30  ;;  %v6613_v30 = vld [vmem:[#allocation52_spill] sm:$0xff]  ;;  %v6624_v59 = vld [vmem:[#allocation83_spill] sm:$0xff] }
 0x28b   : > { %3754 = vmatmul.mubr.bf16.gmra.mrb[188].mxu0 %v1112_v5  ;;  %v4235_v5 = vld [vmem:[%s6233_s5 + $0x18] sm:$0xff]  }
 0x28d   : > { %v5718_v53 = vpop.f32.mrb[136].mxu0 }
 0x28e   : > { %6599 = vst [vmem:[#allocation20_spill] sm:$0xff] %v5718_v53  ;;  %v1907_v43 = vpop.f32.mrb[137].mxu0 }
 0x28f   : > { %2427 = vmatmul.mubr.bf16.gmra.mrb[76].mxu1 %v6598_v52  ;;  %v5721_v17 = vpop.f32.mrb[138].mxu0  ;;  %v6610_v43 = vld [vmem:[#allocation94_spill] sm:$0xff] }
 0x290   : > { %2434 = vmatprep.mubr.bf16.mxu1 %v6600_v15  ;;  %6601 = vst [vmem:[#allocation18_spill] sm:$0xff] %v5721_v17  ;;  %v1910_v45 = vpop.f32.mrb[139].mxu0 }
 0x295   : > { %v5724_v8 = vpop.f32.mrb[140].mxu0 }
 0x296   : > { %6603 = vst [vmem:[#allocation50_spill] sm:$0xff] %v5724_v8  ;;  %v1915_v10 = vpop.f32.mrb[141].mxu0  ;;  %v6622_v8 = vld [vmem:[#allocation107_spill] sm:$0xff] }
 0x297   : > { %2435 = vmatmul.mubr.bf16.gmra.mrb[80].mxu1 %v6602_v37  ;;  %v5727_v19 = vpop.f32.mrb[142].mxu0  ;;  %v6611_v37 = vld [vmem:[#allocation48_spill] sm:$0xff] }
 0x298   : > { %2442 = vmatprep.mubr.bf16.mxu1 %v6604_v16  ;;  %6605 = vst [vmem:[#allocation49_spill] sm:$0xff] %v5727_v19  ;;  %v1918_v57 = vpop.f32.mrb[143].mxu0 }
 0x29d   : > { %v5730_v42 = vpop.f32.mrb[48].mxu0 }
 0x29e   : > { %v1956_v32 = vpop.f32.mrb[49].mxu0 }
 0x29f   : > { %2443 = vmatmul.mubr.bf16.gmra.mrb[84].mxu1 %v6606_v21  ;;  %v5733_v7 = vpop.f32.mrb[50].mxu0  ;;  %v4232_v21 = vld [vmem:[%s6233_s5] sm:$0xff]   ;;  %v4234_v32 = vld [vmem:[%s6233_s5 + $0x10] sm:$0xff]  }
 0x2a0   : > { %2450 = vmatprep.mubr.bf16.mxu1 %v6607_v22  ;;  %v1959_v11 = vpop.f32.mrb[51].mxu0  ;;  %v4233_v22 = vld [vmem:[%s6233_s5 + $0x8] sm:$0xff]   ;;  %3757 = vmatprep.subr.bf16.mxu0 %v4232_v21 }
 0x2a1   : > { %3758 = vmatpush3.bf16.msra.mxu0 %v4232_v21  ;;  %v6612_v11 = vld [vmem:[#allocation98_spill] sm:$0xff] }
 0x2a2   : > { %3759 = vmatprep.subr.bf16.mxu0 %v4233_v22 }
 0x2a5   : > { %v5736_v13 = vpop.f32.mrb[52].mxu0  ;;  %3760 = vmatpush3.bf16.msra.mxu0 %v4233_v22  ;;  %v6616_v22 = vld [vmem:[#allocation104_spill] sm:$0xff] }
 0x2a6   : > { %v1964_v51 = vpop.f32.mrb[53].mxu0  ;;  %3761 = vmatprep.subr.bf16.mxu0 %v4234_v32 }
 0x2a7   : > { %2451 = vmatmul.mubr.bf16.gmra.mrb[88].mxu1 %v6608_v41  ;;  %v5739_v52 = vpop.f32.mrb[54].mxu0 }
 0x2a8   : > { %2458 = vmatprep.mubr.bf16.mxu1 %v6609_v50  ;;  %v1967_v15 = vpop.f32.mrb[55].mxu0 }
 0x2a9   : > { %3762 = vmatpush3.bf16.msra.mxu0 %v4234_v32  ;;  %v6614_v15 = vld [vmem:[#allocation101_spill] sm:$0xff] }
 0x2aa   : > { %3763 = vmatprep.subr.bf16.mxu0 %v4235_v5 }
 0x2ad   : > { %v5742_v45 = vpop.f32.mrb[56].mxu0  ;;  %3764 = vmatpush3.bf16.msra.mxu0 %v4235_v5  ;;  %v6619_v5 = vld [vmem:[#allocation72_spill] sm:$0xff] }
 0x2ae   : > { %v1972_v16 = vpop.f32.mrb[57].mxu0 }
 0x2af   : > { %2459 = vmatmul.mubr.bf16.gmra.mrb[92].mxu1 %v6610_v43  ;;  %v5745_v10 = vpop.f32.mrb[58].mxu0 }
 0x2b0   : > { %2466 = vmatprep.mubr.bf16.mxu1 %v6611_v37  ;;  %v1975_v57 = vpop.f32.mrb[59].mxu0  ;;  %v6615_v37 = vld [vmem:[#allocation60_spill] sm:$0xff] }
 0x2b5   : > { %v5757_v41 = vpop.f32.mrb[60].mxu0 }
 0x2b6   : > { %v1980_v36 = vpop.f32.mrb[61].mxu0 }
 0x2b7   : > { %2467 = vmatmul.mubr.bf16.gmra.mrb[0].mxu1 %v6612_v11  ;;  %v5760_v50 = vpop.f32.mrb[62].mxu0 }
 0x2b8   : > { %2474 = vmatprep.mubr.bf16.mxu1 %v6613_v30  ;;  %v1983_v51 = vpop.f32.mrb[63].mxu0  ;;  %v6617_v30 = vld [vmem:[#allocation64_spill] sm:$0xff] }
 0x2bd   : > { %v5766_v43 = vpop.f32.mrb[64].mxu0 }
 0x2be   : > { %v1988_v16 = vpop.f32.mrb[65].mxu0 }
 0x2bf   : > { %2475 = vmatmul.mubr.bf16.gmra.mrb[4].mxu1 %v6614_v15  ;;  %v5769_v57 = vpop.f32.mrb[66].mxu0  ;;  %v4236_v15 = vld [vmem:[%s6233_s5 + $0x20] sm:$0xff]  }
 0x2c0   : > { %2482 = vmatprep.mubr.bf16.mxu1 %v6615_v37  ;;  %v1991_v21 = vpop.f32.mrb[67].mxu0  ;;  %v6618_v37 = vld [vmem:[#allocation105_spill] sm:$0xff]  ;;  %3765 = vmatprep.subr.bf16.mxu0 %v4236_v15 }
 0x2c1   : > { %3766 = vmatpush3.bf16.msra.mxu0 %v4236_v15 }
 0x2c5   : > { %v5772_v11 = vpop.f32.mrb[68].mxu0 }
 0x2c6   : > { %v1996_v36 = vpop.f32.mrb[69].mxu0 }
 0x2c7   : > { %2483 = vmatmul.mubr.bf16.gmra.mrb[8].mxu1 %v6616_v22  ;;  %v5775_v32 = vpop.f32.mrb[70].mxu0 }
 0x2c8   : > { %2490 = vmatprep.mubr.bf16.mxu1 %v6617_v30  ;;  %v1999_v51 = vpop.f32.mrb[71].mxu0  ;;  %v4237_v30 = vld [vmem:[%s6233_s5 + $0x28] sm:$0xff]  }
 0x2c9   : > { %3767 = vmatprep.subr.bf16.mxu0 %v4237_v30  ;;  %v4238_v51 = vld [vmem:[%s6233_s5 + $0x30] sm:$0xff]  }
 0x2ca   : > { %3768 = vmatpush3.bf16.msra.mxu0 %v4237_v30 }
 0x2cb   : > { %3769 = vmatprep.subr.bf16.mxu0 %v4238_v51 }
 0x2cd   : > { %v5781_v16 = vpop.f32.mrb[72].mxu0 }
 0x2ce   : > { %v2004_v21 = vpop.f32.mrb[73].mxu0  ;;  %3770 = vmatpush3.bf16.msra.mxu0 %v4238_v51 }
 0x2cf   : > { %2491 = vmatmul.mubr.bf16.gmra.mrb[12].mxu1 %v6618_v37  ;;  %v5784_v22 = vpop.f32.mrb[74].mxu0  ;;  %v6620_v37 = vld [vmem:[#allocation106_spill] sm:$0xff] }
 0x2d0   : > { %2498 = vmatprep.mubr.bf16.mxu1 %v6619_v5  ;;  %v2007_v36 = vpop.f32.mrb[75].mxu0  ;;  %v6621_v5 = vld [vmem:[#allocation75_spill] sm:$0xff] }
 0x2d1   : > { %v4239_v36 = vld [vmem:[%s6233_s5 + $0x38] sm:$0xff]  }
 0x2d2   : > { %3771 = vmatprep.subr.bf16.mxu0 %v4239_v36 }
 0x2d3   : > { %3772 = vmatpush3.bf16.msra.mxu0 %v4239_v36 }
 0x2d5   : > { %v5793_v19 = vpop.f32.mrb[76].mxu0 }
 0x2d6   : > { %v2012_v15 = vpop.f32.mrb[77].mxu0 }
 0x2d7   : > { %2499 = vmatmul.mubr.bf16.gmra.mrb[16].mxu1 %v6620_v37  ;;  %v5796_v21 = vpop.f32.mrb[78].mxu0  ;;  %v6623_v37 = vld [vmem:[#allocation81_spill] sm:$0xff] }
 0x2d8   : > { %2506 = vmatprep.mubr.bf16.mxu1 %v6621_v5  ;;  %v2015_v30 = vpop.f32.mrb[79].mxu0 }
 0x2dd   : > { %v5802_v17 = vpop.f32.mrb[144].mxu0 }
 0x2de   : > { %v5805_v53 = vpop.f32.mrb[145].mxu0 }
 0x2df   : > { %2507 = vmatmul.mubr.bf16.gmra.mrb[20].mxu1 %v6622_v8  ;;  %v5807_v5 = vpop.f32.mrb[146].mxu0 }
 0x2e0   : > { %2514 = vmatprep.mubr.bf16.mxu1 %v6623_v37  ;;  %v5809_v51 = vpop.f32.mrb[147].mxu0 }
 0x2e5   : > { %v5812_v15 = vpop.f32.mrb[148].mxu0 }
 0x2e6   : > { %v5815_v30 = vpop.f32.mrb[149].mxu0 }
 0x2e7   : > { %2515 = vmatmul.mubr.bf16.gmra.mrb[24].mxu1 %v5306_v0  ;;  %v5817_v36 = vpop.f32.mrb[150].mxu0 }
 0x2e8   : > { %2522 = vmatprep.mubr.bf16.mxu1 %v6624_v59  ;;  %v5819_v8 = vpop.f32.mrb[151].mxu0 }
 0x2ed   : > { %v5822_v37 = vpop.f32.mrb[152].mxu0 }
 0x2ee   : > { %v5825_v58 = vpop.f32.mrb[153].mxu0 }
 0x2ef   : > { %2523 = vmatmul.mubr.bf16.gmra.mrb[28].mxu1 %v5316_v18  ;;  %v5827_v12 = vpop.f32.mrb[154].mxu0 }
 0x2f0   : > { %2530 = vmatprep.mubr.bf16.mxu1 %v5061_v25  ;;  %v5829_v0 = vpop.f32.mrb[155].mxu0 }
 0x2f5   : > { %v5832_v59 = vpop.f32.mrb[156].mxu0 }
 0x2f6   : > { %v5835_v23 = vpop.f32.mrb[157].mxu0 }
 0x2f7   : > { %2531 = vmatmul.mubr.bf16.gmra.mrb[32].mxu1 %v5326_v54  ;;  %v5837_v24 = vpop.f32.mrb[158].mxu0 }
 0x2f8   : > { %2538 = vmatprep.mubr.bf16.mxu1 %v6625_v20  ;;  %v5839_v18 = vpop.f32.mrb[159].mxu0 }
 0x2fd   : > { %v5842_v25 = vpop.f32.mrb[160].mxu0 }
 0x2fe   : > { %v5845_v4 = vpop.f32.mrb[161].mxu0 }
 0x2ff   : > { %2539 = vmatmul.mubr.bf16.gmra.mrb[36].mxu1 %v5339_v55  ;;  %v5847_v28 = vpop.f32.mrb[162].mxu0 }
 0x300   : > { %2546 = vmatprep.mubr.bf16.mxu1 %v6626_v27  ;;  %v5849_v54 = vpop.f32.mrb[163].mxu0 }
 0x305   : > { %v5852_v20 = vpop.f32.mrb[164].mxu0 }
 0x306   : > { %v5855_v61 = vpop.f32.mrb[165].mxu0 }
 0x307   : > { %2547 = vmatmul.mubr.bf16.gmra.mrb[40].mxu1 %v6627_v29  ;;  %v5857_v26 = vpop.f32.mrb[166].mxu0 }
 0x308   : > { %2554 = vmatprep.mubr.bf16.mxu1 %v6628_v39  ;;  %v5859_v55 = vpop.f32.mrb[167].mxu0 }
 0x30d   : > { %v5862_v27 = vpop.f32.mrb[168].mxu0 }
 0x30e   : > { %6629 = vst [vmem:[#allocation37_spill] sm:$0xff] %v5862_v27  ;;  %v5865_v6 = vpop.f32.mrb[169].mxu0 }
 0x30f   : > { %2555 = vmatmul.mubr.bf16.gmra.mrb[44].mxu1 %v5376_v47  ;;  %6630 = vst [vmem:[#allocation36_spill] sm:$0xff] %v5865_v6  ;;  %v5867_v9 = vpop.f32.mrb[170].mxu0  ;;  %v6639_v6 = vld [vmem:[#allocation103_spill] sm:$0xff] }
 0x310   : > { %2562 = vmatprep.mubr.bf16.mxu1 %v5182_v56  ;;  %6631 = vst [vmem:[#allocation32_spill] sm:$0xff] %v5867_v9  ;;  %v5869_v29 = vpop.f32.mrb[171].mxu0  ;;  %v4240_v56 = vld [vmem:[#allocation2 + $0x8] sm:$0xff]  ;;  %v6638_v9 = vld [vmem:[#allocation102_spill] sm:$0xff] }
 0x311   : > { %6632 = vst [vmem:[#allocation30_spill] sm:$0xff] %v5869_v29  ;;  %v1105_v35 = vpack.c.bf16 %v4240_v56, %v5690_v2  ;;  %v6640_v29 = vpack.c.bf16 %v6638_v9, %v6639_v6  ;;  %v1096_v9 = vld [vmem:[#allocation2 + $0x1a7] sm:$0xff]  ;;  %v1097_v6 = vld [vmem:[#allocation2 + $0x1af] sm:$0xff] }
 0x315   : > { %v5872_v39 = vpop.f32.mrb[172].mxu0 }
 0x316   : > { %6633 = vst [vmem:[#allocation57_spill] sm:$0xff] %v5872_v39  ;;  %v5877_v44 = vpop.f32.mrb[173].mxu0 }
 0x317   : > { %2563 = vmatmul.mubr.bf16.gmra.mrb[48].mxu1 %v5397_v49  ;;  %6635 = vst [vmem:[#allocation56_spill] sm:$0xff] %v5877_v44  ;;  %v5879_v47 = vpop.f32.mrb[174].mxu0  ;;  %v6645_v44 = vld [vmem:[#allocation108_spill] sm:$0xff] }
 0x318   : > { %2570 = vmatprep.mubr.bf16.mxu1 %v6634_v60  ;;  %6636 = vst [vmem:[#allocation34_spill] sm:$0xff] %v5879_v47  ;;  %v5881_v27 = vpop.f32.mrb[175].mxu0  ;;  %v1106_v47 = vpack.c.bf16 %v4240_v56, %v4240_v56 }
 0x319   : > { %6637 = vst [vmem:[#allocation38_spill] sm:$0xff] %v5881_v27  ;;  %v1099_v27 = vpack.c.bf16 %v1095_v33, %v6645_v44 }
 0x31d   : > { %v5887_v49 = vpop.f32.mrb[176].mxu0 }
 0x31e   : > { %6641 = vst [vmem:[#allocation31_spill] sm:$0xff] %v5887_v49  ;;  %v5889_v39 = vpop.f32.mrb[177].mxu0  ;;  %v1100_v49 = vpack.c.bf16 %v1097_v6, %v1096_v9 }
 0x31f   : > { %2571 = vmatmul.mubr.bf16.gmra.mrb[52].mxu1 %v6640_v29  ;;  %6642 = vst [vmem:[#allocation29_spill] sm:$0xff] %v5889_v39  ;;  %v5891_v63 = vpop.f32.mrb[178].mxu0 }
 0x320   : > { %2578 = vmatprep.mubr.bf16.mxu1 %v1105_v35  ;;  %6643 = vst [vmem:[#allocation61_spill] sm:$0xff] %v5891_v63  ;;  %v5893_v60 = vpop.f32.mrb[179].mxu0 }
 0x321   : > { %6644 = vst [vmem:[#allocation63_spill] sm:$0xff] %v5893_v60 }
 0x325   : > { %v5896_v46 = vpop.f32.mrb[180].mxu0 }
 0x326   : > { %6646 = vst [vmem:[#allocation45_spill] sm:$0xff] %v5896_v46  ;;  %v5898_v2 = vpop.f32.mrb[181].mxu0 }
 0x327   : > { %2579 = vmatmul.mubr.bf16.gmra.mrb[56].mxu1 %v1099_v27  ;;  %6647 = vst [vmem:[#allocation41_spill] sm:$0xff] %v5898_v2  ;;  %v5900_v29 = vpop.f32.mrb[182].mxu0  ;;  %v5915_v27 = vld [vmem:[%s6232_s4] ss:$0 sm:$0xff] }
 0x328   : > { %2586 = vmatprep.mubr.bf16.mxu1 %v1106_v47  ;;  %6648 = vst [vmem:[#allocation69_spill] sm:$0xff] %v5900_v29  ;;  %v5902_v35 = vpop.f32.mrb[183].mxu0  ;;  %v3853_v47 = vadd.f32 %v5915_v27, %v5730_v42  ;;  %v3857_v46 = vadd.f32 %v5915_v27, %v5736_v13  ;;  %v3859_v42 = vadd.f32 %v5915_v27, %v5739_v52 }
 0x329   : > { %6649 = vst [vmem:[#allocation66_spill] sm:$0xff] %v5902_v35  ;;  %v3861_v13 = vadd.f32 %v5915_v27, %v5742_v45  ;;  %v3863_v52 = vadd.f32 %v5915_v27, %v5745_v10  ;;  %v3865_v45 = vadd.f32 %v5915_v27, %v5757_v41  ;;  %v3867_v10 = vadd.f32 %v5915_v27, %v5760_v50 }
 0x32a   : > { %v3869_v41 = vadd.f32 %v5915_v27, %v5766_v43  ;;  %v3871_v50 = vadd.f32 %v5915_v27, %v5769_v57  ;;  %v3873_v43 = vadd.f32 %v5915_v27, %v5772_v11  ;;  %v3875_v57 = vadd.f32 %v5915_v27, %v5775_v32 }
 0x32b   : > { %v3877_v11 = vadd.f32 %v5915_v27, %v5781_v16  ;;  %v3879_v32 = vadd.f32 %v5915_v27, %v5784_v22  ;;  %v3881_v22 = vadd.f32 %v5915_v27, %v5793_v19  ;;  %v1794_v19 = vadd.f32 %v5915_v27, %v5584_v62 }
 0x32c   : > { %v1802_v62 = vadd.f32 %v5915_v27, %v5596_v3  ;;  %v1810_v3 = vadd.f32 %v5915_v27, %v5608_v31  ;;  %v1818_v31 = vadd.f32 %v5915_v27, %v5620_v14 }
 0x32d   : > { %v5904_v63 = vpop.f32.mrb[184].mxu0 }
 0x32e   : > { %6650 = vst [vmem:[#allocation42_spill] sm:$0xff] %v5904_v63  ;;  %v5906_v60 = vpop.f32.mrb[185].mxu0 }
 0x32f   : > { %2587 = vmatmul.mubr.bf16.gmra.mrb[60].mxu1 %v1100_v49  ;;  %6651 = vst [vmem:[#allocation40_spill] sm:$0xff] %v5906_v60  ;;  %v5908_v56 = vpop.f32.mrb[186].mxu0  ;;  %v3855_v49 = vadd.f32 %v5915_v27, %v5733_v7 }
 0x330   : > { %6652 = vst [vmem:[#allocation74_spill] sm:$0xff] %v5908_v56  ;;  %v5910_v44 = vpop.f32.mrb[187].mxu0 }
 0x331   : > { %6653 = vst [vmem:[#allocation58_spill] sm:$0xff] %v5910_v44 }
 0x34a   : > { %v2404_v33 = vpop.f32.mrb[64].mxu1 }
 0x34b   : > { %v3854_v9 = vadd.f32 %v3853_v47, %v2404_v33  ;;  %v2406_v6 = vpop.f32.mrb[65].mxu1 }
 0x34c   : > { %v2407_v63 = vpop.f32.mrb[66].mxu1 }
 0x34d   : > { %v2630_v60 = vadd.f32 %v3854_v9, %v5805_v53  ;;  %v3856_v56 = vadd.f32 %v3855_v49, %v2407_v63  ;;  %v2409_v29 = vpop.f32.mrb[67].mxu1 }
 0x34f   : > { %v2633_v44 = vadd.f32 %v3856_v56, %v5809_v51  ;;  %v2820_v35 = vmax.f32 %v2630_v60, 0.0 }
 0x351   : > { %v2821_v2 = vmax.f32 %v2633_v44, 0.0 }
 0x352   : > { %v2412_v39 = vpop.f32.mrb[68].mxu1 }
 0x353   : > { %v3858_v38 = vadd.f32 %v3857_v46, %v2412_v39  ;;  %v2414_v7 = vpop.f32.mrb[69].mxu1  ;;  %v2868_v47 = vpack.c.bf16 %v2821_v2, %v2820_v35 }
 0x354   : > { %v2415_v33 = vpop.f32.mrb[70].mxu1 }
 0x355   : > { %v2638_v6 = vadd.f32 %v3858_v38, %v5802_v17  ;;  %v3860_v53 = vadd.f32 %v3859_v42, %v2415_v33  ;;  %v2417_v63 = vpop.f32.mrb[71].mxu1  ;;  %3773 = vmatprep.mubr.bf16.mxu0 %v2868_v47 }
 0x357   : > { %v2641_v51 = vadd.f32 %v3860_v53, %v5807_v5  ;;  %v2822_v60 = vmax.f32 %v2638_v6, 0.0 }
 0x359   : > { %v2823_v29 = vmax.f32 %v2641_v51, 0.0 }
 0x35a   : > { %v2420_v56 = vpop.f32.mrb[72].mxu1 }
 0x35b   : > { %v2869_v46 = vpack.c.bf16 %v2823_v29, %v2822_v60  ;;  %v3862_v39 = vadd.f32 %v3861_v13, %v2420_v56  ;;  %v2422_v2 = vpop.f32.mrb[73].mxu1 }
 0x35c   : > { %v2423_v35 = vpop.f32.mrb[74].mxu1 }
 0x35d   : > { %v2646_v38 = vadd.f32 %v3862_v39, %v5815_v30  ;;  %v3864_v17 = vadd.f32 %v3863_v52, %v2423_v35  ;;  %v2425_v44 = vpop.f32.mrb[75].mxu1  ;;  %3774 = vmatmul.mubr.bf16.vlgmr.msra.gmra.mrb[192].mxu0 %v2869_v46 }
 0x35f   : > { %v2649_v5 = vadd.f32 %v3864_v17, %v5819_v8  ;;  %v2824_v49 = vmax.f32 %v2646_v38, 0.0 }
 0x361   : > { %v2825_v9 = vmax.f32 %v2649_v5, 0.0 }
 0x362   : > { %v2428_v42 = vpop.f32.mrb[76].mxu1 }
 0x363   : > { %v3866_v7 = vadd.f32 %v3865_v45, %v2428_v42  ;;  %v2430_v47 = vpop.f32.mrb[77].mxu1  ;;  %v2870_v33 = vpack.c.bf16 %v2825_v9, %v2824_v49 }
 0x364   : > { %v2431_v6 = vpop.f32.mrb[78].mxu1 }
 0x365   : > { %v2654_v30 = vadd.f32 %v3866_v7, %v5812_v15  ;;  %v3868_v53 = vadd.f32 %v3867_v10, %v2431_v6  ;;  %v2433_v63 = vpop.f32.mrb[79].mxu1  ;;  %3777 = vmatprep.mubr.bf16.mxu0 %v2870_v33 }
 0x367   : > { %v2657_v8 = vadd.f32 %v3868_v53, %v5817_v36  ;;  %v2826_v51 = vmax.f32 %v2654_v30, 0.0 }
 0x369   : > { %v2827_v13 = vmax.f32 %v2657_v8, 0.0 }
 0x36a   : > { %v2436_v60 = vpop.f32.mrb[80].mxu1 }
 0x36b   : > { %v3870_v29 = vadd.f32 %v3869_v41, %v2436_v60  ;;  %v2438_v56 = vpop.f32.mrb[81].mxu1  ;;  %v2871_v52 = vpack.c.bf16 %v2827_v13, %v2826_v51  ;;  %v5958_v41 = vpop.f32.mrb[188].mxu0 }
 0x36c   : > { %v2439_v46 = vpop.f32.mrb[82].mxu1 }
 0x36d   : > { %v2662_v15 = vadd.f32 %v3870_v29, %v5825_v58  ;;  %v3872_v39 = vadd.f32 %v3871_v50, %v2439_v46  ;;  %v2441_v2 = vpop.f32.mrb[83].mxu1  ;;  %3778 = vmatmul.mubr.bf16.gmra.mrb[196].mxu0 %v2871_v52 }
 0x36f   : > { %v2665_v36 = vadd.f32 %v3872_v39, %v5829_v0  ;;  %v2828_v35 = vmax.f32 %v2662_v15, 0.0 }
 0x371   : > { %v2829_v38 = vmax.f32 %v2665_v36, 0.0 }
 0x372   : > { %v2444_v17 = vpop.f32.mrb[84].mxu1 }
 0x373   : > { %v3874_v44 = vadd.f32 %v3873_v43, %v2444_v17  ;;  %v2446_v5 = vpop.f32.mrb[85].mxu1  ;;  %v2872_v45 = vpack.c.bf16 %v2829_v38, %v2828_v35 }
 0x374   : > { %v2447_v49 = vpop.f32.mrb[86].mxu1 }
 0x375   : > { %v2670_v58 = vadd.f32 %v3874_v44, %v5822_v37  ;;  %v3876_v9 = vadd.f32 %v3875_v57, %v2447_v49  ;;  %v2449_v42 = vpop.f32.mrb[87].mxu1  ;;  %3781 = vmatprep.mubr.bf16.mxu0 %v2872_v45 }
 0x377   : > { %v2673_v0 = vadd.f32 %v3876_v9, %v5827_v12  ;;  %v2830_v10 = vmax.f32 %v2670_v58, 0.0  ;;  %v5960_v12 = vpop.f32.mrb[189].mxu0 }
 0x378   : > { %v5963_v51 = vpop.f32.mrb[190].mxu0 }
 0x379   : > { %v2831_v7 = vmax.f32 %v2673_v0, 0.0  ;;  %v5965_v13 = vpop.f32.mrb[191].mxu0 }
 0x37a   : > { %v2452_v47 = vpop.f32.mrb[88].mxu1 }
 0x37b   : > { %v3878_v33 = vadd.f32 %v3877_v11, %v2452_v47  ;;  %v2454_v6 = vpop.f32.mrb[89].mxu1  ;;  %v2873_v30 = vpack.c.bf16 %v2831_v7, %v2830_v10 }
 0x37c   : > { %v2455_v53 = vpop.f32.mrb[90].mxu1 }
 0x37d   : > { %v2678_v37 = vadd.f32 %v3878_v33, %v5835_v23  ;;  %v3880_v63 = vadd.f32 %v3879_v32, %v2455_v53  ;;  %v2457_v8 = vpop.f32.mrb[91].mxu1  ;;  %3782 = vmatmul.mubr.bf16.gmra.mrb[200].mxu0 %v2873_v30  ;;  %v3883_v23 = vadd.f32 %v5915_v27, %v5796_v21  ;;  %v1797_v21 = vadd.f32 %v5915_v27, %v5589_v48 }
 0x37e   : > { %v1805_v48 = vadd.f32 %v5915_v27, %v5601_v40  ;;  %v1813_v40 = vadd.f32 %v5915_v27, %v5613_v1  ;;  %v1821_v1 = vadd.f32 %v5915_v27, %v5625_v34 }
 0x37f   : > { %v2681_v16 = vadd.f32 %v3880_v63, %v5839_v18  ;;  %v2832_v60 = vmax.f32 %v2678_v37, 0.0 }
 0x381   : > { %v2833_v50 = vmax.f32 %v2681_v16, 0.0 }
 0x382   : > { %v2460_v29 = vpop.f32.mrb[92].mxu1 }
 0x383   : > { %v3882_v56 = vadd.f32 %v3881_v22, %v2460_v29  ;;  %v2462_v52 = vpop.f32.mrb[93].mxu1  ;;  %v2874_v46 = vpack.c.bf16 %v2833_v50, %v2832_v60 }
 0x384   : > { %v2463_v15 = vpop.f32.mrb[94].mxu1 }
 0x385   : > { %v2686_v39 = vadd.f32 %v3882_v56, %v5832_v59  ;;  %v3884_v18 = vadd.f32 %v3883_v23, %v2463_v15  ;;  %v2465_v2 = vpop.f32.mrb[95].mxu1  ;;  %3785 = vmatprep.mubr.bf16.mxu0 %v2874_v46 }
 0x387   : > { %v2689_v36 = vadd.f32 %v3884_v18, %v5837_v24  ;;  %v2834_v43 = vmax.f32 %v2686_v39, 0.0  ;;  %v6654_v18 = vld [vmem:[#allocation6_spill] sm:$0xff] }
 0x388   : > { %v1826_v14 = vadd.f32 %v5915_v27, %v6654_v18 }
 0x389   : > { %v2835_v35 = vmax.f32 %v2689_v36, 0.0 }
 0x38a   : > { %v2468_v38 = vpop.f32.mrb[0].mxu1 }
 0x38b   : > { %v3886_v17 = vadd.f32 %v2468_v38, %v1794_v19  ;;  %v2470_v57 = vpop.f32.mrb[1].mxu1  ;;  %v2875_v44 = vpack.c.bf16 %v2835_v35, %v2834_v43  ;;  %v6655_v43 = vld [vmem:[#allocation4_spill] sm:$0xff] }
 0x38c   : > { %v2471_v5 = vpop.f32.mrb[2].mxu1  ;;  %v1829_v34 = vadd.f32 %v5915_v27, %v6655_v43  ;;  %v6656_v57 = vld [vmem:[#allocation36_spill] sm:$0xff] }
 0x38d   : > { %v2694_v59 = vadd.f32 %v3886_v17, %v5845_v4  ;;  %v3888_v45 = vadd.f32 %v2471_v5, %v1797_v21  ;;  %v2473_v49 = vpop.f32.mrb[3].mxu1  ;;  %3786 = vmatmul.mubr.bf16.gmra.mrb[204].mxu0 %v2875_v44 }
 0x38f   : > { %v2697_v24 = vadd.f32 %v3888_v45, %v5849_v54  ;;  %v2836_v58 = vmax.f32 %v2694_v59, 0.0  ;;  %v6657_v59 = vld [vmem:[#allocation30_spill] sm:$0xff]  ;;  %v6658_v45 = vld [vmem:[#allocation3_spill] sm:$0xff] }
 0x390   : > { %v1834_v49 = vadd.f32 %v5915_v27, %v6658_v45 }
 0x391   : > { %v2837_v9 = vmax.f32 %v2697_v24, 0.0 }
 0x392   : > { %v2476_v42 = vpop.f32.mrb[4].mxu1 }
 0x393   : > { %v3890_v0 = vadd.f32 %v2476_v42, %v1802_v62  ;;  %v2478_v11 = vpop.f32.mrb[5].mxu1  ;;  %v2876_v10 = vpack.c.bf16 %v2837_v9, %v2836_v58  ;;  %v6659_v9 = vld [vmem:[#allocation15_spill] sm:$0xff] }
 0x394   : > { %v2479_v7 = vpop.f32.mrb[6].mxu1  ;;  %v1837_v42 = vadd.f32 %v5915_v27, %v6659_v9 }
 0x395   : > { %v2702_v4 = vadd.f32 %v3890_v0, %v5842_v25  ;;  %v3892_v47 = vadd.f32 %v2479_v7, %v1805_v48  ;;  %v2481_v32 = vpop.f32.mrb[7].mxu1  ;;  %3789 = vmatprep.mubr.bf16.mxu0 %v2876_v10  ;;  %v6660_v7 = vld [vmem:[#allocation37_spill] sm:$0xff] }
 0x397   : > { %v2705_v54 = vadd.f32 %v3892_v47, %v5847_v28  ;;  %v2838_v33 = vmax.f32 %v2702_v4, 0.0 }
 0x399   : > { %v2839_v6 = vmax.f32 %v2705_v54, 0.0  ;;  %v6661_v54 = vld [vmem:[#allocation32_spill] sm:$0xff] }
 0x39a   : > { %v2484_v30 = vpop.f32.mrb[8].mxu1 }
 0x39b   : > { %v3894_v53 = vadd.f32 %v2484_v30, %v1810_v3  ;;  %v2486_v37 = vpop.f32.mrb[9].mxu1  ;;  %v2877_v63 = vpack.c.bf16 %v2839_v6, %v2838_v33  ;;  %v6662_v33 = vld [vmem:[#allocation14_spill] sm:$0xff] }
 0x39c   : > { %v2487_v8 = vpop.f32.mrb[10].mxu1  ;;  %v1842_v6 = vadd.f32 %v5915_v27, %v6662_v33  ;;  %v6663_v37 = vld [vmem:[#allocation11_spill] sm:$0xff] }
 0x39d   : > { %v2710_v25 = vadd.f32 %v3894_v53, %v5855_v61  ;;  %v3896_v16 = vadd.f32 %v2487_v8, %v1813_v40  ;;  %v2489_v22 = vpop.f32.mrb[11].mxu1  ;;  %3790 = vmatmul.mubr.bf16.gmra.mrb[208].mxu0 %v2877_v63  ;;  %v1845_v63 = vadd.f32 %v5915_v27, %v6663_v37 }
 0x39f   : > { %v2713_v28 = vadd.f32 %v3896_v16, %v5859_v55  ;;  %v2840_v60 = vmax.f32 %v2710_v25, 0.0 }
 0x3a1   : > { %v2841_v50 = vmax.f32 %v2713_v28, 0.0  ;;  %v6664_v28 = vld [vmem:[#allocation56_spill] sm:$0xff] }
 0x3a2   : > { %v2492_v29 = vpop.f32.mrb[12].mxu1 }
 0x3a3   : > { %v3898_v23 = vadd.f32 %v2492_v29, %v1818_v31  ;;  %v2494_v56 = vpop.f32.mrb[13].mxu1  ;;  %v2878_v52 = vpack.c.bf16 %v2841_v50, %v2840_v60  ;;  %v6665_v29 = vld [vmem:[#allocation38_spill] sm:$0xff] }
 0x3a4   : > { %v2495_v46 = vpop.f32.mrb[14].mxu1 }
 0x3a5   : > { %v2718_v61 = vadd.f32 %v3898_v23, %v5852_v20  ;;  %v3900_v15 = vadd.f32 %v2495_v46, %v1821_v1  ;;  %v2497_v39 = vpop.f32.mrb[15].mxu1  ;;  %3793 = vmatprep.mubr.bf16.mxu0 %v2878_v52  ;;  %v6666_v23 = vld [vmem:[#allocation9_spill] sm:$0xff] }
 0x3a6   : > { %v1850_v56 = vadd.f32 %v5915_v27, %v6666_v23 }
 0x3a7   : > { %v2721_v55 = vadd.f32 %v3900_v15, %v5857_v26  ;;  %v2842_v2 = vmax.f32 %v2718_v61, 0.0  ;;  %v6667_v15 = vld [vmem:[#allocation13_spill] sm:$0xff] }
 0x3a8   : > { %v1853_v39 = vadd.f32 %v5915_v27, %v6667_v15 }
 0x3a9   : > { %v2843_v36 = vmax.f32 %v2721_v55, 0.0 }
 0x3aa   : > { %v2500_v19 = vpop.f32.mrb[16].mxu1 }
 0x3ab   : > { %v3902_v35 = vadd.f32 %v2500_v19, %v1826_v14  ;;  %v2502_v38 = vpop.f32.mrb[17].mxu1  ;;  %v2879_v21 = vpack.c.bf16 %v2843_v36, %v2842_v2  ;;  %v6668_v36 = vld [vmem:[#allocation57_spill] sm:$0xff] }
 0x3ac   : > { %v2503_v17 = vpop.f32.mrb[18].mxu1 }
 0x3ad   : > { %v2726_v20 = vadd.f32 %v3902_v35, %v6656_v57  ;;  %v3904_v44 = vadd.f32 %v2503_v17, %v1829_v34  ;;  %v2505_v5 = vpop.f32.mrb[19].mxu1  ;;  %3794 = vmatmul.mubr.bf16.gmra.mrb[212].mxu0 %v2879_v21  ;;  %v6669_v35 = vld [vmem:[#allocation34_spill] sm:$0xff]  ;;  %v6670_v21 = vld [vmem:[#allocation16_spill] sm:$0xff] }
 0x3ae   : > { %v1858_v17 = vadd.f32 %v5915_v27, %v6670_v21  ;;  %v6671_v5 = vld [vmem:[#allocation47_spill] sm:$0xff] }
 0x3af   : > { %v2729_v26 = vadd.f32 %v3904_v44, %v6657_v59  ;;  %v2844_v24 = vmax.f32 %v2726_v20, 0.0  ;;  %v1861_v59 = vadd.f32 %v5915_v27, %v6671_v5 }
 0x3b1   : > { %v2845_v62 = vmax.f32 %v2729_v26, 0.0 }
 0x3b2   : > { %v2508_v58 = vpop.f32.mrb[20].mxu1 }
 0x3b3   : > { %v3906_v48 = vadd.f32 %v2508_v58, %v1834_v49  ;;  %v2510_v0 = vpop.f32.mrb[21].mxu1  ;;  %v2880_v11 = vpack.c.bf16 %v2845_v62, %v2844_v24  ;;  %v6672_v62 = vld [vmem:[#allocation29_spill] sm:$0xff] }
 0x3b4   : > { %v2511_v10 = vpop.f32.mrb[22].mxu1 }
 0x3b5   : > { %v2734_v4 = vadd.f32 %v3906_v48, %v6660_v7  ;;  %v3908_v47 = vadd.f32 %v2511_v10, %v1837_v42  ;;  %v2513_v32 = vpop.f32.mrb[23].mxu1  ;;  %3797 = vmatprep.mubr.bf16.mxu0 %v2880_v11  ;;  %v6673_v48 = vld [vmem:[#allocation63_spill] sm:$0xff]  ;;  %v6674_v11 = vld [vmem:[#allocation10_spill] sm:$0xff] }
 0x3b6   : > { %v1866_v10 = vadd.f32 %v5915_v27, %v6674_v11  ;;  %v6675_v32 = vld [vmem:[#allocation8_spill] sm:$0xff] }
 0x3b7   : > { %v2737_v3 = vadd.f32 %v3908_v47, %v6661_v54  ;;  %v2846_v30 = vmax.f32 %v2734_v4, 0.0  ;;  %v1869_v54 = vadd.f32 %v5915_v27, %v6675_v32 }
 0x3b9   : > { %v2847_v40 = vmax.f32 %v2737_v3, 0.0 }
 0x3ba   : > { %v2516_v53 = vpop.f32.mrb[24].mxu1 }
 0x3bb   : > { %v3910_v8 = vadd.f32 %v2516_v53, %v1842_v6  ;;  %v2518_v25 = vpop.f32.mrb[25].mxu1  ;;  %v2881_v16 = vpack.c.bf16 %v2847_v40, %v2846_v30  ;;  %v6676_v40 = vld [vmem:[#allocation31_spill] sm:$0xff] }
 0x3bc   : > { %v2519_v22 = vpop.f32.mrb[26].mxu1 }
 0x3bd   : > { %v2742_v31 = vadd.f32 %v3910_v8, %v6664_v28  ;;  %v3912_v60 = vadd.f32 %v2519_v22, %v1845_v63  ;;  %v2521_v50 = vpop.f32.mrb[27].mxu1  ;;  %3798 = vmatmul.mubr.bf16.gmra.mrb[216].mxu0 %v2881_v16  ;;  %v6677_v8 = vld [vmem:[#allocation61_spill] sm:$0xff]  ;;  %v6678_v16 = vld [vmem:[#allocation26_spill] sm:$0xff] }
 0x3be   : > { %v1874_v22 = vadd.f32 %v5915_v27, %v6678_v16  ;;  %v6679_v50 = vld [vmem:[#allocation25_spill] sm:$0xff] }
 0x3bf   : > { %v2745_v1 = vadd.f32 %v3912_v60, %v6665_v29  ;;  %v2848_v52 = vmax.f32 %v2742_v31, 0.0  ;;  %v1877_v29 = vadd.f32 %v5915_v27, %v6679_v50 }
 0x3c1   : > { %v2849_v46 = vmax.f32 %v2745_v1, 0.0 }
 0x3c2   : > { %v2524_v61 = vpop.f32.mrb[28].mxu1 }
 0x3c3   : > { %v3914_v55 = vadd.f32 %v2524_v61, %v1850_v56  ;;  %v2526_v18 = vpop.f32.mrb[29].mxu1  ;;  %v2882_v14 = vpack.c.bf16 %v2849_v46, %v2848_v52  ;;  %v6680_v46 = vld [vmem:[#allocation41_spill] sm:$0xff] }
 0x3c4   : > { %v2527_v2 = vpop.f32.mrb[30].mxu1 }
 0x3c5   : > { %v2750_v19 = vadd.f32 %v3914_v55, %v6668_v36  ;;  %v3916_v43 = vadd.f32 %v2527_v2, %v1853_v39  ;;  %v2529_v34 = vpop.f32.mrb[31].mxu1  ;;  %3801 = vmatprep.mubr.bf16.mxu0 %v2882_v14  ;;  %v6681_v55 = vld [vmem:[#allocation66_spill] sm:$0xff]  ;;  %v6682_v14 = vld [vmem:[#allocation21_spill] sm:$0xff] }
 0x3c6   : > { %v1882_v2 = vadd.f32 %v5915_v27, %v6682_v14  ;;  %v6683_v34 = vld [vmem:[#allocation19_spill] sm:$0xff] }
 0x3c7   : > { %v2753_v38 = vadd.f32 %v3916_v43, %v6669_v35  ;;  %v2850_v57 = vmax.f32 %v2750_v19, 0.0  ;;  %v1885_v35 = vadd.f32 %v5915_v27, %v6683_v34 }
 0x3c9   : > { %v2851_v20 = vmax.f32 %v2753_v38, 0.0 }
 0x3ca   : > { %v2532_v44 = vpop.f32.mrb[32].mxu1 }
 0x3cb   : > { %v3918_v26 = vadd.f32 %v2532_v44, %v1858_v17  ;;  %v2534_v45 = vpop.f32.mrb[33].mxu1  ;;  %v2883_v49 = vpack.c.bf16 %v2851_v20, %v2850_v57  ;;  %v6684_v20 = vld [vmem:[#allocation45_spill] sm:$0xff] }
 0x3cc   : > { %v2535_v24 = vpop.f32.mrb[34].mxu1 }
 0x3cd   : > { %v2758_v58 = vadd.f32 %v3918_v26, %v6672_v62  ;;  %v3920_v9 = vadd.f32 %v2535_v24, %v1861_v59  ;;  %v2537_v42 = vpop.f32.mrb[35].mxu1  ;;  %3802 = vmatmul.mubr.bf16.gmra.mrb[220].mxu0 %v2883_v49  ;;  %v6685_v26 = vld [vmem:[#allocation69_spill] sm:$0xff]  ;;  %v6686_v49 = vld [vmem:[#allocation44_spill] sm:$0xff] }
 0x3ce   : > { %v1890_v24 = vadd.f32 %v5915_v27, %v6686_v49  ;;  %v6687_v42 = vld [vmem:[#allocation43_spill] sm:$0xff] }
 0x3cf   : > { %v2761_v0 = vadd.f32 %v3920_v9, %v6673_v48  ;;  %v2852_v7 = vmax.f32 %v2758_v58, 0.0  ;;  %v1893_v48 = vadd.f32 %v5915_v27, %v6687_v42 }
 0x3d1   : > { %v2853_v4 = vmax.f32 %v2761_v0, 0.0 }
 0x3d2   : > { %v2540_v47 = vpop.f32.mrb[36].mxu1 }
 0x3d3   : > { %v3922_v3 = vadd.f32 %v2540_v47, %v1866_v10  ;;  %v2542_v33 = vpop.f32.mrb[37].mxu1  ;;  %v2884_v6 = vpack.c.bf16 %v2853_v4, %v2852_v7  ;;  %v6688_v4 = vld [vmem:[#allocation40_spill] sm:$0xff] }
 0x3d4   : > { %v2543_v30 = vpop.f32.mrb[38].mxu1 }
 0x3d5   : > { %v2766_v53 = vadd.f32 %v3922_v3, %v6676_v40  ;;  %v3924_v37 = vadd.f32 %v2543_v30, %v1869_v54  ;;  %v2545_v63 = vpop.f32.mrb[39].mxu1  ;;  %3805 = vmatprep.mubr.bf16.mxu0 %v2884_v6  ;;  %v6689_v3 = vld [vmem:[#allocation58_spill] sm:$0xff]  ;;  %v6690_v6 = vld [vmem:[#allocation24_spill] sm:$0xff] }
 0x3d6   : > { %v1898_v30 = vadd.f32 %v5915_v27, %v6690_v6  ;;  %v6691_v63 = vld [vmem:[#allocation27_spill] sm:$0xff] }
 0x3d7   : > { %v2769_v25 = vadd.f32 %v3924_v37, %v6677_v8  ;;  %v2854_v28 = vmax.f32 %v2766_v53, 0.0  ;;  %v1901_v8 = vadd.f32 %v5915_v27, %v6691_v63 }
 0x3d9   : > { %v2855_v31 = vmax.f32 %v2769_v25, 0.0 }
 0x3da   : > { %v2548_v60 = vpop.f32.mrb[40].mxu1 }
 0x3db   : > { %v3926_v1 = vadd.f32 %v2548_v60, %v1874_v22  ;;  %v2550_v23 = vpop.f32.mrb[41].mxu1  ;;  %v2885_v56 = vpack.c.bf16 %v2855_v31, %v2854_v28  ;;  %v6692_v31 = vld [vmem:[#allocation42_spill] sm:$0xff] }
 0x3dc   : > { %v2551_v52 = vpop.f32.mrb[42].mxu1 }
 0x3dd   : > { %v2774_v61 = vadd.f32 %v3926_v1, %v6680_v46  ;;  %v3928_v15 = vadd.f32 %v2551_v52, %v1877_v29  ;;  %v2553_v39 = vpop.f32.mrb[43].mxu1  ;;  %3806 = vmatmul.mubr.bf16.gmra.mrb[224].mxu0 %v2885_v56  ;;  %v6693_v1 = vld [vmem:[#allocation74_spill] sm:$0xff]  ;;  %v6694_v56 = vld [vmem:[#allocation20_spill] sm:$0xff] }
 0x3de   : > { %v1906_v52 = vadd.f32 %v5915_v27, %v6694_v56  ;;  %v6695_v39 = vld [vmem:[#allocation18_spill] sm:$0xff]  ;;  %v2913_v56 = vld [vmem:[%s4318_s12 + $0x28] sm:$0xff] }
 0x3df   : > { %v2777_v18 = vadd.f32 %v3928_v15, %v6681_v55  ;;  %v2856_v36 = vmax.f32 %v2774_v61, 0.0  ;;  %v1909_v55 = vadd.f32 %v5915_v27, %v6695_v39 }
 0x3e1   : > { %v2857_v19 = vmax.f32 %v2777_v18, 0.0 }
 0x3e2   : > { %v2556_v43 = vpop.f32.mrb[44].mxu1 }
 0x3e3   : > { %v3930_v38 = vadd.f32 %v2556_v43, %v1882_v2  ;;  %v2558_v21 = vpop.f32.mrb[45].mxu1  ;;  %v2886_v17 = vpack.c.bf16 %v2857_v19, %v2856_v36 }
 0x3e4   : > { %v2559_v57 = vpop.f32.mrb[46].mxu1 }
 0x3e5   : > { %v2782_v44 = vadd.f32 %v3930_v38, %v6684_v20  ;;  %v3932_v5 = vadd.f32 %v2559_v57, %v1885_v35  ;;  %v2561_v59 = vpop.f32.mrb[47].mxu1  ;;  %3809 = vmatprep.mubr.bf16.mxu0 %v2886_v17  ;;  %v6696_v38 = vld [vmem:[#allocation50_spill] sm:$0xff] }
 0x3e6   : > { %v1914_v21 = vadd.f32 %v5915_v27, %v6696_v38 }
 0x3e7   : > { %v2785_v45 = vadd.f32 %v3932_v5, %v6685_v26  ;;  %v2858_v62 = vmax.f32 %v2782_v44, 0.0  ;;  %v6697_v44 = vld [vmem:[#allocation49_spill] sm:$0xff] }
 0x3e8   : > { %v1917_v5 = vadd.f32 %v5915_v27, %v6697_v44  ;;  %v6072_v27 = vld [vmem:[%s6234_s6] ss:$0 sm:$0xff]  ;;  %v2917_v44 = vld [vmem:[%s4318_s12 + $0x48] sm:$0xff] }
 0x3e9   : > { %v2859_v58 = vmax.f32 %v2785_v45, 0.0 }
 0x3ea   : > { %v2564_v9 = vpop.f32.mrb[48].mxu1 }
 0x3eb   : > { %v3934_v0 = vadd.f32 %v2564_v9, %v1890_v24  ;;  %v2566_v11 = vpop.f32.mrb[49].mxu1  ;;  %v2887_v10 = vpack.c.bf16 %v2859_v58, %v2858_v62 }
 0x3ec   : > { %v2567_v7 = vpop.f32.mrb[50].mxu1  ;;  %v2908_v11 = vld [vmem:[%s4318_s12] sm:$0xff] }
 0x3ed   : > { %v2790_v47 = vadd.f32 %v3934_v0, %v6688_v4  ;;  %v3936_v32 = vadd.f32 %v2567_v7, %v1893_v48  ;;  %v2569_v54 = vpop.f32.mrb[51].mxu1  ;;  %3810 = vmatmul.mubr.bf16.gmra.mrb[228].mxu0 %v2887_v10  ;;  %v2910_v48 = vld [vmem:[%s4318_s12 + $0x10] sm:$0xff] }
 0x3ee   : > { %v2909_v54 = vld [vmem:[%s4318_s12 + $0x8] sm:$0xff] }
 0x3ef   : > { %v2793_v33 = vadd.f32 %v3936_v32, %v6689_v3  ;;  %v2860_v40 = vmax.f32 %v2790_v47, 0.0 }
 0x3f1   : > { %v2861_v53 = vmax.f32 %v2793_v33, 0.0 }
 0x3f2   : > { %v2572_v37 = vpop.f32.mrb[52].mxu1 }
 0x3f3   : > { %v3938_v25 = vadd.f32 %v2572_v37, %v1898_v30  ;;  %v2574_v16 = vpop.f32.mrb[53].mxu1  ;;  %v2888_v22 = vpack.c.bf16 %v2861_v53, %v2860_v40 }
 0x3f4   : > { %v2575_v28 = vpop.f32.mrb[54].mxu1 }
 0x3f5   : > { %v2798_v60 = vadd.f32 %v3938_v25, %v6692_v31  ;;  %v3940_v50 = vadd.f32 %v2575_v28, %v1901_v8  ;;  %v2577_v29 = vpop.f32.mrb[55].mxu1  ;;  %3813 = vmatprep.mubr.bf16.mxu0 %v2888_v22  ;;  %v2914_v25 = vld [vmem:[%s4318_s12 + $0x30] sm:$0xff]  ;;  %v2912_v28 = vld [vmem:[%s4318_s12 + $0x20] sm:$0xff] }
 0x3f7   : > { %v2801_v23 = vadd.f32 %v3940_v50, %v6693_v1  ;;  %v2862_v46 = vmax.f32 %v2798_v60, 0.0  ;;  %v2915_v50 = vld [vmem:[%s4318_s12 + $0x38] sm:$0xff] }
 0x3f9   : > { %v2863_v61 = vmax.f32 %v2801_v23, 0.0 }
 0x3fa   : > { %v2580_v15 = vpop.f32.mrb[56].mxu1 }
 0x3fb   : > { %v3942_v18 = vadd.f32 %v2580_v15, %v1906_v52  ;;  %v2582_v14 = vpop.f32.mrb[57].mxu1  ;;  %v2889_v2 = vpack.c.bf16 %v2863_v61, %v2862_v46 }
 0x3fc   : > { %v2583_v36 = vpop.f32.mrb[58].mxu1 }
 0x3fd   : > { %v3944_v19 = vadd.f32 %v2583_v36, %v1909_v55  ;;  %v2806_v43 = vadd.f32 %v3942_v18, %v5960_v12  ;;  %v2585_v34 = vpop.f32.mrb[59].mxu1  ;;  %3814 = vmatmul.mubr.bf16.gmra.mrb[232].mxu0 %v2889_v2  ;;  %v2918_v36 = vld [vmem:[%s4318_s12 + $0x50] sm:$0xff] }
 0x3fe   : > { %v2916_v34 = vld [vmem:[%s4318_s12 + $0x40] sm:$0xff] }
 0x3ff   : > { %v2809_v35 = vadd.f32 %v3944_v19, %v5965_v13  ;;  %v2864_v17 = vmax.f32 %v2806_v43, 0.0 }
 0x401   : > { %v2865_v57 = vmax.f32 %v2809_v35, 0.0 }
 0x402   : > { %v2588_v20 = vpop.f32.mrb[60].mxu1 }
 0x403   : > { %v2890_v59 = vpack.c.bf16 %v2865_v57, %v2864_v17  ;;  %v3946_v26 = vadd.f32 %v2588_v20, %v1914_v21  ;;  %v2590_v45 = vpop.f32.mrb[61].mxu1  ;;  %v2919_v21 = vld [vmem:[%s4318_s12 + $0x58] sm:$0xff] }
 0x404   : > { %v2591_v49 = vpop.f32.mrb[62].mxu1 }
 0x405   : > { %v2814_v12 = vadd.f32 %v3946_v26, %v5958_v41  ;;  %v3948_v24 = vadd.f32 %v2591_v49, %v1917_v5  ;;  %v2593_v13 = vpop.f32.mrb[63].mxu1  ;;  %3817 = vmatprep.mubr.bf16.mxu0 %v2890_v59 }
 0x407   : > { %v2817_v62 = vadd.f32 %v3948_v24, %v5963_v51  ;;  %v2866_v58 = vmax.f32 %v2814_v12, 0.0  ;;  %v2911_v51 = vld [vmem:[%s4318_s12 + $0x18] sm:$0xff] }
 0x409   : > { %v2867_v9 = vmax.f32 %v2817_v62, 0.0 }
 0x40b   : > { %v2891_v42 = vpack.c.bf16 %v2867_v9, %v2866_v58  ;;  %v2922_v58 = vld [vmem:[%s4318_s12 + $0x70] sm:$0xff] }
 0x40d   : > { %3818 = vmatmul.mubr.bf16.gmra.mrb[236].mxu0 %v2891_v42 }
 0x430   : > { %v3775_v0 = vpop.f32.mrb[192].mxu0 }
 0x431   : > { %v3053_v41 = vadd.f32 %v3775_v0, %v6072_v27  ;;  %v3044_v10 = vpop.f32.mrb[193].mxu0 }
 0x432   : > { %v3045_v7 = vadd.f32 %v6072_v27, %v3044_v10  ;;  %v3776_v4 = vpop.f32.mrb[194].mxu0 }
 0x433   : > { %v3237_v47 = vadd.f32 %v3053_v41, %v2910_v48  ;;  %v3056_v32 = vadd.f32 %v3776_v4, %v6072_v27  ;;  %v3047_v3 = vpop.f32.mrb[195].mxu0  ;;  %v2920_v48 = vld [vmem:[%s4318_s12 + $0x60] sm:$0xff]  ;;  %v2921_v4 = vld [vmem:[%s4318_s12 + $0x68] sm:$0xff] }
 0x434   : > { %v3235_v33 = vadd.f32 %v3045_v7, %v2908_v11  ;;  %v3048_v6 = vadd.f32 %v6072_v27, %v3047_v3  ;;  %v2923_v11 = vld [vmem:[%s4318_s12 + $0x78] sm:$0xff] }
 0x435   : > { %v3285_v30 = vmax.f32 %v3237_v47, 0.0  ;;  %v3238_v40 = vadd.f32 %v3056_v32, %v2911_v51 }
 0x436   : > { %v3283_v53 = vmax.f32 %v3235_v33, 0.0  ;;  %v3236_v37 = vadd.f32 %v3048_v6, %v2909_v54 }
 0x437   : > { %3333 = vst [vmem:[%s6086_s26 + $0x10] sm:$0xff] %v3285_v30  ;;  %v3286_v63 = vmax.f32 %v3238_v40, 0.0 }
 0x438   : > { %3331 = vst [vmem:[%s6086_s26] sm:$0xff] %v3283_v53  ;;  %v3284_v8 = vmax.f32 %v3236_v37, 0.0  ;;  %v2926_v37 = vld [vmem:[%s4318_s12 + $0x90] sm:$0xff] }
 0x439   : > { %3334 = vst [vmem:[%s6086_s26 + $0x18] sm:$0xff] %v3286_v63 }
 0x43a   : > { %3332 = vst [vmem:[%s6086_s26 + $0x8] sm:$0xff] %v3284_v8 }
 0x440   : > { %v3779_v16 = vpop.f32.mrb[196].mxu0 }
 0x441   : > { %v3069_v22 = vadd.f32 %v3779_v16, %v6072_v27  ;;  %v3060_v31 = vpop.f32.mrb[197].mxu0 }
 0x442   : > { %v3061_v60 = vadd.f32 %v6072_v27, %v3060_v31  ;;  %v3780_v29 = vpop.f32.mrb[198].mxu0 }
 0x443   : > { %v3241_v1 = vadd.f32 %v3069_v22, %v2914_v25  ;;  %v3072_v23 = vadd.f32 %v3780_v29, %v6072_v27  ;;  %v3063_v52 = vpop.f32.mrb[199].mxu0  ;;  %v2924_v25 = vld [vmem:[%s4318_s12 + $0x80] sm:$0xff]  ;;  %v2925_v29 = vld [vmem:[%s4318_s12 + $0x88] sm:$0xff] }
 0x444   : > { %v3239_v46 = vadd.f32 %v3061_v60, %v2912_v28  ;;  %v3064_v61 = vadd.f32 %v6072_v27, %v3063_v52  ;;  %v2927_v28 = vld [vmem:[%s4318_s12 + $0x98] sm:$0xff] }
 0x445   : > { %v3289_v15 = vmax.f32 %v3241_v1, 0.0  ;;  %v3242_v39 = vadd.f32 %v3072_v23, %v2915_v50 }
 0x446   : > { %v3287_v55 = vmax.f32 %v3239_v46, 0.0  ;;  %v3240_v18 = vadd.f32 %v3064_v61, %v2913_v56 }
 0x447   : > { %3337 = vst [vmem:[%s6086_s26 + $0x30] sm:$0xff] %v3289_v15  ;;  %v3290_v14 = vmax.f32 %v3242_v39, 0.0 }
 0x448   : > { %3335 = vst [vmem:[%s6086_s26 + $0x20] sm:$0xff] %v3287_v55  ;;  %v3288_v2 = vmax.f32 %v3240_v18, 0.0  ;;  %v2930_v18 = vld [vmem:[%s4318_s12 + $0xb0] sm:$0xff] }
 0x449   : > { %3338 = vst [vmem:[%s6086_s26 + $0x38] sm:$0xff] %v3290_v14 }
 0x44a   : > { %3336 = vst [vmem:[%s6086_s26 + $0x28] sm:$0xff] %v3288_v2 }
 0x450   : > { %v3783_v19 = vpop.f32.mrb[200].mxu0 }
 0x451   : > { %v3085_v43 = vadd.f32 %v3783_v19, %v6072_v27  ;;  %v3076_v35 = vpop.f32.mrb[201].mxu0 }
 0x452   : > { %v3077_v38 = vadd.f32 %v6072_v27, %v3076_v35  ;;  %v3784_v17 = vpop.f32.mrb[202].mxu0 }
 0x453   : > { %v3245_v57 = vadd.f32 %v3085_v43, %v2918_v36  ;;  %v3088_v20 = vadd.f32 %v3784_v17, %v6072_v27  ;;  %v3079_v5 = vpop.f32.mrb[203].mxu0  ;;  %v2928_v36 = vld [vmem:[%s4318_s12 + $0xa0] sm:$0xff]  ;;  %v2929_v17 = vld [vmem:[%s4318_s12 + $0xa8] sm:$0xff] }
 0x454   : > { %v3243_v59 = vadd.f32 %v3077_v38, %v2916_v34  ;;  %v3080_v26 = vadd.f32 %v6072_v27, %v3079_v5  ;;  %v2931_v34 = vld [vmem:[%s4318_s12 + $0xb8] sm:$0xff] }
 0x455   : > { %v3293_v45 = vmax.f32 %v3245_v57, 0.0  ;;  %v3246_v49 = vadd.f32 %v3088_v20, %v2919_v21 }
 0x456   : > { %v3291_v12 = vmax.f32 %v3243_v59, 0.0  ;;  %v3244_v24 = vadd.f32 %v3080_v26, %v2917_v44 }
 0x457   : > { %3341 = vst [vmem:[%s6086_s26 + $0x50] sm:$0xff] %v3293_v45  ;;  %v3294_v13 = vmax.f32 %v3246_v49, 0.0 }
 0x458   : > { %3339 = vst [vmem:[%s6086_s26 + $0x40] sm:$0xff] %v3291_v12  ;;  %v3292_v62 = vmax.f32 %v3244_v24, 0.0  ;;  %v2934_v24 = vld [vmem:[%s4318_s12 + $0xd0] sm:$0xff] }
 0x459   : > { %3342 = vst [vmem:[%s6086_s26 + $0x58] sm:$0xff] %v3294_v13 }
 0x45a   : > { %3340 = vst [vmem:[%s6086_s26 + $0x48] sm:$0xff] %v3292_v62 }
 0x460   : > { %v3787_v9 = vpop.f32.mrb[204].mxu0 }
 0x461   : > { %v3101_v42 = vadd.f32 %v3787_v9, %v6072_v27  ;;  %v3092_v0 = vpop.f32.mrb[205].mxu0 }
 0x462   : > { %v3093_v41 = vadd.f32 %v6072_v27, %v3092_v0  ;;  %v3788_v10 = vpop.f32.mrb[206].mxu0 }
 0x463   : > { %v3249_v7 = vadd.f32 %v3101_v42, %v2922_v58  ;;  %v3104_v51 = vadd.f32 %v3788_v10, %v6072_v27  ;;  %v3095_v47 = vpop.f32.mrb[207].mxu0  ;;  %v2932_v58 = vld [vmem:[%s4318_s12 + $0xc0] sm:$0xff]  ;;  %v2933_v10 = vld [vmem:[%s4318_s12 + $0xc8] sm:$0xff] }
 0x464   : > { %v3247_v32 = vadd.f32 %v3093_v41, %v2920_v48  ;;  %v3096_v54 = vadd.f32 %v6072_v27, %v3095_v47  ;;  %v2935_v48 = vld [vmem:[%s4318_s12 + $0xd8] sm:$0xff] }
 0x465   : > { %v3297_v3 = vmax.f32 %v3249_v7, 0.0  ;;  %v3250_v33 = vadd.f32 %v3104_v51, %v2923_v11 }
 0x466   : > { %v3295_v6 = vmax.f32 %v3247_v32, 0.0  ;;  %v3248_v30 = vadd.f32 %v3096_v54, %v2921_v4 }
 0x467   : > { %3345 = vst [vmem:[%s6086_s26 + $0x70] sm:$0xff] %v3297_v3  ;;  %v3298_v40 = vmax.f32 %v3250_v33, 0.0 }
 0x468   : > { %3343 = vst [vmem:[%s6086_s26 + $0x60] sm:$0xff] %v3295_v6  ;;  %v3296_v53 = vmax.f32 %v3248_v30, 0.0  ;;  %v2938_v30 = vld [vmem:[%s4318_s12 + $0xf0] sm:$0xff] }
 0x469   : > { %3346 = vst [vmem:[%s6086_s26 + $0x78] sm:$0xff] %v3298_v40 }
 0x46a   : > { %3344 = vst [vmem:[%s6086_s26 + $0x68] sm:$0xff] %v3296_v53 }
 0x470   : > { %v3791_v63 = vpop.f32.mrb[208].mxu0 }
 0x471   : > { %v3117_v8 = vadd.f32 %v3791_v63, %v6072_v27  ;;  %v3108_v16 = vpop.f32.mrb[209].mxu0 }
 0x472   : > { %v3109_v22 = vadd.f32 %v6072_v27, %v3108_v16  ;;  %v3792_v31 = vpop.f32.mrb[210].mxu0 }
 0x473   : > { %v3253_v60 = vadd.f32 %v3117_v8, %v2926_v37  ;;  %v3120_v50 = vadd.f32 %v3792_v31, %v6072_v27  ;;  %v3111_v1 = vpop.f32.mrb[211].mxu0  ;;  %v2936_v37 = vld [vmem:[%s4318_s12 + $0xe0] sm:$0xff]  ;;  %v2937_v31 = vld [vmem:[%s4318_s12 + $0xe8] sm:$0xff] }
 0x474   : > { %v3251_v23 = vadd.f32 %v3109_v22, %v2924_v25  ;;  %v3112_v56 = vadd.f32 %v6072_v27, %v3111_v1  ;;  %v2939_v25 = vld [vmem:[%s4318_s12 + $0xf8] sm:$0xff] }
 0x475   : > { %v3301_v52 = vmax.f32 %v3253_v60, 0.0  ;;  %v3254_v46 = vadd.f32 %v3120_v50, %v2927_v28 }
 0x476   : > { %v3299_v61 = vmax.f32 %v3251_v23, 0.0  ;;  %v3252_v15 = vadd.f32 %v3112_v56, %v2925_v29 }
 0x477   : > { %3349 = vst [vmem:[%s6086_s26 + $0x90] sm:$0xff] %v3301_v52  ;;  %v3302_v39 = vmax.f32 %v3254_v46, 0.0 }
 0x478   : > { %3347 = vst [vmem:[%s6086_s26 + $0x80] sm:$0xff] %v3299_v61  ;;  %v3300_v55 = vmax.f32 %v3252_v15, 0.0  ;;  %v2942_v15 = vld [vmem:[%s4318_s12 + $0x110] sm:$0xff] }
 0x479   : > { %3350 = vst [vmem:[%s6086_s26 + $0x98] sm:$0xff] %v3302_v39 }
 0x47a   : > { %3348 = vst [vmem:[%s6086_s26 + $0x88] sm:$0xff] %v3300_v55 }
 0x480   : > { %v3795_v14 = vpop.f32.mrb[212].mxu0 }
 0x481   : > { %v3133_v2 = vadd.f32 %v3795_v14, %v6072_v27  ;;  %v3124_v19 = vpop.f32.mrb[213].mxu0 }
 0x482   : > { %v3125_v43 = vadd.f32 %v6072_v27, %v3124_v19  ;;  %v3796_v35 = vpop.f32.mrb[214].mxu0 }
 0x483   : > { %v3257_v38 = vadd.f32 %v3133_v2, %v2930_v18  ;;  %v3136_v21 = vadd.f32 %v3796_v35, %v6072_v27  ;;  %v3127_v57 = vpop.f32.mrb[215].mxu0  ;;  %v2940_v18 = vld [vmem:[%s4318_s12 + $0x100] sm:$0xff]  ;;  %v2941_v35 = vld [vmem:[%s4318_s12 + $0x108] sm:$0xff] }
 0x484   : > { %v3255_v20 = vadd.f32 %v3125_v43, %v2928_v36  ;;  %v3128_v44 = vadd.f32 %v6072_v27, %v3127_v57  ;;  %v2943_v36 = vld [vmem:[%s4318_s12 + $0x118] sm:$0xff] }
 0x485   : > { %v3305_v5 = vmax.f32 %v3257_v38, 0.0  ;;  %v3258_v59 = vadd.f32 %v3136_v21, %v2931_v34 }
 0x486   : > { %v3303_v26 = vmax.f32 %v3255_v20, 0.0  ;;  %v3256_v45 = vadd.f32 %v3128_v44, %v2929_v17 }
 0x487   : > { %3353 = vst [vmem:[%s6086_s26 + $0xb0] sm:$0xff] %v3305_v5  ;;  %v3306_v49 = vmax.f32 %v3258_v59, 0.0 }
 0x488   : > { %3351 = vst [vmem:[%s6086_s26 + $0xa0] sm:$0xff] %v3303_v26  ;;  %v3304_v12 = vmax.f32 %v3256_v45, 0.0  ;;  %v2946_v45 = vld [vmem:[%s4318_s12 + $0x130] sm:$0xff] }
 0x489   : > { %3354 = vst [vmem:[%s6086_s26 + $0xb8] sm:$0xff] %v3306_v49 }
 0x48a   : > { %3352 = vst [vmem:[%s6086_s26 + $0xa8] sm:$0xff] %v3304_v12 }
 0x490   : > { %v3799_v13 = vpop.f32.mrb[216].mxu0 }
 0x491   : > { %v3149_v62 = vadd.f32 %v3799_v13, %v6072_v27  ;;  %v3140_v9 = vpop.f32.mrb[217].mxu0 }
 0x492   : > { %v3141_v42 = vadd.f32 %v6072_v27, %v3140_v9  ;;  %v3800_v0 = vpop.f32.mrb[218].mxu0 }
 0x493   : > { %v3261_v41 = vadd.f32 %v3149_v62, %v2934_v24  ;;  %v3152_v11 = vadd.f32 %v3800_v0, %v6072_v27  ;;  %v3143_v7 = vpop.f32.mrb[219].mxu0  ;;  %v2944_v24 = vld [vmem:[%s4318_s12 + $0x120] sm:$0xff]  ;;  %v2945_v0 = vld [vmem:[%s4318_s12 + $0x128] sm:$0xff] }
 0x494   : > { %v3259_v51 = vadd.f32 %v3141_v42, %v2932_v58  ;;  %v3144_v4 = vadd.f32 %v6072_v27, %v3143_v7  ;;  %v2947_v58 = vld [vmem:[%s4318_s12 + $0x138] sm:$0xff] }
 0x495   : > { %v3309_v47 = vmax.f32 %v3261_v41, 0.0  ;;  %v3262_v32 = vadd.f32 %v3152_v11, %v2935_v48 }
 0x496   : > { %v3307_v54 = vmax.f32 %v3259_v51, 0.0  ;;  %v3260_v3 = vadd.f32 %v3144_v4, %v2933_v10 }
 0x497   : > { %3357 = vst [vmem:[%s6086_s26 + $0xd0] sm:$0xff] %v3309_v47  ;;  %v3310_v33 = vmax.f32 %v3262_v32, 0.0 }
 0x498   : > { %3355 = vst [vmem:[%s6086_s26 + $0xc0] sm:$0xff] %v3307_v54  ;;  %v3308_v6 = vmax.f32 %v3260_v3, 0.0  ;;  %v2950_v3 = vld [vmem:[%s4318_s12 + $0x150] sm:$0xff] }
 0x499   : > { %3358 = vst [vmem:[%s6086_s26 + $0xd8] sm:$0xff] %v3310_v33 }
 0x49a   : > { %3356 = vst [vmem:[%s6086_s26 + $0xc8] sm:$0xff] %v3308_v6 }
 0x4a0   : > { %v3803_v40 = vpop.f32.mrb[220].mxu0 }
 0x4a1   : > { %v3165_v53 = vadd.f32 %v3803_v40, %v6072_v27  ;;  %v3156_v63 = vpop.f32.mrb[221].mxu0 }
 0x4a2   : > { %v3157_v8 = vadd.f32 %v6072_v27, %v3156_v63  ;;  %v3804_v16 = vpop.f32.mrb[222].mxu0 }
 0x4a3   : > { %v3265_v22 = vadd.f32 %v3165_v53, %v2938_v30  ;;  %v3168_v28 = vadd.f32 %v3804_v16, %v6072_v27  ;;  %v3159_v60 = vpop.f32.mrb[223].mxu0  ;;  %v2948_v30 = vld [vmem:[%s4318_s12 + $0x140] sm:$0xff]  ;;  %v2949_v16 = vld [vmem:[%s4318_s12 + $0x148] sm:$0xff] }
 0x4a4   : > { %v3263_v50 = vadd.f32 %v3157_v8, %v2936_v37  ;;  %v3160_v29 = vadd.f32 %v6072_v27, %v3159_v60  ;;  %v2951_v37 = vld [vmem:[%s4318_s12 + $0x158] sm:$0xff] }
 0x4a5   : > { %v3313_v1 = vmax.f32 %v3265_v22, 0.0  ;;  %v3266_v23 = vadd.f32 %v3168_v28, %v2939_v25 }
 0x4a6   : > { %v3311_v56 = vmax.f32 %v3263_v50, 0.0  ;;  %v3264_v52 = vadd.f32 %v3160_v29, %v2937_v31 }
 0x4a7   : > { %3361 = vst [vmem:[%s6086_s26 + $0xf0] sm:$0xff] %v3313_v1  ;;  %v3314_v46 = vmax.f32 %v3266_v23, 0.0 }
 0x4a8   : > { %3359 = vst [vmem:[%s6086_s26 + $0xe0] sm:$0xff] %v3311_v56  ;;  %v3312_v61 = vmax.f32 %v3264_v52, 0.0  ;;  %v2954_v52 = vld [vmem:[%s4318_s12 + $0x170] sm:$0xff] }
 0x4a9   : > { %3362 = vst [vmem:[%s6086_s26 + $0xf8] sm:$0xff] %v3314_v46 }
 0x4aa   : > { %3360 = vst [vmem:[%s6086_s26 + $0xe8] sm:$0xff] %v3312_v61 }
 0x4b0   : > { %v3807_v39 = vpop.f32.mrb[224].mxu0 }
 0x4b1   : > { %v3181_v55 = vadd.f32 %v3807_v39, %v6072_v27  ;;  %v3172_v14 = vpop.f32.mrb[225].mxu0 }
 0x4b2   : > { %v3173_v2 = vadd.f32 %v6072_v27, %v3172_v14  ;;  %v3808_v19 = vpop.f32.mrb[226].mxu0 }
 0x4b3   : > { %v3269_v43 = vadd.f32 %v3181_v55, %v2942_v15  ;;  %v3184_v34 = vadd.f32 %v3808_v19, %v6072_v27  ;;  %v3175_v38 = vpop.f32.mrb[227].mxu0  ;;  %v2952_v15 = vld [vmem:[%s4318_s12 + $0x160] sm:$0xff]  ;;  %v2953_v19 = vld [vmem:[%s4318_s12 + $0x168] sm:$0xff] }
 0x4b4   : > { %v3267_v21 = vadd.f32 %v3173_v2, %v2940_v18  ;;  %v3176_v17 = vadd.f32 %v6072_v27, %v3175_v38  ;;  %v2955_v18 = vld [vmem:[%s4318_s12 + $0x178] sm:$0xff] }
 0x4b5   : > { %v3317_v57 = vmax.f32 %v3269_v43, 0.0  ;;  %v3270_v20 = vadd.f32 %v3184_v34, %v2943_v36 }
 0x4b6   : > { %v3315_v44 = vmax.f32 %v3267_v21, 0.0  ;;  %v3268_v5 = vadd.f32 %v3176_v17, %v2941_v35 }
 0x4b7   : > { %3365 = vst [vmem:[%s6086_s26 + $0x110] sm:$0xff] %v3317_v57  ;;  %v3318_v59 = vmax.f32 %v3270_v20, 0.0 }
 0x4b8   : > { %3363 = vst [vmem:[%s6086_s26 + $0x100] sm:$0xff] %v3315_v44  ;;  %v3316_v26 = vmax.f32 %v3268_v5, 0.0 }
 0x4b9   : > { %3366 = vst [vmem:[%s6086_s26 + $0x118] sm:$0xff] %v3318_v59 }
 0x4ba   : > { %3364 = vst [vmem:[%s6086_s26 + $0x108] sm:$0xff] %v3316_v26 }
 0x4c0   : > { %v3811_v49 = vpop.f32.mrb[228].mxu0 }
 0x4c1   : > { %v3197_v12 = vadd.f32 %v3811_v49, %v6072_v27  ;;  %v3188_v13 = vpop.f32.mrb[229].mxu0 }
 0x4c2   : > { %v3189_v62 = vadd.f32 %v6072_v27, %v3188_v13  ;;  %v3812_v9 = vpop.f32.mrb[230].mxu0 }
 0x4c3   : > { %v3273_v42 = vadd.f32 %v3197_v12, %v2946_v45  ;;  %v3200_v48 = vadd.f32 %v3812_v9, %v6072_v27  ;;  %v3191_v41 = vpop.f32.mrb[231].mxu0 }
 0x4c4   : > { %v3271_v11 = vadd.f32 %v3189_v62, %v2944_v24  ;;  %v3192_v10 = vadd.f32 %v6072_v27, %v3191_v41 }
 0x4c5   : > { %v3321_v7 = vmax.f32 %v3273_v42, 0.0  ;;  %v3274_v51 = vadd.f32 %v3200_v48, %v2947_v58 }
 0x4c6   : > { %v3319_v4 = vmax.f32 %v3271_v11, 0.0  ;;  %v3272_v47 = vadd.f32 %v3192_v10, %v2945_v0 }
 0x4c7   : > { %3369 = vst [vmem:[%s6086_s26 + $0x130] sm:$0xff] %v3321_v7  ;;  %v3322_v32 = vmax.f32 %v3274_v51, 0.0 }
 0x4c8   : > { %3367 = vst [vmem:[%s6086_s26 + $0x120] sm:$0xff] %v3319_v4  ;;  %v3320_v54 = vmax.f32 %v3272_v47, 0.0 }
 0x4c9   : > { %3370 = vst [vmem:[%s6086_s26 + $0x138] sm:$0xff] %v3322_v32 }
 0x4ca   : > { %3368 = vst [vmem:[%s6086_s26 + $0x128] sm:$0xff] %v3320_v54 }
 0x4d0   : > { %v3815_v33 = vpop.f32.mrb[232].mxu0 }
 0x4d1   : > { %v3213_v6 = vadd.f32 %v3815_v33, %v6072_v27  ;;  %v3204_v40 = vpop.f32.mrb[233].mxu0 }
 0x4d2   : > { %v3205_v53 = vadd.f32 %v6072_v27, %v3204_v40  ;;  %v3816_v63 = vpop.f32.mrb[234].mxu0 }
 0x4d3   : > { %v3277_v8 = vadd.f32 %v3213_v6, %v2950_v3  ;;  %v3216_v25 = vadd.f32 %v3816_v63, %v6072_v27  ;;  %v3207_v22 = vpop.f32.mrb[235].mxu0 }
 0x4d4   : > { %v3275_v28 = vadd.f32 %v3205_v53, %v2948_v30  ;;  %v3208_v31 = vadd.f32 %v6072_v27, %v3207_v22 }
 0x4d5   : > { %v3325_v60 = vmax.f32 %v3277_v8, 0.0  ;;  %v3278_v50 = vadd.f32 %v3216_v25, %v2951_v37 }
 0x4d6   : > { %v3323_v29 = vmax.f32 %v3275_v28, 0.0  ;;  %v3276_v1 = vadd.f32 %v3208_v31, %v2949_v16 }
 0x4d7   : > { %3373 = vst [vmem:[%s6086_s26 + $0x150] sm:$0xff] %v3325_v60  ;;  %v3326_v23 = vmax.f32 %v3278_v50, 0.0 }
 0x4d8   : > { %3371 = vst [vmem:[%s6086_s26 + $0x140] sm:$0xff] %v3323_v29  ;;  %v3324_v56 = vmax.f32 %v3276_v1, 0.0 }
 0x4d9   : > { %3374 = vst [vmem:[%s6086_s26 + $0x158] sm:$0xff] %v3326_v23 }
 0x4da   : > { %3372 = vst [vmem:[%s6086_s26 + $0x148] sm:$0xff] %v3324_v56 }
 0x4e0   : > { %v3819_v46 = vpop.f32.mrb[236].mxu0 }
 0x4e1   : > { %v3229_v61 = vadd.f32 %v3819_v46, %v6072_v27  ;;  %v3220_v39 = vpop.f32.mrb[237].mxu0 }
 0x4e2   : > { %v3221_v55 = vadd.f32 %v6072_v27, %v3220_v39  ;;  %v3820_v14 = vpop.f32.mrb[238].mxu0 }
 0x4e3   : > { %v3281_v2 = vadd.f32 %v3229_v61, %v2954_v52  ;;  %v3232_v36 = vadd.f32 %v3820_v14, %v6072_v27  ;;  %v3223_v43 = vpop.f32.mrb[239].mxu0 }
 0x4e4   : > { %v3279_v34 = vadd.f32 %v3221_v55, %v2952_v15  ;;  %v3224_v35 = vadd.f32 %v6072_v27, %v3223_v43 }
 0x4e5   : > { %v3329_v38 = vmax.f32 %v3281_v2, 0.0  ;;  %v3282_v21 = vadd.f32 %v3232_v36, %v2955_v18 }
 0x4e6   : > { %v3327_v17 = vmax.f32 %v3279_v34, 0.0  ;;  %v3280_v57 = vadd.f32 %v3224_v35, %v2953_v19 }
 0x4e7   : > { %3377 = vst [vmem:[%s6086_s26 + $0x170] sm:$0xff] %v3329_v38  ;;  %v3330_v20 = vmax.f32 %v3282_v21, 0.0 }
 0x4e8   : > { %3375 = vst [vmem:[%s6086_s26 + $0x160] sm:$0xff] %v3327_v17  ;;  %v3328_v44 = vmax.f32 %v3280_v57, 0.0 }
 0x4e9   : > { %3378 = vst [vmem:[%s6086_s26 + $0x178] sm:$0xff] %v3330_v20 }
 0x4ea   : > { %3376 = vst [vmem:[%s6086_s26 + $0x168] sm:$0xff] %v3328_v44 }
 0x4eb PF: > { %s17_s24 = sadd.s32 1, %s4247_s24  }
 0x4ec   : > { %p14_p4 = scmp.ge.s32.totalorder %s17_s24, 4  }
 0x4ee   :  { %16 = sbr.rel (!%p14_p4) target bundleno = 1 (0x1), region = 78 }

</bundles_post_ra>
